<compile_context>
chip_gen: v5e
topology: v5e:2x2
jax: 0.10.0
libtpu: 0.0.40
codegen_flags: <defaults>
</compile_context>

<pallas_src>
import jax
import jax.numpy as jnp
from jax import lax
from jax.experimental import pallas as pl
from jax.experimental.pallas import tpu as pltpu


# --------------------------------------------------------------------------
# Fused bidirectional GRU layer kernel.
#
# Grid = (T // CHUNK,), "arbitrary" (hidden state carried in VMEM scratch).
# Each grid step:
#   1) computes GI for the whole chunk / both directions as chunk-wide MXU
#      matmuls into VMEM scratch (fused input projection),
#   2) runs the serial recurrence over the chunk: one (B,H)@(H,3H) matmul per
#      direction per timestep, gates in f32,
#   3) stores the chunk outputs (bf16) and, at the last grid step, the final
#      hidden states (f32).
# The backward direction is handled purely by index maps (its chunk index runs
# nc-1 .. 0) plus in-chunk index reversal, so its outputs land in forward
# temporal order with no [::-1] HBM passes.
# --------------------------------------------------------------------------
def _make_gru_kernel(num_parts):
    def kernel(*refs):
        P = num_parts
        fwd_parts = refs[0:P]                          # each (C, B, Dp) bf16
        bwd_parts = refs[P:2 * P]                      # each (C, B, Dp) bf16
        wih_ref, whh_ref, bgi_ref, bhn_ref = refs[2 * P:2 * P + 4]
        yf_ref, yb_ref, hout_ref = refs[2 * P + 4:2 * P + 7]
        gif_s, gib_s, h_s = refs[2 * P + 7:2 * P + 10]

        C, B, H = yf_ref.shape
        G = 3 * H

        @pl.when(pl.program_id(0) == 0)
        def _():
            h_s[...] = jnp.zeros_like(h_s)

        # ---- fused input projection for the whole chunk (both directions) ----
        def project(part_refs, d):
            acc = None
            for p, pref in enumerate(part_refs):
                xp = pref[...].reshape(C * B, pref.shape[-1])      # bf16
                contrib = jnp.dot(xp, wih_ref[d, p],
                                  preferred_element_type=jnp.float32)
                acc = contrib if acc is None else acc + contrib
            return (acc + bgi_ref[d]).reshape(C, B, G)             # f32

        gif_s[...] = project(fwd_parts, 0)
        gib_s[...] = project(bwd_parts, 1)

        # ---- serial recurrence over the chunk ----
        whh_f = whh_ref[0]                                         # (H, 3H) bf16
        whh_b = whh_ref[1]
        bhn_f = jnp.broadcast_to(bhn_ref[0], (B, H))               # hoisted
        bhn_b = jnp.broadcast_to(bhn_ref[1], (B, H))

        def step(i, carry):
            hf, hb = carry                                         # (B, H) f32
            ghf = jnp.dot(hf.astype(jnp.bfloat16), whh_f,
                          preferred_element_type=jnp.float32)
            ghb = jnp.dot(hb.astype(jnp.bfloat16), whh_b,
                          preferred_element_type=jnp.float32)
            gif = gif_s[i]                                         # (B, 3H)
            gib = gib_s[C - 1 - i]
            # PyTorch gate order [r, z, n]; b_hh's r/z parts are pre-folded
            # into GI, only the n-gate hidden bias stays inside r * (.)
            rzf = jax.nn.sigmoid(gif[:, :2 * H] + ghf[:, :2 * H])
            rzb = jax.nn.sigmoid(gib[:, :2 * H] + ghb[:, :2 * H])
            nf = jnp.tanh(gif[:, 2 * H:] + rzf[:, :H] * (ghf[:, 2 * H:] + bhn_f))
            nb = jnp.tanh(gib[:, 2 * H:] + rzb[:, :H] * (ghb[:, 2 * H:] + bhn_b))
            hf = nf + rzf[:, H:] * (hf - nf)                       # (1-z)n + z h
            hb = nb + rzb[:, H:] * (hb - nb)
            yf_ref[i] = hf.astype(yf_ref.dtype)
            yb_ref[C - 1 - i] = hb.astype(yb_ref.dtype)            # fwd temporal order
            return (hf, hb)

        hf_fin, hb_fin = lax.fori_loop(0, C, step, (h_s[0], h_s[1]),
                                       unroll=min(C, 8))
        h_s[0] = hf_fin
        h_s[1] = hb_fin

        @pl.when(pl.program_id(0) == pl.num_programs(0) - 1)
        def _():
            hout_ref[0] = hf_fin      # fwd final hidden (t = T-1)
            hout_ref[1] = hb_fin      # bwd final hidden (t = 0)

    return kernel


def gru_bidir_layer(in_parts, w_ih, w_hh, b_gi, b_hn, chunk):
    """One bidirectional GRU layer.

    in_parts: list of time-major (T, B, Dp) bf16 arrays; layer 0 passes [x],
              upper layers pass [y_fwd, y_bwd] of the previous layer so the
              (T, B, 2H) concat is never materialized in HBM.
    Returns (y_fwd, y_bwd) bf16 (T, B, H) and h_final f32 (2, B, H).
    """
    T, B, _ = in_parts[0].shape
    H = w_hh.shape[1]
    G = 3 * H
    P = len(in_parts)
    assert T % chunk == 0
    nc = T // chunk
    C = chunk

    fwd_specs = [pl.BlockSpec((C, B, a.shape[-1]), lambda c: (c, 0, 0))
                 for a in in_parts]
    bwd_specs = [pl.BlockSpec((C, B, a.shape[-1]), lambda c: (nc - 1 - c, 0, 0))
                 for a in in_parts]
    weight_specs = [
        pl.BlockSpec(w_ih.shape, lambda c: (0, 0, 0, 0)),   # (2, P, Dp, 3H) bf16
        pl.BlockSpec(w_hh.shape, lambda c: (0, 0, 0)),      # (2, H, 3H)     bf16
        pl.BlockSpec(b_gi.shape, lambda c: (0, 0, 0)),      # (2, 1, 3H)     f32
        pl.BlockSpec(b_hn.shape, lambda c: (0, 0, 0)),      # (2, 1, H)      f32
    ]

    return pl.pallas_call(
        _make_gru_kernel(P),
        out_shape=(jax.ShapeDtypeStruct((T, B, H), jnp.bfloat16),
                   jax.ShapeDtypeStruct((T, B, H), jnp.bfloat16),
                   jax.ShapeDtypeStruct((2, B, H), jnp.float32)),
        grid=(nc,),
        in_specs=fwd_specs + bwd_specs + weight_specs,
        out_specs=(pl.BlockSpec((C, B, H), lambda c: (c, 0, 0)),
                   pl.BlockSpec((C, B, H), lambda c: (nc - 1 - c, 0, 0)),
                   pl.BlockSpec((2, B, H), lambda c: (0, 0, 0))),
        scratch_shapes=[pltpu.VMEM((C, B, G), jnp.float32),   # GI fwd chunk
                        pltpu.VMEM((C, B, G), jnp.float32),   # GI bwd chunk
                        pltpu.VMEM((2, B, H), jnp.float32)],  # carried hidden
        compiler_params=pltpu.CompilerParams(
            dimension_semantics=("arbitrary",)),
    )(*(in_parts + in_parts), w_ih, w_hh, b_gi, b_hn)


# --------------------------------- Linear head ---------------------------------
def head_kernel(h_ref, w_ref, b_ref, o_ref):
    # h_ref: (2, B, H) f32 final hiddens (fwd, bwd); w_ref: (2, H, Dpad) f32.
    o_ref[...] = (jnp.dot(h_ref[0], w_ref[0], preferred_element_type=jnp.float32)
                  + jnp.dot(h_ref[1], w_ref[1], preferred_element_type=jnp.float32)
                  + b_ref[...])


def linear_head(h_final, w, b):
    """cat(h_fwd, h_bwd) @ W + b with W pre-padded to a 128-lane multiple."""
    _, B, H = h_final.shape
    Dpad = w.shape[-1]
    return pl.pallas_call(
        head_kernel,
        out_shape=jax.ShapeDtypeStruct((B, Dpad), jnp.float32),
        grid=(1,),
        in_specs=[pl.BlockSpec((2, B, H), lambda i: (0, 0, 0)),
                  pl.BlockSpec((2, H, Dpad), lambda i: (0, 0, 0)),
                  pl.BlockSpec((1, Dpad), lambda i: (0, 0))],
        out_specs=pl.BlockSpec((B, Dpad), lambda i: (0, 0)),
    )(h_final, w, b)


# ------------------------------- Parameter setup -------------------------------
def init_params(key, vocab, E, H, n_layers, out_dim):
    keys = jax.random.split(key, 1 + 4 * n_layers + 2)
    k = 1.0 / (H ** 0.5)
    params = {
        "emb_table": (jax.random.normal(keys[0], (vocab, E), jnp.float32) * 0.02
                      ).astype(jnp.bfloat16),
        "gru": [],
        "out_dim": out_dim,
    }
    ki = 1
    for layer in range(n_layers):
        p_parts = 1 if layer == 0 else 2          # layer 0: [x]; upper: [y_fwd, y_bwd]
        dp = E if layer == 0 else H
        w_ih = jax.random.uniform(keys[ki + 0], (2, p_parts, dp, 3 * H),
                                  jnp.float32, -k, k).astype(jnp.bfloat16)
        w_hh = jax.random.uniform(keys[ki + 1], (2, H, 3 * H),
                                  jnp.float32, -k, k).astype(jnp.bfloat16)
        b_ih = jax.random.uniform(keys[ki + 2], (2, 1, 3 * H), jnp.float32, -k, k)
        b_hh = jax.random.uniform(keys[ki + 3], (2, 1, 3 * H), jnp.float32, -k, k)
        # Fold b_hh's r/z columns into the input-projection bias; only the
        # n-gate hidden bias must stay separate (it sits inside r * (.)).
        b_gi = b_ih + jnp.concatenate(
            [b_hh[..., :2 * H], jnp.zeros((2, 1, H), jnp.float32)], axis=-1)
        b_hn = b_hh[..., 2 * H:]
        params["gru"].append({"w_ih": w_ih, "w_hh": w_hh,
                              "b_gi": b_gi, "b_hn": b_hn})
        ki += 4
    kl = 1.0 / ((2 * H) ** 0.5)
    dpad = max(128, -(-out_dim // 128) * 128)
    w_out = jax.random.uniform(keys[ki], (2 * H, out_dim), jnp.float32, -kl, kl)
    b_out = jax.random.uniform(keys[ki + 1], (1, out_dim), jnp.float32, -kl, kl)
    # Pre-pad once to a 128-lane multiple (lane-dense head stores) and split
    # into (fwd, bwd) halves so the head consumes the (2, B, H) output directly.
    params["w_out_p"] = jnp.pad(w_out, ((0, 0), (0, dpad - out_dim))
                                ).reshape(2, H, dpad)
    params["b_out_p"] = jnp.pad(b_out, ((0, 0), (0, dpad - out_dim)))
    return params


# --------------------------------- Forward pass ---------------------------------
def bert_gru_sentiment_forward(text, params, *, time_chunk=8):
    # TODO(synk): the full pretrained BERT encoder is not reproduced; its frozen
    # (no_grad) output bert(text)[0] of shape (B, T, E) is stood in by a
    # deterministic embedding-table lookup with the same output shape.
    emb = jnp.take(params["emb_table"], text, axis=0)        # (B, T, E) bf16
    x = jnp.transpose(emb, (1, 0, 2))                        # (T, B, E) time-major

    parts = [x]
    h_final = None
    for p in params["gru"]:
        y_fwd, y_bwd, h_final = gru_bidir_layer(
            parts, p["w_ih"], p["w_hh"], p["b_gi"], p["b_hn"], time_chunk)
        parts = [y_fwd, y_bwd]        # next layer reads both; no (T,B,2H) concat
        # inter-layer GRU dropout (p=0.25): identity under eval semantics

    # hiddens[-2] = last-layer fwd final, hiddens[-1] = last-layer bwd final.
    # self.dropout on their concat: identity under eval semantics.
    logits = linear_head(h_final, params["w_out_p"], params["b_out_p"])
    return logits[:, :params["out_dim"]]                     # (B, output_dim)


if __name__ == "__main__":
    # Small, (8,128)-aligned stand-ins (real module: E=768, H=256, out_dim=5).
    B, T = 8, 16
    VOCAB, E = 128, 128
    H, N_LAYERS, OUT_DIM = 128, 2, 5
    TIME_CHUNK = 8            # use 32-64 for real sequence lengths

    key = jax.random.PRNGKey(0)
    k_text, k_param = jax.random.split(key)
    text = jax.random.randint(k_text, (B, T), 0, VOCAB, dtype=jnp.int32)
    params = init_params(k_param, VOCAB, E, H, N_LAYERS, OUT_DIM)

    logits = bert_gru_sentiment_forward(text, params, time_chunk=TIME_CHUNK)
    jax.block_until_ready(logits)
    assert logits.shape == (B, OUT_DIM), logits.shape
    assert logits.dtype == jnp.float32
    print("KERNEL_OK")
</pallas_src>

<mosaic_0001>
module attributes {stable_mosaic.version = 11 : i64} {
  func.func @kernel(%arg0: i32, %arg1: memref<8x8x128xbf16, #tpu.memory_space<vmem>>, %arg2: memref<8x8x128xbf16, #tpu.memory_space<vmem>>, %arg3: memref<2x1x128x384xbf16, #tpu.memory_space<vmem>>, %arg4: memref<2x128x384xbf16, #tpu.memory_space<vmem>>, %arg5: memref<2x1x384xf32, #tpu.memory_space<vmem>>, %arg6: memref<2x1x128xf32, #tpu.memory_space<vmem>>, %arg7: memref<8x8x128xbf16, #tpu.memory_space<vmem>>, %arg8: memref<8x8x128xbf16, #tpu.memory_space<vmem>>, %arg9: memref<2x8x128xf32, #tpu.memory_space<vmem>>, %arg10: memref<8x8x384xf32, #tpu.memory_space<vmem>>, %arg11: memref<8x8x384xf32, #tpu.memory_space<vmem>>, %arg12: memref<2x8x128xf32, #tpu.memory_space<vmem>>) attributes {dimension_semantics = [#tpu.dimension_semantics<arbitrary>], iteration_bounds = array<i64: 2>, scalar_prefetch = 0 : i64, scratch_operands = 3 : i64, tpu.core_type = #tpu.core_type<tc>, window_params = [{transform_indices = @transform_0, window_bounds = array<i64: 8, 8, 128>}, {transform_indices = @transform_1, window_bounds = array<i64: 8, 8, 128>}, {pipeline_mode = #tpu.pipeline_mode<synchronous>, transform_indices = @transform_2, window_bounds = array<i64: 2, 1, 128, 384>}, {pipeline_mode = #tpu.pipeline_mode<synchronous>, transform_indices = @transform_3, window_bounds = array<i64: 2, 128, 384>}, {pipeline_mode = #tpu.pipeline_mode<synchronous>, transform_indices = @transform_4, window_bounds = array<i64: 2, 1, 384>}, {pipeline_mode = #tpu.pipeline_mode<synchronous>, transform_indices = @transform_5, window_bounds = array<i64: 2, 1, 128>}, {transform_indices = @transform_6, window_bounds = array<i64: 8, 8, 128>}, {transform_indices = @transform_7, window_bounds = array<i64: 8, 8, 128>}, {pipeline_mode = #tpu.pipeline_mode<synchronous>, transform_indices = @transform_8, window_bounds = array<i64: 2, 8, 128>}]} {
    %c0_i32 = arith.constant 0 : i32
    %0 = arith.cmpi eq, %arg0, %c0_i32 : i32
    %1 = arith.extui %0 : i1 to i32
    %c0_i32_0 = arith.constant 0 : i32
    %2 = arith.cmpi ne, %1, %c0_i32_0 : i32
    scf.if %2 {
      %cst_165 = arith.constant 0.000000e+00 : f32
      %530 = vector.broadcast %cst_165 : f32 to vector<2x8x128xf32>
      %c0_166 = arith.constant 0 : index
      %c0_167 = arith.constant 0 : index
      %c0_168 = arith.constant 0 : index
      %531 = vector.load %arg12[%c0_166, %c0_167, %c0_168] : memref<2x8x128xf32, #tpu.memory_space<vmem>>, vector<2x8x128xf32>
      tpu.vector_store %arg12[%c0_166, %c0_167, %c0_168], %530 {strides = array<i32>} : memref<2x8x128xf32, #tpu.memory_space<vmem>>, vector<2x8x128xf32>,
    } else {
    }
    %c0 = arith.constant 0 : index
    %c0_1 = arith.constant 0 : index
    %c0_2 = arith.constant 0 : index
    %3 = vector.load %arg1[%c0, %c0_1, %c0_2] : memref<8x8x128xbf16, #tpu.memory_space<vmem>>, vector<8x8x128xbf16>
    %4 = vector.shape_cast %3 : vector<8x8x128xbf16> to vector<64x128xbf16>
    %c0_3 = arith.constant 0 : index
    %c0_4 = arith.constant 0 : index
    %c0_5 = arith.constant 0 : index
    %c0_6 = arith.constant 0 : index
    %5 = vector.load %arg3[%c0_3, %c0_4, %c0_5, %c0_6] : memref<2x1x128x384xbf16, #tpu.memory_space<vmem>>, vector<1x1x128x384xbf16>
    %6 = vector.shape_cast %5 : vector<1x1x128x384xbf16> to vector<128x384xbf16>
    %cst = arith.constant dense<0.000000e+00> : vector<64x384xf32>
    %7 = tpu.matmul %4, %6, %cst {dimension_numbers = #tpu.dot_dimension_numbers<[1], [0], [0], [1], [0, 0, 1, 1], [], []>} : vector<64x128xbf16>, vector<128x384xbf16>, vector<64x384xf32> -> vector<64x384xf32>
    %c0_7 = arith.constant 0 : index
    %c0_8 = arith.constant 0 : index
    %c0_9 = arith.constant 0 : index
    %8 = vector.load %arg5[%c0_7, %c0_8, %c0_9] : memref<2x1x384xf32, #tpu.memory_space<vmem>>, vector<1x1x384xf32>
    %9 = vector.shape_cast %8 : vector<1x1x384xf32> to vector<1x384xf32>
    %10 = vector.broadcast %9 : vector<1x384xf32> to vector<64x384xf32>
    %11 = arith.addf %7, %10 : vector<64x384xf32>
    %12 = vector.shape_cast %11 : vector<64x384xf32> to vector<8x8x384xf32>
    %c0_10 = arith.constant 0 : index
    %c0_11 = arith.constant 0 : index
    %c0_12 = arith.constant 0 : index
    %13 = vector.load %arg10[%c0_10, %c0_11, %c0_12] : memref<8x8x384xf32, #tpu.memory_space<vmem>>, vector<8x8x384xf32>
    tpu.vector_store %arg10[%c0_10, %c0_11, %c0_12], %12 {strides = array<i32>} : memref<8x8x384xf32, #tpu.memory_space<vmem>>, vector<8x8x384xf32>,
    %c0_13 = arith.constant 0 : index
    %c0_14 = arith.constant 0 : index
    %c0_15 = arith.constant 0 : index
    %14 = vector.load %arg2[%c0_13, %c0_14, %c0_15] : memref<8x8x128xbf16, #tpu.memory_space<vmem>>, vector<8x8x128xbf16>
    %15 = vector.shape_cast %14 : vector<8x8x128xbf16> to vector<64x128xbf16>
    %c1 = arith.constant 1 : index
    %c0_16 = arith.constant 0 : index
    %c0_17 = arith.constant 0 : index
    %c0_18 = arith.constant 0 : index
    %16 = vector.load %arg3[%c1, %c0_16, %c0_17, %c0_18] : memref<2x1x128x384xbf16, #tpu.memory_space<vmem>>, vector<1x1x128x384xbf16>
    %17 = vector.shape_cast %16 : vector<1x1x128x384xbf16> to vector<128x384xbf16>
    %cst_19 = arith.constant dense<0.000000e+00> : vector<64x384xf32>
    %18 = tpu.matmul %15, %17, %cst_19 {dimension_numbers = #tpu.dot_dimension_numbers<[1], [0], [0], [1], [0, 0, 1, 1], [], []>} : vector<64x128xbf16>, vector<128x384xbf16>, vector<64x384xf32> -> vector<64x384xf32>
    %c1_20 = arith.constant 1 : index
    %c0_21 = arith.constant 0 : index
    %c0_22 = arith.constant 0 : index
    %19 = vector.load %arg5[%c1_20, %c0_21, %c0_22] : memref<2x1x384xf32, #tpu.memory_space<vmem>>, vector<1x1x384xf32>
    %20 = vector.shape_cast %19 : vector<1x1x384xf32> to vector<1x384xf32>
    %21 = vector.broadcast %20 : vector<1x384xf32> to vector<64x384xf32>
    %22 = arith.addf %18, %21 : vector<64x384xf32>
    %23 = vector.shape_cast %22 : vector<64x384xf32> to vector<8x8x384xf32>
    %c0_23 = arith.constant 0 : index
    %c0_24 = arith.constant 0 : index
    %c0_25 = arith.constant 0 : index
    %24 = vector.load %arg11[%c0_23, %c0_24, %c0_25] : memref<8x8x384xf32, #tpu.memory_space<vmem>>, vector<8x8x384xf32>
    tpu.vector_store %arg11[%c0_23, %c0_24, %c0_25], %23 {strides = array<i32>} : memref<8x8x384xf32, #tpu.memory_space<vmem>>, vector<8x8x384xf32>,
    %c0_26 = arith.constant 0 : index
    %c0_27 = arith.constant 0 : index
    %c0_28 = arith.constant 0 : index
    %25 = vector.load %arg4[%c0_26, %c0_27, %c0_28] : memref<2x128x384xbf16, #tpu.memory_space<vmem>>, vector<1x128x384xbf16>
    %26 = vector.shape_cast %25 : vector<1x128x384xbf16> to vector<128x384xbf16>
    %c1_29 = arith.constant 1 : index
    %c0_30 = arith.constant 0 : index
    %c0_31 = arith.constant 0 : index
    %27 = vector.load %arg4[%c1_29, %c0_30, %c0_31] : memref<2x128x384xbf16, #tpu.memory_space<vmem>>, vector<1x128x384xbf16>
    %28 = vector.shape_cast %27 : vector<1x128x384xbf16> to vector<128x384xbf16>
    %c0_32 = arith.constant 0 : index
    %c0_33 = arith.constant 0 : index
    %c0_34 = arith.constant 0 : index
    %29 = vector.load %arg6[%c0_32, %c0_33, %c0_34] : memref<2x1x128xf32, #tpu.memory_space<vmem>>, vector<1x1x128xf32>
    %30 = vector.shape_cast %29 : vector<1x1x128xf32> to vector<1x128xf32>
    %31 = vector.shape_cast %30 : vector<1x128xf32> to vector<1x128xf32>
    %32 = vector.broadcast %31 : vector<1x128xf32> to vector<8x128xf32>
    %c1_35 = arith.constant 1 : index
    %c0_36 = arith.constant 0 : index
    %c0_37 = arith.constant 0 : index
    %33 = vector.load %arg6[%c1_35, %c0_36, %c0_37] : memref<2x1x128xf32, #tpu.memory_space<vmem>>, vector<1x1x128xf32>
    %34 = vector.shape_cast %33 : vector<1x1x128xf32> to vector<1x128xf32>
    %35 = vector.shape_cast %34 : vector<1x128xf32> to vector<1x128xf32>
    %36 = vector.broadcast %35 : vector<1x128xf32> to vector<8x128xf32>
    %c0_38 = arith.constant 0 : index
    %c0_39 = arith.constant 0 : index
    %c0_40 = arith.constant 0 : index
    %37 = vector.load %arg12[%c0_38, %c0_39, %c0_40] : memref<2x8x128xf32, #tpu.memory_space<vmem>>, vector<1x8x128xf32>
    %38 = vector.shape_cast %37 : vector<1x8x128xf32> to vector<8x128xf32>
    %c1_41 = arith.constant 1 : index
    %c0_42 = arith.constant 0 : index
    %c0_43 = arith.constant 0 : index
    %39 = vector.load %arg12[%c1_41, %c0_42, %c0_43] : memref<2x8x128xf32, #tpu.memory_space<vmem>>, vector<1x8x128xf32>
    %40 = vector.shape_cast %39 : vector<1x8x128xf32> to vector<8x128xf32>
    %c0_i32_44 = arith.constant 0 : i32
    %41 = arith.truncf %38 : vector<8x128xf32> to vector<8x128xbf16>
    %cst_45 = arith.constant dense<0.000000e+00> : vector<8x384xf32>
    %42 = tpu.matmul %41, %26, %cst_45 {dimension_numbers = #tpu.dot_dimension_numbers<[1], [0], [0], [1], [0, 0, 1, 1], [], []>} : vector<8x128xbf16>, vector<128x384xbf16>, vector<8x384xf32> -> vector<8x384xf32>
    %43 = arith.truncf %40 : vector<8x128xf32> to vector<8x128xbf16>
    %cst_46 = arith.constant dense<0.000000e+00> : vector<8x384xf32>
    %44 = tpu.matmul %43, %28, %cst_46 {dimension_numbers = #tpu.dot_dimension_numbers<[1], [0], [0], [1], [0, 0, 1, 1], [], []>} : vector<8x128xbf16>, vector<128x384xbf16>, vector<8x384xf32> -> vector<8x384xf32>
    %45 = arith.index_cast %c0_i32_44 : i32 to index
    %c0_47 = arith.constant 0 : index
    %c0_48 = arith.constant 0 : index
    %46 = vector.load %arg10[%45, %c0_47, %c0_48] : memref<8x8x384xf32, #tpu.memory_space<vmem>>, vector<1x8x384xf32>
    %47 = vector.shape_cast %46 : vector<1x8x384xf32> to vector<8x384xf32>
    %c7_i32 = arith.constant 7 : i32
    %48 = arith.subi %c7_i32, %c0_i32_44 : i32
    %49 = arith.index_cast %48 : i32 to index
    %c0_49 = arith.constant 0 : index
    %c0_50 = arith.constant 0 : index
    %50 = vector.load %arg11[%49, %c0_49, %c0_50] : memref<8x8x384xf32, #tpu.memory_space<vmem>>, vector<1x8x384xf32>
    %51 = vector.shape_cast %50 : vector<1x8x384xf32> to vector<8x384xf32>
    %52 = vector.extract_strided_slice %47 {offsets = [0, 0], sizes = [8, 256], strides = [1, 1]} : vector<8x384xf32> to vector<8x256xf32>
    %53 = vector.extract_strided_slice %42 {offsets = [0, 0], sizes = [8, 256], strides = [1, 1]} : vector<8x384xf32> to vector<8x256xf32>
    %54 = arith.addf %52, %53 : vector<8x256xf32>
    %55 = arith.negf %54 : vector<8x256xf32>
    %56 = math.exp %55 : vector<8x256xf32>
    %cst_51 = arith.constant 1.000000e+00 : f32
    %57 = vector.broadcast %cst_51 : f32 to vector<8x256xf32>
    %58 = arith.addf %57, %56 : vector<8x256xf32>
    %59 = arith.divf %57, %58 : vector<8x256xf32>
    %60 = vector.extract_strided_slice %51 {offsets = [0, 0], sizes = [8, 256], strides = [1, 1]} : vector<8x384xf32> to vector<8x256xf32>
    %61 = vector.extract_strided_slice %44 {offsets = [0, 0], sizes = [8, 256], strides = [1, 1]} : vector<8x384xf32> to vector<8x256xf32>
    %62 = arith.addf %60, %61 : vector<8x256xf32>
    %63 = arith.negf %62 : vector<8x256xf32>
    %64 = math.exp %63 : vector<8x256xf32>
    %cst_52 = arith.constant 1.000000e+00 : f32
    %65 = vector.broadcast %cst_52 : f32 to vector<8x256xf32>
    %66 = arith.addf %65, %64 : vector<8x256xf32>
    %67 = arith.divf %65, %66 : vector<8x256xf32>
    %68 = vector.extract_strided_slice %47 {offsets = [0, 256], sizes = [8, 128], strides = [1, 1]} : vector<8x384xf32> to vector<8x128xf32>
    %69 = vector.extract_strided_slice %59 {offsets = [0, 0], sizes = [8, 128], strides = [1, 1]} : vector<8x256xf32> to vector<8x128xf32>
    %70 = vector.extract_strided_slice %42 {offsets = [0, 256], sizes = [8, 128], strides = [1, 1]} : vector<8x384xf32> to vector<8x128xf32>
    %71 = arith.addf %70, %32 : vector<8x128xf32>
    %72 = arith.mulf %69, %71 : vector<8x128xf32>
    %73 = arith.addf %68, %72 : vector<8x128xf32>
    %74 = math.tanh %73 : vector<8x128xf32>
    %75 = vector.extract_strided_slice %51 {offsets = [0, 256], sizes = [8, 128], strides = [1, 1]} : vector<8x384xf32> to vector<8x128xf32>
    %76 = vector.extract_strided_slice %67 {offsets = [0, 0], sizes = [8, 128], strides = [1, 1]} : vector<8x256xf32> to vector<8x128xf32>
    %77 = vector.extract_strided_slice %44 {offsets = [0, 256], sizes = [8, 128], strides = [1, 1]} : vector<8x384xf32> to vector<8x128xf32>
    %78 = arith.addf %77, %36 : vector<8x128xf32>
    %79 = arith.mulf %76, %78 : vector<8x128xf32>
    %80 = arith.addf %75, %79 : vector<8x128xf32>
    %81 = math.tanh %80 : vector<8x128xf32>
    %82 = vector.extract_strided_slice %59 {offsets = [0, 128], sizes = [8, 128], strides = [1, 1]} : vector<8x256xf32> to vector<8x128xf32>
    %83 = arith.subf %38, %74 : vector<8x128xf32>
    %84 = arith.mulf %82, %83 : vector<8x128xf32>
    %85 = arith.addf %74, %84 : vector<8x128xf32>
    %86 = vector.extract_strided_slice %67 {offsets = [0, 128], sizes = [8, 128], strides = [1, 1]} : vector<8x256xf32> to vector<8x128xf32>
    %87 = arith.subf %40, %81 : vector<8x128xf32>
    %88 = arith.mulf %86, %87 : vector<8x128xf32>
    %89 = arith.addf %81, %88 : vector<8x128xf32>
    %90 = arith.truncf %85 : vector<8x128xf32> to vector<8x128xbf16>
    %91 = arith.index_cast %c0_i32_44 : i32 to index
    %c0_53 = arith.constant 0 : index
    %c0_54 = arith.constant 0 : index
    %92 = vector.load %arg7[%91, %c0_53, %c0_54] : memref<8x8x128xbf16, #tpu.memory_space<vmem>>, vector<1x8x128xbf16>
    %93 = vector.shape_cast %92 : vector<1x8x128xbf16> to vector<8x128xbf16>
    %94 = vector.shape_cast %90 : vector<8x128xbf16> to vector<1x8x128xbf16>
    tpu.vector_store %arg7[%91, %c0_53, %c0_54], %94 {strides = array<i32>} : memref<8x8x128xbf16, #tpu.memory_space<vmem>>, vector<1x8x128xbf16>,
    %95 = arith.truncf %89 : vector<8x128xf32> to vector<8x128xbf16>
    %c7_i32_55 = arith.constant 7 : i32
    %96 = arith.subi %c7_i32_55, %c0_i32_44 : i32
    %97 = arith.index_cast %96 : i32 to index
    %c0_56 = arith.constant 0 : index
    %c0_57 = arith.constant 0 : index
    %98 = vector.load %arg8[%97, %c0_56, %c0_57] : memref<8x8x128xbf16, #tpu.memory_space<vmem>>, vector<1x8x128xbf16>
    %99 = vector.shape_cast %98 : vector<1x8x128xbf16> to vector<8x128xbf16>
    %100 = vector.shape_cast %95 : vector<8x128xbf16> to vector<1x8x128xbf16>
    tpu.vector_store %arg8[%97, %c0_56, %c0_57], %100 {strides = array<i32>} : memref<8x8x128xbf16, #tpu.memory_space<vmem>>, vector<1x8x128xbf16>,
    %c1_i32 = arith.constant 1 : i32
    %101 = arith.truncf %85 : vector<8x128xf32> to vector<8x128xbf16>
    %cst_58 = arith.constant dense<0.000000e+00> : vector<8x384xf32>
    %102 = tpu.matmul %101, %26, %cst_58 {dimension_numbers = #tpu.dot_dimension_numbers<[1], [0], [0], [1], [0, 0, 1, 1], [], []>} : vector<8x128xbf16>, vector<128x384xbf16>, vector<8x384xf32> -> vector<8x384xf32>
    %103 = arith.truncf %89 : vector<8x128xf32> to vector<8x128xbf16>
    %cst_59 = arith.constant dense<0.000000e+00> : vector<8x384xf32>
    %104 = tpu.matmul %103, %28, %cst_59 {dimension_numbers = #tpu.dot_dimension_numbers<[1], [0], [0], [1], [0, 0, 1, 1], [], []>} : vector<8x128xbf16>, vector<128x384xbf16>, vector<8x384xf32> -> vector<8x384xf32>
    %105 = arith.index_cast %c1_i32 : i32 to index
    %c0_60 = arith.constant 0 : index
    %c0_61 = arith.constant 0 : index
    %106 = vector.load %arg10[%105, %c0_60, %c0_61] : memref<8x8x384xf32, #tpu.memory_space<vmem>>, vector<1x8x384xf32>
    %107 = vector.shape_cast %106 : vector<1x8x384xf32> to vector<8x384xf32>
    %c7_i32_62 = arith.constant 7 : i32
    %108 = arith.subi %c7_i32_62, %c1_i32 : i32
    %109 = arith.index_cast %108 : i32 to index
    %c0_63 = arith.constant 0 : index
    %c0_64 = arith.constant 0 : index
    %110 = vector.load %arg11[%109, %c0_63, %c0_64] : memref<8x8x384xf32, #tpu.memory_space<vmem>>, vector<1x8x384xf32>
    %111 = vector.shape_cast %110 : vector<1x8x384xf32> to vector<8x384xf32>
    %112 = vector.extract_strided_slice %107 {offsets = [0, 0], sizes = [8, 256], strides = [1, 1]} : vector<8x384xf32> to vector<8x256xf32>
    %113 = vector.extract_strided_slice %102 {offsets = [0, 0], sizes = [8, 256], strides = [1, 1]} : vector<8x384xf32> to vector<8x256xf32>
    %114 = arith.addf %112, %113 : vector<8x256xf32>
    %115 = arith.negf %114 : vector<8x256xf32>
    %116 = math.exp %115 : vector<8x256xf32>
    %cst_65 = arith.constant 1.000000e+00 : f32
    %117 = vector.broadcast %cst_65 : f32 to vector<8x256xf32>
    %118 = arith.addf %117, %116 : vector<8x256xf32>
    %119 = arith.divf %117, %118 : vector<8x256xf32>
    %120 = vector.extract_strided_slice %111 {offsets = [0, 0], sizes = [8, 256], strides = [1, 1]} : vector<8x384xf32> to vector<8x256xf32>
    %121 = vector.extract_strided_slice %104 {offsets = [0, 0], sizes = [8, 256], strides = [1, 1]} : vector<8x384xf32> to vector<8x256xf32>
    %122 = arith.addf %120, %121 : vector<8x256xf32>
    %123 = arith.negf %122 : vector<8x256xf32>
    %124 = math.exp %123 : vector<8x256xf32>
    %cst_66 = arith.constant 1.000000e+00 : f32
    %125 = vector.broadcast %cst_66 : f32 to vector<8x256xf32>
    %126 = arith.addf %125, %124 : vector<8x256xf32>
    %127 = arith.divf %125, %126 : vector<8x256xf32>
    %128 = vector.extract_strided_slice %107 {offsets = [0, 256], sizes = [8, 128], strides = [1, 1]} : vector<8x384xf32> to vector<8x128xf32>
    %129 = vector.extract_strided_slice %119 {offsets = [0, 0], sizes = [8, 128], strides = [1, 1]} : vector<8x256xf32> to vector<8x128xf32>
    %130 = vector.extract_strided_slice %102 {offsets = [0, 256], sizes = [8, 128], strides = [1, 1]} : vector<8x384xf32> to vector<8x128xf32>
    %131 = arith.addf %130, %32 : vector<8x128xf32>
    %132 = arith.mulf %129, %131 : vector<8x128xf32>
    %133 = arith.addf %128, %132 : vector<8x128xf32>
    %134 = math.tanh %133 : vector<8x128xf32>
    %135 = vector.extract_strided_slice %111 {offsets = [0, 256], sizes = [8, 128], strides = [1, 1]} : vector<8x384xf32> to vector<8x128xf32>
    %136 = vector.extract_strided_slice %127 {offsets = [0, 0], sizes = [8, 128], strides = [1, 1]} : vector<8x256xf32> to vector<8x128xf32>
    %137 = vector.extract_strided_slice %104 {offsets = [0, 256], sizes = [8, 128], strides = [1, 1]} : vector<8x384xf32> to vector<8x128xf32>
    %138 = arith.addf %137, %36 : vector<8x128xf32>
    %139 = arith.mulf %136, %138 : vector<8x128xf32>
    %140 = arith.addf %135, %139 : vector<8x128xf32>
    %141 = math.tanh %140 : vector<8x128xf32>
    %142 = vector.extract_strided_slice %119 {offsets = [0, 128], sizes = [8, 128], strides = [1, 1]} : vector<8x256xf32> to vector<8x128xf32>
    %143 = arith.subf %85, %134 : vector<8x128xf32>
    %144 = arith.mulf %142, %143 : vector<8x128xf32>
    %145 = arith.addf %134, %144 : vector<8x128xf32>
    %146 = vector.extract_strided_slice %127 {offsets = [0, 128], sizes = [8, 128], strides = [1, 1]} : vector<8x256xf32> to vector<8x128xf32>
    %147 = arith.subf %89, %141 : vector<8x128xf32>
    %148 = arith.mulf %146, %147 : vector<8x128xf32>
    %149 = arith.addf %141, %148 : vector<8x128xf32>
    %150 = arith.truncf %145 : vector<8x128xf32> to vector<8x128xbf16>
    %151 = arith.index_cast %c1_i32 : i32 to index
    %c0_67 = arith.constant 0 : index
    %c0_68 = arith.constant 0 : index
    %152 = vector.load %arg7[%151, %c0_67, %c0_68] : memref<8x8x128xbf16, #tpu.memory_space<vmem>>, vector<1x8x128xbf16>
    %153 = vector.shape_cast %152 : vector<1x8x128xbf16> to vector<8x128xbf16>
    %154 = vector.shape_cast %150 : vector<8x128xbf16> to vector<1x8x128xbf16>
    tpu.vector_store %arg7[%151, %c0_67, %c0_68], %154 {strides = array<i32>} : memref<8x8x128xbf16, #tpu.memory_space<vmem>>, vector<1x8x128xbf16>,
    %155 = arith.truncf %149 : vector<8x128xf32> to vector<8x128xbf16>
    %c7_i32_69 = arith.constant 7 : i32
    %156 = arith.subi %c7_i32_69, %c1_i32 : i32
    %157 = arith.index_cast %156 : i32 to index
    %c0_70 = arith.constant 0 : index
    %c0_71 = arith.constant 0 : index
    %158 = vector.load %arg8[%157, %c0_70, %c0_71] : memref<8x8x128xbf16, #tpu.memory_space<vmem>>, vector<1x8x128xbf16>
    %159 = vector.shape_cast %158 : vector<1x8x128xbf16> to vector<8x128xbf16>
    %160 = vector.shape_cast %155 : vector<8x128xbf16> to vector<1x8x128xbf16>
    tpu.vector_store %arg8[%157, %c0_70, %c0_71], %160 {strides = array<i32>} : memref<8x8x128xbf16, #tpu.memory_space<vmem>>, vector<1x8x128xbf16>,
    %c2_i32 = arith.constant 2 : i32
    %161 = arith.truncf %145 : vector<8x128xf32> to vector<8x128xbf16>
    %cst_72 = arith.constant dense<0.000000e+00> : vector<8x384xf32>
    %162 = tpu.matmul %161, %26, %cst_72 {dimension_numbers = #tpu.dot_dimension_numbers<[1], [0], [0], [1], [0, 0, 1, 1], [], []>} : vector<8x128xbf16>, vector<128x384xbf16>, vector<8x384xf32> -> vector<8x384xf32>
    %163 = arith.truncf %149 : vector<8x128xf32> to vector<8x128xbf16>
    %cst_73 = arith.constant dense<0.000000e+00> : vector<8x384xf32>
    %164 = tpu.matmul %163, %28, %cst_73 {dimension_numbers = #tpu.dot_dimension_numbers<[1], [0], [0], [1], [0, 0, 1, 1], [], []>} : vector<8x128xbf16>, vector<128x384xbf16>, vector<8x384xf32> -> vector<8x384xf32>
    %165 = arith.index_cast %c2_i32 : i32 to index
    %c0_74 = arith.constant 0 : index
    %c0_75 = arith.constant 0 : index
    %166 = vector.load %arg10[%165, %c0_74, %c0_75] : memref<8x8x384xf32, #tpu.memory_space<vmem>>, vector<1x8x384xf32>
    %167 = vector.shape_cast %166 : vector<1x8x384xf32> to vector<8x384xf32>
    %c7_i32_76 = arith.constant 7 : i32
    %168 = arith.subi %c7_i32_76, %c2_i32 : i32
    %169 = arith.index_cast %168 : i32 to index
    %c0_77 = arith.constant 0 : index
    %c0_78 = arith.constant 0 : index
    %170 = vector.load %arg11[%169, %c0_77, %c0_78] : memref<8x8x384xf32, #tpu.memory_space<vmem>>, vector<1x8x384xf32>
    %171 = vector.shape_cast %170 : vector<1x8x384xf32> to vector<8x384xf32>
    %172 = vector.extract_strided_slice %167 {offsets = [0, 0], sizes = [8, 256], strides = [1, 1]} : vector<8x384xf32> to vector<8x256xf32>
    %173 = vector.extract_strided_slice %162 {offsets = [0, 0], sizes = [8, 256], strides = [1, 1]} : vector<8x384xf32> to vector<8x256xf32>
    %174 = arith.addf %172, %173 : vector<8x256xf32>
    %175 = arith.negf %174 : vector<8x256xf32>
    %176 = math.exp %175 : vector<8x256xf32>
    %cst_79 = arith.constant 1.000000e+00 : f32
    %177 = vector.broadcast %cst_79 : f32 to vector<8x256xf32>
    %178 = arith.addf %177, %176 : vector<8x256xf32>
    %179 = arith.divf %177, %178 : vector<8x256xf32>
    %180 = vector.extract_strided_slice %171 {offsets = [0, 0], sizes = [8, 256], strides = [1, 1]} : vector<8x384xf32> to vector<8x256xf32>
    %181 = vector.extract_strided_slice %164 {offsets = [0, 0], sizes = [8, 256], strides = [1, 1]} : vector<8x384xf32> to vector<8x256xf32>
    %182 = arith.addf %180, %181 : vector<8x256xf32>
    %183 = arith.negf %182 : vector<8x256xf32>
    %184 = math.exp %183 : vector<8x256xf32>
    %cst_80 = arith.constant 1.000000e+00 : f32
    %185 = vector.broadcast %cst_80 : f32 to vector<8x256xf32>
    %186 = arith.addf %185, %184 : vector<8x256xf32>
    %187 = arith.divf %185, %186 : vector<8x256xf32>
    %188 = vector.extract_strided_slice %167 {offsets = [0, 256], sizes = [8, 128], strides = [1, 1]} : vector<8x384xf32> to vector<8x128xf32>
    %189 = vector.extract_strided_slice %179 {offsets = [0, 0], sizes = [8, 128], strides = [1, 1]} : vector<8x256xf32> to vector<8x128xf32>
    %190 = vector.extract_strided_slice %162 {offsets = [0, 256], sizes = [8, 128], strides = [1, 1]} : vector<8x384xf32> to vector<8x128xf32>
    %191 = arith.addf %190, %32 : vector<8x128xf32>
    %192 = arith.mulf %189, %191 : vector<8x128xf32>
    %193 = arith.addf %188, %192 : vector<8x128xf32>
    %194 = math.tanh %193 : vector<8x128xf32>
    %195 = vector.extract_strided_slice %171 {offsets = [0, 256], sizes = [8, 128], strides = [1, 1]} : vector<8x384xf32> to vector<8x128xf32>
    %196 = vector.extract_strided_slice %187 {offsets = [0, 0], sizes = [8, 128], strides = [1, 1]} : vector<8x256xf32> to vector<8x128xf32>
    %197 = vector.extract_strided_slice %164 {offsets = [0, 256], sizes = [8, 128], strides = [1, 1]} : vector<8x384xf32> to vector<8x128xf32>
    %198 = arith.addf %197, %36 : vector<8x128xf32>
    %199 = arith.mulf %196, %198 : vector<8x128xf32>
    %200 = arith.addf %195, %199 : vector<8x128xf32>
    %201 = math.tanh %200 : vector<8x128xf32>
    %202 = vector.extract_strided_slice %179 {offsets = [0, 128], sizes = [8, 128], strides = [1, 1]} : vector<8x256xf32> to vector<8x128xf32>
    %203 = arith.subf %145, %194 : vector<8x128xf32>
    %204 = arith.mulf %202, %203 : vector<8x128xf32>
    %205 = arith.addf %194, %204 : vector<8x128xf32>
    %206 = vector.extract_strided_slice %187 {offsets = [0, 128], sizes = [8, 128], strides = [1, 1]} : vector<8x256xf32> to vector<8x128xf32>
    %207 = arith.subf %149, %201 : vector<8x128xf32>
    %208 = arith.mulf %206, %207 : vector<8x128xf32>
    %209 = arith.addf %201, %208 : vector<8x128xf32>
    %210 = arith.truncf %205 : vector<8x128xf32> to vector<8x128xbf16>
    %211 = arith.index_cast %c2_i32 : i32 to index
    %c0_81 = arith.constant 0 : index
    %c0_82 = arith.constant 0 : index
    %212 = vector.load %arg7[%211, %c0_81, %c0_82] : memref<8x8x128xbf16, #tpu.memory_space<vmem>>, vector<1x8x128xbf16>
    %213 = vector.shape_cast %212 : vector<1x8x128xbf16> to vector<8x128xbf16>
    %214 = vector.shape_cast %210 : vector<8x128xbf16> to vector<1x8x128xbf16>
    tpu.vector_store %arg7[%211, %c0_81, %c0_82], %214 {strides = array<i32>} : memref<8x8x128xbf16, #tpu.memory_space<vmem>>, vector<1x8x128xbf16>,
    %215 = arith.truncf %209 : vector<8x128xf32> to vector<8x128xbf16>
    %c7_i32_83 = arith.constant 7 : i32
    %216 = arith.subi %c7_i32_83, %c2_i32 : i32
    %217 = arith.index_cast %216 : i32 to index
    %c0_84 = arith.constant 0 : index
    %c0_85 = arith.constant 0 : index
    %218 = vector.load %arg8[%217, %c0_84, %c0_85] : memref<8x8x128xbf16, #tpu.memory_space<vmem>>, vector<1x8x128xbf16>
    %219 = vector.shape_cast %218 : vector<1x8x128xbf16> to vector<8x128xbf16>
    %220 = vector.shape_cast %215 : vector<8x128xbf16> to vector<1x8x128xbf16>
    tpu.vector_store %arg8[%217, %c0_84, %c0_85], %220 {strides = array<i32>} : memref<8x8x128xbf16, #tpu.memory_space<vmem>>, vector<1x8x128xbf16>,
    %c3_i32 = arith.constant 3 : i32
    %221 = arith.truncf %205 : vector<8x128xf32> to vector<8x128xbf16>
    %cst_86 = arith.constant dense<0.000000e+00> : vector<8x384xf32>
    %222 = tpu.matmul %221, %26, %cst_86 {dimension_numbers = #tpu.dot_dimension_numbers<[1], [0], [0], [1], [0, 0, 1, 1], [], []>} : vector<8x128xbf16>, vector<128x384xbf16>, vector<8x384xf32> -> vector<8x384xf32>
    %223 = arith.truncf %209 : vector<8x128xf32> to vector<8x128xbf16>
    %cst_87 = arith.constant dense<0.000000e+00> : vector<8x384xf32>
    %224 = tpu.matmul %223, %28, %cst_87 {dimension_numbers = #tpu.dot_dimension_numbers<[1], [0], [0], [1], [0, 0, 1, 1], [], []>} : vector<8x128xbf16>, vector<128x384xbf16>, vector<8x384xf32> -> vector<8x384xf32>
    %225 = arith.index_cast %c3_i32 : i32 to index
    %c0_88 = arith.constant 0 : index
    %c0_89 = arith.constant 0 : index
    %226 = vector.load %arg10[%225, %c0_88, %c0_89] : memref<8x8x384xf32, #tpu.memory_space<vmem>>, vector<1x8x384xf32>
    %227 = vector.shape_cast %226 : vector<1x8x384xf32> to vector<8x384xf32>
    %c7_i32_90 = arith.constant 7 : i32
    %228 = arith.subi %c7_i32_90, %c3_i32 : i32
    %229 = arith.index_cast %228 : i32 to index
    %c0_91 = arith.constant 0 : index
    %c0_92 = arith.constant 0 : index
    %230 = vector.load %arg11[%229, %c0_91, %c0_92] : memref<8x8x384xf32, #tpu.memory_space<vmem>>, vector<1x8x384xf32>
    %231 = vector.shape_cast %230 : vector<1x8x384xf32> to vector<8x384xf32>
    %232 = vector.extract_strided_slice %227 {offsets = [0, 0], sizes = [8, 256], strides = [1, 1]} : vector<8x384xf32> to vector<8x256xf32>
    %233 = vector.extract_strided_slice %222 {offsets = [0, 0], sizes = [8, 256], strides = [1, 1]} : vector<8x384xf32> to vector<8x256xf32>
    %234 = arith.addf %232, %233 : vector<8x256xf32>
    %235 = arith.negf %234 : vector<8x256xf32>
    %236 = math.exp %235 : vector<8x256xf32>
    %cst_93 = arith.constant 1.000000e+00 : f32
    %237 = vector.broadcast %cst_93 : f32 to vector<8x256xf32>
    %238 = arith.addf %237, %236 : vector<8x256xf32>
    %239 = arith.divf %237, %238 : vector<8x256xf32>
    %240 = vector.extract_strided_slice %231 {offsets = [0, 0], sizes = [8, 256], strides = [1, 1]} : vector<8x384xf32> to vector<8x256xf32>
    %241 = vector.extract_strided_slice %224 {offsets = [0, 0], sizes = [8, 256], strides = [1, 1]} : vector<8x384xf32> to vector<8x256xf32>
    %242 = arith.addf %240, %241 : vector<8x256xf32>
    %243 = arith.negf %242 : vector<8x256xf32>
    %244 = math.exp %243 : vector<8x256xf32>
    %cst_94 = arith.constant 1.000000e+00 : f32
    %245 = vector.broadcast %cst_94 : f32 to vector<8x256xf32>
    %246 = arith.addf %245, %244 : vector<8x256xf32>
    %247 = arith.divf %245, %246 : vector<8x256xf32>
    %248 = vector.extract_strided_slice %227 {offsets = [0, 256], sizes = [8, 128], strides = [1, 1]} : vector<8x384xf32> to vector<8x128xf32>
    %249 = vector.extract_strided_slice %239 {offsets = [0, 0], sizes = [8, 128], strides = [1, 1]} : vector<8x256xf32> to vector<8x128xf32>
    %250 = vector.extract_strided_slice %222 {offsets = [0, 256], sizes = [8, 128], strides = [1, 1]} : vector<8x384xf32> to vector<8x128xf32>
    %251 = arith.addf %250, %32 : vector<8x128xf32>
    %252 = arith.mulf %249, %251 : vector<8x128xf32>
    %253 = arith.addf %248, %252 : vector<8x128xf32>
    %254 = math.tanh %253 : vector<8x128xf32>
    %255 = vector.extract_strided_slice %231 {offsets = [0, 256], sizes = [8, 128], strides = [1, 1]} : vector<8x384xf32> to vector<8x128xf32>
    %256 = vector.extract_strided_slice %247 {offsets = [0, 0], sizes = [8, 128], strides = [1, 1]} : vector<8x256xf32> to vector<8x128xf32>
    %257 = vector.extract_strided_slice %224 {offsets = [0, 256], sizes = [8, 128], strides = [1, 1]} : vector<8x384xf32> to vector<8x128xf32>
    %258 = arith.addf %257, %36 : vector<8x128xf32>
    %259 = arith.mulf %256, %258 : vector<8x128xf32>
    %260 = arith.addf %255, %259 : vector<8x128xf32>
    %261 = math.tanh %260 : vector<8x128xf32>
    %262 = vector.extract_strided_slice %239 {offsets = [0, 128], sizes = [8, 128], strides = [1, 1]} : vector<8x256xf32> to vector<8x128xf32>
    %263 = arith.subf %205, %254 : vector<8x128xf32>
    %264 = arith.mulf %262, %263 : vector<8x128xf32>
    %265 = arith.addf %254, %264 : vector<8x128xf32>
    %266 = vector.extract_strided_slice %247 {offsets = [0, 128], sizes = [8, 128], strides = [1, 1]} : vector<8x256xf32> to vector<8x128xf32>
    %267 = arith.subf %209, %261 : vector<8x128xf32>
    %268 = arith.mulf %266, %267 : vector<8x128xf32>
    %269 = arith.addf %261, %268 : vector<8x128xf32>
    %270 = arith.truncf %265 : vector<8x128xf32> to vector<8x128xbf16>
    %271 = arith.index_cast %c3_i32 : i32 to index
    %c0_95 = arith.constant 0 : index
    %c0_96 = arith.constant 0 : index
    %272 = vector.load %arg7[%271, %c0_95, %c0_96] : memref<8x8x128xbf16, #tpu.memory_space<vmem>>, vector<1x8x128xbf16>
    %273 = vector.shape_cast %272 : vector<1x8x128xbf16> to vector<8x128xbf16>
    %274 = vector.shape_cast %270 : vector<8x128xbf16> to vector<1x8x128xbf16>
    tpu.vector_store %arg7[%271, %c0_95, %c0_96], %274 {strides = array<i32>} : memref<8x8x128xbf16, #tpu.memory_space<vmem>>, vector<1x8x128xbf16>,
    %275 = arith.truncf %269 : vector<8x128xf32> to vector<8x128xbf16>
    %c7_i32_97 = arith.constant 7 : i32
    %276 = arith.subi %c7_i32_97, %c3_i32 : i32
    %277 = arith.index_cast %276 : i32 to index
    %c0_98 = arith.constant 0 : index
    %c0_99 = arith.constant 0 : index
    %278 = vector.load %arg8[%277, %c0_98, %c0_99] : memref<8x8x128xbf16, #tpu.memory_space<vmem>>, vector<1x8x128xbf16>
    %279 = vector.shape_cast %278 : vector<1x8x128xbf16> to vector<8x128xbf16>
    %280 = vector.shape_cast %275 : vector<8x128xbf16> to vector<1x8x128xbf16>
    tpu.vector_store %arg8[%277, %c0_98, %c0_99], %280 {strides = array<i32>} : memref<8x8x128xbf16, #tpu.memory_space<vmem>>, vector<1x8x128xbf16>,
    %c4_i32 = arith.constant 4 : i32
    %281 = arith.truncf %265 : vector<8x128xf32> to vector<8x128xbf16>
    %cst_100 = arith.constant dense<0.000000e+00> : vector<8x384xf32>
    %282 = tpu.matmul %281, %26, %cst_100 {dimension_numbers = #tpu.dot_dimension_numbers<[1], [0], [0], [1], [0, 0, 1, 1], [], []>} : vector<8x128xbf16>, vector<128x384xbf16>, vector<8x384xf32> -> vector<8x384xf32>
    %283 = arith.truncf %269 : vector<8x128xf32> to vector<8x128xbf16>
    %cst_101 = arith.constant dense<0.000000e+00> : vector<8x384xf32>
    %284 = tpu.matmul %283, %28, %cst_101 {dimension_numbers = #tpu.dot_dimension_numbers<[1], [0], [0], [1], [0, 0, 1, 1], [], []>} : vector<8x128xbf16>, vector<128x384xbf16>, vector<8x384xf32> -> vector<8x384xf32>
    %285 = arith.index_cast %c4_i32 : i32 to index
    %c0_102 = arith.constant 0 : index
    %c0_103 = arith.constant 0 : index
    %286 = vector.load %arg10[%285, %c0_102, %c0_103] : memref<8x8x384xf32, #tpu.memory_space<vmem>>, vector<1x8x384xf32>
    %287 = vector.shape_cast %286 : vector<1x8x384xf32> to vector<8x384xf32>
    %c7_i32_104 = arith.constant 7 : i32
    %288 = arith.subi %c7_i32_104, %c4_i32 : i32
    %289 = arith.index_cast %288 : i32 to index
    %c0_105 = arith.constant 0 : index
    %c0_106 = arith.constant 0 : index
    %290 = vector.load %arg11[%289, %c0_105, %c0_106] : memref<8x8x384xf32, #tpu.memory_space<vmem>>, vector<1x8x384xf32>
    %291 = vector.shape_cast %290 : vector<1x8x384xf32> to vector<8x384xf32>
    %292 = vector.extract_strided_slice %287 {offsets = [0, 0], sizes = [8, 256], strides = [1, 1]} : vector<8x384xf32> to vector<8x256xf32>
    %293 = vector.extract_strided_slice %282 {offsets = [0, 0], sizes = [8, 256], strides = [1, 1]} : vector<8x384xf32> to vector<8x256xf32>
    %294 = arith.addf %292, %293 : vector<8x256xf32>
    %295 = arith.negf %294 : vector<8x256xf32>
    %296 = math.exp %295 : vector<8x256xf32>
    %cst_107 = arith.constant 1.000000e+00 : f32
    %297 = vector.broadcast %cst_107 : f32 to vector<8x256xf32>
    %298 = arith.addf %297, %296 : vector<8x256xf32>
    %299 = arith.divf %297, %298 : vector<8x256xf32>
    %300 = vector.extract_strided_slice %291 {offsets = [0, 0], sizes = [8, 256], strides = [1, 1]} : vector<8x384xf32> to vector<8x256xf32>
    %301 = vector.extract_strided_slice %284 {offsets = [0, 0], sizes = [8, 256], strides = [1, 1]} : vector<8x384xf32> to vector<8x256xf32>
    %302 = arith.addf %300, %301 : vector<8x256xf32>
    %303 = arith.negf %302 : vector<8x256xf32>
    %304 = math.exp %303 : vector<8x256xf32>
    %cst_108 = arith.constant 1.000000e+00 : f32
    %305 = vector.broadcast %cst_108 : f32 to vector<8x256xf32>
    %306 = arith.addf %305, %304 : vector<8x256xf32>
    %307 = arith.divf %305, %306 : vector<8x256xf32>
    %308 = vector.extract_strided_slice %287 {offsets = [0, 256], sizes = [8, 128], strides = [1, 1]} : vector<8x384xf32> to vector<8x128xf32>
    %309 = vector.extract_strided_slice %299 {offsets = [0, 0], sizes = [8, 128], strides = [1, 1]} : vector<8x256xf32> to vector<8x128xf32>
    %310 = vector.extract_strided_slice %282 {offsets = [0, 256], sizes = [8, 128], strides = [1, 1]} : vector<8x384xf32> to vector<8x128xf32>
    %311 = arith.addf %310, %32 : vector<8x128xf32>
    %312 = arith.mulf %309, %311 : vector<8x128xf32>
    %313 = arith.addf %308, %312 : vector<8x128xf32>
    %314 = math.tanh %313 : vector<8x128xf32>
    %315 = vector.extract_strided_slice %291 {offsets = [0, 256], sizes = [8, 128], strides = [1, 1]} : vector<8x384xf32> to vector<8x128xf32>
    %316 = vector.extract_strided_slice %307 {offsets = [0, 0], sizes = [8, 128], strides = [1, 1]} : vector<8x256xf32> to vector<8x128xf32>
    %317 = vector.extract_strided_slice %284 {offsets = [0, 256], sizes = [8, 128], strides = [1, 1]} : vector<8x384xf32> to vector<8x128xf32>
    %318 = arith.addf %317, %36 : vector<8x128xf32>
    %319 = arith.mulf %316, %318 : vector<8x128xf32>
    %320 = arith.addf %315, %319 : vector<8x128xf32>
    %321 = math.tanh %320 : vector<8x128xf32>
    %322 = vector.extract_strided_slice %299 {offsets = [0, 128], sizes = [8, 128], strides = [1, 1]} : vector<8x256xf32> to vector<8x128xf32>
    %323 = arith.subf %265, %314 : vector<8x128xf32>
    %324 = arith.mulf %322, %323 : vector<8x128xf32>
    %325 = arith.addf %314, %324 : vector<8x128xf32>
    %326 = vector.extract_strided_slice %307 {offsets = [0, 128], sizes = [8, 128], strides = [1, 1]} : vector<8x256xf32> to vector<8x128xf32>
    %327 = arith.subf %269, %321 : vector<8x128xf32>
    %328 = arith.mulf %326, %327 : vector<8x128xf32>
    %329 = arith.addf %321, %328 : vector<8x128xf32>
    %330 = arith.truncf %325 : vector<8x128xf32> to vector<8x128xbf16>
    %331 = arith.index_cast %c4_i32 : i32 to index
    %c0_109 = arith.constant 0 : index
    %c0_110 = arith.constant 0 : index
    %332 = vector.load %arg7[%331, %c0_109, %c0_110] : memref<8x8x128xbf16, #tpu.memory_space<vmem>>, vector<1x8x128xbf16>
    %333 = vector.shape_cast %332 : vector<1x8x128xbf16> to vector<8x128xbf16>
    %334 = vector.shape_cast %330 : vector<8x128xbf16> to vector<1x8x128xbf16>
    tpu.vector_store %arg7[%331, %c0_109, %c0_110], %334 {strides = array<i32>} : memref<8x8x128xbf16, #tpu.memory_space<vmem>>, vector<1x8x128xbf16>,
    %335 = arith.truncf %329 : vector<8x128xf32> to vector<8x128xbf16>
    %c7_i32_111 = arith.constant 7 : i32
    %336 = arith.subi %c7_i32_111, %c4_i32 : i32
    %337 = arith.index_cast %336 : i32 to index
    %c0_112 = arith.constant 0 : index
    %c0_113 = arith.constant 0 : index
    %338 = vector.load %arg8[%337, %c0_112, %c0_113] : memref<8x8x128xbf16, #tpu.memory_space<vmem>>, vector<1x8x128xbf16>
    %339 = vector.shape_cast %338 : vector<1x8x128xbf16> to vector<8x128xbf16>
    %340 = vector.shape_cast %335 : vector<8x128xbf16> to vector<1x8x128xbf16>
    tpu.vector_store %arg8[%337, %c0_112, %c0_113], %340 {strides = array<i32>} : memref<8x8x128xbf16, #tpu.memory_space<vmem>>, vector<1x8x128xbf16>,
    %c5_i32 = arith.constant 5 : i32
    %341 = arith.truncf %325 : vector<8x128xf32> to vector<8x128xbf16>
    %cst_114 = arith.constant dense<0.000000e+00> : vector<8x384xf32>
    %342 = tpu.matmul %341, %26, %cst_114 {dimension_numbers = #tpu.dot_dimension_numbers<[1], [0], [0], [1], [0, 0, 1, 1], [], []>} : vector<8x128xbf16>, vector<128x384xbf16>, vector<8x384xf32> -> vector<8x384xf32>
    %343 = arith.truncf %329 : vector<8x128xf32> to vector<8x128xbf16>
    %cst_115 = arith.constant dense<0.000000e+00> : vector<8x384xf32>
    %344 = tpu.matmul %343, %28, %cst_115 {dimension_numbers = #tpu.dot_dimension_numbers<[1], [0], [0], [1], [0, 0, 1, 1], [], []>} : vector<8x128xbf16>, vector<128x384xbf16>, vector<8x384xf32> -> vector<8x384xf32>
    %345 = arith.index_cast %c5_i32 : i32 to index
    %c0_116 = arith.constant 0 : index
    %c0_117 = arith.constant 0 : index
    %346 = vector.load %arg10[%345, %c0_116, %c0_117] : memref<8x8x384xf32, #tpu.memory_space<vmem>>, vector<1x8x384xf32>
    %347 = vector.shape_cast %346 : vector<1x8x384xf32> to vector<8x384xf32>
    %c7_i32_118 = arith.constant 7 : i32
    %348 = arith.subi %c7_i32_118, %c5_i32 : i32
    %349 = arith.index_cast %348 : i32 to index
    %c0_119 = arith.constant 0 : index
    %c0_120 = arith.constant 0 : index
    %350 = vector.load %arg11[%349, %c0_119, %c0_120] : memref<8x8x384xf32, #tpu.memory_space<vmem>>, vector<1x8x384xf32>
    %351 = vector.shape_cast %350 : vector<1x8x384xf32> to vector<8x384xf32>
    %352 = vector.extract_strided_slice %347 {offsets = [0, 0], sizes = [8, 256], strides = [1, 1]} : vector<8x384xf32> to vector<8x256xf32>
    %353 = vector.extract_strided_slice %342 {offsets = [0, 0], sizes = [8, 256], strides = [1, 1]} : vector<8x384xf32> to vector<8x256xf32>
    %354 = arith.addf %352, %353 : vector<8x256xf32>
    %355 = arith.negf %354 : vector<8x256xf32>
    %356 = math.exp %355 : vector<8x256xf32>
    %cst_121 = arith.constant 1.000000e+00 : f32
    %357 = vector.broadcast %cst_121 : f32 to vector<8x256xf32>
    %358 = arith.addf %357, %356 : vector<8x256xf32>
    %359 = arith.divf %357, %358 : vector<8x256xf32>
    %360 = vector.extract_strided_slice %351 {offsets = [0, 0], sizes = [8, 256], strides = [1, 1]} : vector<8x384xf32> to vector<8x256xf32>
    %361 = vector.extract_strided_slice %344 {offsets = [0, 0], sizes = [8, 256], strides = [1, 1]} : vector<8x384xf32> to vector<8x256xf32>
    %362 = arith.addf %360, %361 : vector<8x256xf32>
    %363 = arith.negf %362 : vector<8x256xf32>
    %364 = math.exp %363 : vector<8x256xf32>
    %cst_122 = arith.constant 1.000000e+00 : f32
    %365 = vector.broadcast %cst_122 : f32 to vector<8x256xf32>
    %366 = arith.addf %365, %364 : vector<8x256xf32>
    %367 = arith.divf %365, %366 : vector<8x256xf32>
    %368 = vector.extract_strided_slice %347 {offsets = [0, 256], sizes = [8, 128], strides = [1, 1]} : vector<8x384xf32> to vector<8x128xf32>
    %369 = vector.extract_strided_slice %359 {offsets = [0, 0], sizes = [8, 128], strides = [1, 1]} : vector<8x256xf32> to vector<8x128xf32>
    %370 = vector.extract_strided_slice %342 {offsets = [0, 256], sizes = [8, 128], strides = [1, 1]} : vector<8x384xf32> to vector<8x128xf32>
    %371 = arith.addf %370, %32 : vector<8x128xf32>
    %372 = arith.mulf %369, %371 : vector<8x128xf32>
    %373 = arith.addf %368, %372 : vector<8x128xf32>
    %374 = math.tanh %373 : vector<8x128xf32>
    %375 = vector.extract_strided_slice %351 {offsets = [0, 256], sizes = [8, 128], strides = [1, 1]} : vector<8x384xf32> to vector<8x128xf32>
    %376 = vector.extract_strided_slice %367 {offsets = [0, 0], sizes = [8, 128], strides = [1, 1]} : vector<8x256xf32> to vector<8x128xf32>
    %377 = vector.extract_strided_slice %344 {offsets = [0, 256], sizes = [8, 128], strides = [1, 1]} : vector<8x384xf32> to vector<8x128xf32>
    %378 = arith.addf %377, %36 : vector<8x128xf32>
    %379 = arith.mulf %376, %378 : vector<8x128xf32>
    %380 = arith.addf %375, %379 : vector<8x128xf32>
    %381 = math.tanh %380 : vector<8x128xf32>
    %382 = vector.extract_strided_slice %359 {offsets = [0, 128], sizes = [8, 128], strides = [1, 1]} : vector<8x256xf32> to vector<8x128xf32>
    %383 = arith.subf %325, %374 : vector<8x128xf32>
    %384 = arith.mulf %382, %383 : vector<8x128xf32>
    %385 = arith.addf %374, %384 : vector<8x128xf32>
    %386 = vector.extract_strided_slice %367 {offsets = [0, 128], sizes = [8, 128], strides = [1, 1]} : vector<8x256xf32> to vector<8x128xf32>
    %387 = arith.subf %329, %381 : vector<8x128xf32>
    %388 = arith.mulf %386, %387 : vector<8x128xf32>
    %389 = arith.addf %381, %388 : vector<8x128xf32>
    %390 = arith.truncf %385 : vector<8x128xf32> to vector<8x128xbf16>
    %391 = arith.index_cast %c5_i32 : i32 to index
    %c0_123 = arith.constant 0 : index
    %c0_124 = arith.constant 0 : index
    %392 = vector.load %arg7[%391, %c0_123, %c0_124] : memref<8x8x128xbf16, #tpu.memory_space<vmem>>, vector<1x8x128xbf16>
    %393 = vector.shape_cast %392 : vector<1x8x128xbf16> to vector<8x128xbf16>
    %394 = vector.shape_cast %390 : vector<8x128xbf16> to vector<1x8x128xbf16>
    tpu.vector_store %arg7[%391, %c0_123, %c0_124], %394 {strides = array<i32>} : memref<8x8x128xbf16, #tpu.memory_space<vmem>>, vector<1x8x128xbf16>,
    %395 = arith.truncf %389 : vector<8x128xf32> to vector<8x128xbf16>
    %c7_i32_125 = arith.constant 7 : i32
    %396 = arith.subi %c7_i32_125, %c5_i32 : i32
    %397 = arith.index_cast %396 : i32 to index
    %c0_126 = arith.constant 0 : index
    %c0_127 = arith.constant 0 : index
    %398 = vector.load %arg8[%397, %c0_126, %c0_127] : memref<8x8x128xbf16, #tpu.memory_space<vmem>>, vector<1x8x128xbf16>
    %399 = vector.shape_cast %398 : vector<1x8x128xbf16> to vector<8x128xbf16>
    %400 = vector.shape_cast %395 : vector<8x128xbf16> to vector<1x8x128xbf16>
    tpu.vector_store %arg8[%397, %c0_126, %c0_127], %400 {strides = array<i32>} : memref<8x8x128xbf16, #tpu.memory_space<vmem>>, vector<1x8x128xbf16>,
    %c6_i32 = arith.constant 6 : i32
    %401 = arith.truncf %385 : vector<8x128xf32> to vector<8x128xbf16>
    %cst_128 = arith.constant dense<0.000000e+00> : vector<8x384xf32>
    %402 = tpu.matmul %401, %26, %cst_128 {dimension_numbers = #tpu.dot_dimension_numbers<[1], [0], [0], [1], [0, 0, 1, 1], [], []>} : vector<8x128xbf16>, vector<128x384xbf16>, vector<8x384xf32> -> vector<8x384xf32>
    %403 = arith.truncf %389 : vector<8x128xf32> to vector<8x128xbf16>
    %cst_129 = arith.constant dense<0.000000e+00> : vector<8x384xf32>
    %404 = tpu.matmul %403, %28, %cst_129 {dimension_numbers = #tpu.dot_dimension_numbers<[1], [0], [0], [1], [0, 0, 1, 1], [], []>} : vector<8x128xbf16>, vector<128x384xbf16>, vector<8x384xf32> -> vector<8x384xf32>
    %405 = arith.index_cast %c6_i32 : i32 to index
    %c0_130 = arith.constant 0 : index
    %c0_131 = arith.constant 0 : index
    %406 = vector.load %arg10[%405, %c0_130, %c0_131] : memref<8x8x384xf32, #tpu.memory_space<vmem>>, vector<1x8x384xf32>
    %407 = vector.shape_cast %406 : vector<1x8x384xf32> to vector<8x384xf32>
    %c7_i32_132 = arith.constant 7 : i32
    %408 = arith.subi %c7_i32_132, %c6_i32 : i32
    %409 = arith.index_cast %408 : i32 to index
    %c0_133 = arith.constant 0 : index
    %c0_134 = arith.constant 0 : index
    %410 = vector.load %arg11[%409, %c0_133, %c0_134] : memref<8x8x384xf32, #tpu.memory_space<vmem>>, vector<1x8x384xf32>
    %411 = vector.shape_cast %410 : vector<1x8x384xf32> to vector<8x384xf32>
    %412 = vector.extract_strided_slice %407 {offsets = [0, 0], sizes = [8, 256], strides = [1, 1]} : vector<8x384xf32> to vector<8x256xf32>
    %413 = vector.extract_strided_slice %402 {offsets = [0, 0], sizes = [8, 256], strides = [1, 1]} : vector<8x384xf32> to vector<8x256xf32>
    %414 = arith.addf %412, %413 : vector<8x256xf32>
    %415 = arith.negf %414 : vector<8x256xf32>
    %416 = math.exp %415 : vector<8x256xf32>
    %cst_135 = arith.constant 1.000000e+00 : f32
    %417 = vector.broadcast %cst_135 : f32 to vector<8x256xf32>
    %418 = arith.addf %417, %416 : vector<8x256xf32>
    %419 = arith.divf %417, %418 : vector<8x256xf32>
    %420 = vector.extract_strided_slice %411 {offsets = [0, 0], sizes = [8, 256], strides = [1, 1]} : vector<8x384xf32> to vector<8x256xf32>
    %421 = vector.extract_strided_slice %404 {offsets = [0, 0], sizes = [8, 256], strides = [1, 1]} : vector<8x384xf32> to vector<8x256xf32>
    %422 = arith.addf %420, %421 : vector<8x256xf32>
    %423 = arith.negf %422 : vector<8x256xf32>
    %424 = math.exp %423 : vector<8x256xf32>
    %cst_136 = arith.constant 1.000000e+00 : f32
    %425 = vector.broadcast %cst_136 : f32 to vector<8x256xf32>
    %426 = arith.addf %425, %424 : vector<8x256xf32>
    %427 = arith.divf %425, %426 : vector<8x256xf32>
    %428 = vector.extract_strided_slice %407 {offsets = [0, 256], sizes = [8, 128], strides = [1, 1]} : vector<8x384xf32> to vector<8x128xf32>
    %429 = vector.extract_strided_slice %419 {offsets = [0, 0], sizes = [8, 128], strides = [1, 1]} : vector<8x256xf32> to vector<8x128xf32>
    %430 = vector.extract_strided_slice %402 {offsets = [0, 256], sizes = [8, 128], strides = [1, 1]} : vector<8x384xf32> to vector<8x128xf32>
    %431 = arith.addf %430, %32 : vector<8x128xf32>
    %432 = arith.mulf %429, %431 : vector<8x128xf32>
    %433 = arith.addf %428, %432 : vector<8x128xf32>
    %434 = math.tanh %433 : vector<8x128xf32>
    %435 = vector.extract_strided_slice %411 {offsets = [0, 256], sizes = [8, 128], strides = [1, 1]} : vector<8x384xf32> to vector<8x128xf32>
    %436 = vector.extract_strided_slice %427 {offsets = [0, 0], sizes = [8, 128], strides = [1, 1]} : vector<8x256xf32> to vector<8x128xf32>
    %437 = vector.extract_strided_slice %404 {offsets = [0, 256], sizes = [8, 128], strides = [1, 1]} : vector<8x384xf32> to vector<8x128xf32>
    %438 = arith.addf %437, %36 : vector<8x128xf32>
    %439 = arith.mulf %436, %438 : vector<8x128xf32>
    %440 = arith.addf %435, %439 : vector<8x128xf32>
    %441 = math.tanh %440 : vector<8x128xf32>
    %442 = vector.extract_strided_slice %419 {offsets = [0, 128], sizes = [8, 128], strides = [1, 1]} : vector<8x256xf32> to vector<8x128xf32>
    %443 = arith.subf %385, %434 : vector<8x128xf32>
    %444 = arith.mulf %442, %443 : vector<8x128xf32>
    %445 = arith.addf %434, %444 : vector<8x128xf32>
    %446 = vector.extract_strided_slice %427 {offsets = [0, 128], sizes = [8, 128], strides = [1, 1]} : vector<8x256xf32> to vector<8x128xf32>
    %447 = arith.subf %389, %441 : vector<8x128xf32>
    %448 = arith.mulf %446, %447 : vector<8x128xf32>
    %449 = arith.addf %441, %448 : vector<8x128xf32>
    %450 = arith.truncf %445 : vector<8x128xf32> to vector<8x128xbf16>
    %451 = arith.index_cast %c6_i32 : i32 to index
    %c0_137 = arith.constant 0 : index
    %c0_138 = arith.constant 0 : index
    %452 = vector.load %arg7[%451, %c0_137, %c0_138] : memref<8x8x128xbf16, #tpu.memory_space<vmem>>, vector<1x8x128xbf16>
    %453 = vector.shape_cast %452 : vector<1x8x128xbf16> to vector<8x128xbf16>
    %454 = vector.shape_cast %450 : vector<8x128xbf16> to vector<1x8x128xbf16>
    tpu.vector_store %arg7[%451, %c0_137, %c0_138], %454 {strides = array<i32>} : memref<8x8x128xbf16, #tpu.memory_space<vmem>>, vector<1x8x128xbf16>,
    %455 = arith.truncf %449 : vector<8x128xf32> to vector<8x128xbf16>
    %c7_i32_139 = arith.constant 7 : i32
    %456 = arith.subi %c7_i32_139, %c6_i32 : i32
    %457 = arith.index_cast %456 : i32 to index
    %c0_140 = arith.constant 0 : index
    %c0_141 = arith.constant 0 : index
    %458 = vector.load %arg8[%457, %c0_140, %c0_141] : memref<8x8x128xbf16, #tpu.memory_space<vmem>>, vector<1x8x128xbf16>
    %459 = vector.shape_cast %458 : vector<1x8x128xbf16> to vector<8x128xbf16>
    %460 = vector.shape_cast %455 : vector<8x128xbf16> to vector<1x8x128xbf16>
    tpu.vector_store %arg8[%457, %c0_140, %c0_141], %460 {strides = array<i32>} : memref<8x8x128xbf16, #tpu.memory_space<vmem>>, vector<1x8x128xbf16>,
    %c7_i32_142 = arith.constant 7 : i32
    %461 = arith.truncf %445 : vector<8x128xf32> to vector<8x128xbf16>
    %cst_143 = arith.constant dense<0.000000e+00> : vector<8x384xf32>
    %462 = tpu.matmul %461, %26, %cst_143 {dimension_numbers = #tpu.dot_dimension_numbers<[1], [0], [0], [1], [0, 0, 1, 1], [], []>} : vector<8x128xbf16>, vector<128x384xbf16>, vector<8x384xf32> -> vector<8x384xf32>
    %463 = arith.truncf %449 : vector<8x128xf32> to vector<8x128xbf16>
    %cst_144 = arith.constant dense<0.000000e+00> : vector<8x384xf32>
    %464 = tpu.matmul %463, %28, %cst_144 {dimension_numbers = #tpu.dot_dimension_numbers<[1], [0], [0], [1], [0, 0, 1, 1], [], []>} : vector<8x128xbf16>, vector<128x384xbf16>, vector<8x384xf32> -> vector<8x384xf32>
    %465 = arith.index_cast %c7_i32_142 : i32 to index
    %c0_145 = arith.constant 0 : index
    %c0_146 = arith.constant 0 : index
    %466 = vector.load %arg10[%465, %c0_145, %c0_146] : memref<8x8x384xf32, #tpu.memory_space<vmem>>, vector<1x8x384xf32>
    %467 = vector.shape_cast %466 : vector<1x8x384xf32> to vector<8x384xf32>
    %c7_i32_147 = arith.constant 7 : i32
    %468 = arith.subi %c7_i32_147, %c7_i32_142 : i32
    %469 = arith.index_cast %468 : i32 to index
    %c0_148 = arith.constant 0 : index
    %c0_149 = arith.constant 0 : index
    %470 = vector.load %arg11[%469, %c0_148, %c0_149] : memref<8x8x384xf32, #tpu.memory_space<vmem>>, vector<1x8x384xf32>
    %471 = vector.shape_cast %470 : vector<1x8x384xf32> to vector<8x384xf32>
    %472 = vector.extract_strided_slice %467 {offsets = [0, 0], sizes = [8, 256], strides = [1, 1]} : vector<8x384xf32> to vector<8x256xf32>
    %473 = vector.extract_strided_slice %462 {offsets = [0, 0], sizes = [8, 256], strides = [1, 1]} : vector<8x384xf32> to vector<8x256xf32>
    %474 = arith.addf %472, %473 : vector<8x256xf32>
    %475 = arith.negf %474 : vector<8x256xf32>
    %476 = math.exp %475 : vector<8x256xf32>
    %cst_150 = arith.constant 1.000000e+00 : f32
    %477 = vector.broadcast %cst_150 : f32 to vector<8x256xf32>
    %478 = arith.addf %477, %476 : vector<8x256xf32>
    %479 = arith.divf %477, %478 : vector<8x256xf32>
    %480 = vector.extract_strided_slice %471 {offsets = [0, 0], sizes = [8, 256], strides = [1, 1]} : vector<8x384xf32> to vector<8x256xf32>
    %481 = vector.extract_strided_slice %464 {offsets = [0, 0], sizes = [8, 256], strides = [1, 1]} : vector<8x384xf32> to vector<8x256xf32>
    %482 = arith.addf %480, %481 : vector<8x256xf32>
    %483 = arith.negf %482 : vector<8x256xf32>
    %484 = math.exp %483 : vector<8x256xf32>
    %cst_151 = arith.constant 1.000000e+00 : f32
    %485 = vector.broadcast %cst_151 : f32 to vector<8x256xf32>
    %486 = arith.addf %485, %484 : vector<8x256xf32>
    %487 = arith.divf %485, %486 : vector<8x256xf32>
    %488 = vector.extract_strided_slice %467 {offsets = [0, 256], sizes = [8, 128], strides = [1, 1]} : vector<8x384xf32> to vector<8x128xf32>
    %489 = vector.extract_strided_slice %479 {offsets = [0, 0], sizes = [8, 128], strides = [1, 1]} : vector<8x256xf32> to vector<8x128xf32>
    %490 = vector.extract_strided_slice %462 {offsets = [0, 256], sizes = [8, 128], strides = [1, 1]} : vector<8x384xf32> to vector<8x128xf32>
    %491 = arith.addf %490, %32 : vector<8x128xf32>
    %492 = arith.mulf %489, %491 : vector<8x128xf32>
    %493 = arith.addf %488, %492 : vector<8x128xf32>
    %494 = math.tanh %493 : vector<8x128xf32>
    %495 = vector.extract_strided_slice %471 {offsets = [0, 256], sizes = [8, 128], strides = [1, 1]} : vector<8x384xf32> to vector<8x128xf32>
    %496 = vector.extract_strided_slice %487 {offsets = [0, 0], sizes = [8, 128], strides = [1, 1]} : vector<8x256xf32> to vector<8x128xf32>
    %497 = vector.extract_strided_slice %464 {offsets = [0, 256], sizes = [8, 128], strides = [1, 1]} : vector<8x384xf32> to vector<8x128xf32>
    %498 = arith.addf %497, %36 : vector<8x128xf32>
    %499 = arith.mulf %496, %498 : vector<8x128xf32>
    %500 = arith.addf %495, %499 : vector<8x128xf32>
    %501 = math.tanh %500 : vector<8x128xf32>
    %502 = vector.extract_strided_slice %479 {offsets = [0, 128], sizes = [8, 128], strides = [1, 1]} : vector<8x256xf32> to vector<8x128xf32>
    %503 = arith.subf %445, %494 : vector<8x128xf32>
    %504 = arith.mulf %502, %503 : vector<8x128xf32>
    %505 = arith.addf %494, %504 : vector<8x128xf32>
    %506 = vector.extract_strided_slice %487 {offsets = [0, 128], sizes = [8, 128], strides = [1, 1]} : vector<8x256xf32> to vector<8x128xf32>
    %507 = arith.subf %449, %501 : vector<8x128xf32>
    %508 = arith.mulf %506, %507 : vector<8x128xf32>
    %509 = arith.addf %501, %508 : vector<8x128xf32>
    %510 = arith.truncf %505 : vector<8x128xf32> to vector<8x128xbf16>
    %511 = arith.index_cast %c7_i32_142 : i32 to index
    %c0_152 = arith.constant 0 : index
    %c0_153 = arith.constant 0 : index
    %512 = vector.load %arg7[%511, %c0_152, %c0_153] : memref<8x8x128xbf16, #tpu.memory_space<vmem>>, vector<1x8x128xbf16>
    %513 = vector.shape_cast %512 : vector<1x8x128xbf16> to vector<8x128xbf16>
    %514 = vector.shape_cast %510 : vector<8x128xbf16> to vector<1x8x128xbf16>
    tpu.vector_store %arg7[%511, %c0_152, %c0_153], %514 {strides = array<i32>} : memref<8x8x128xbf16, #tpu.memory_space<vmem>>, vector<1x8x128xbf16>,
    %515 = arith.truncf %509 : vector<8x128xf32> to vector<8x128xbf16>
    %c7_i32_154 = arith.constant 7 : i32
    %516 = arith.subi %c7_i32_154, %c7_i32_142 : i32
    %517 = arith.index_cast %516 : i32 to index
    %c0_155 = arith.constant 0 : index
    %c0_156 = arith.constant 0 : index
    %518 = vector.load %arg8[%517, %c0_155, %c0_156] : memref<8x8x128xbf16, #tpu.memory_space<vmem>>, vector<1x8x128xbf16>
    %519 = vector.shape_cast %518 : vector<1x8x128xbf16> to vector<8x128xbf16>
    %520 = vector.shape_cast %515 : vector<8x128xbf16> to vector<1x8x128xbf16>
    tpu.vector_store %arg8[%517, %c0_155, %c0_156], %520 {strides = array<i32>} : memref<8x8x128xbf16, #tpu.memory_space<vmem>>, vector<1x8x128xbf16>,
    %c8_i32 = arith.constant 8 : i32
    %c0_157 = arith.constant 0 : index
    %c0_158 = arith.constant 0 : index
    %c0_159 = arith.constant 0 : index
    %521 = vector.load %arg12[%c0_157, %c0_158, %c0_159] : memref<2x8x128xf32, #tpu.memory_space<vmem>>, vector<1x8x128xf32>
    %522 = vector.shape_cast %521 : vector<1x8x128xf32> to vector<8x128xf32>
    %523 = vector.shape_cast %505 : vector<8x128xf32> to vector<1x8x128xf32>
    tpu.vector_store %arg12[%c0_157, %c0_158, %c0_159], %523 {strides = array<i32>} : memref<2x8x128xf32, #tpu.memory_space<vmem>>, vector<1x8x128xf32>,
    %c1_160 = arith.constant 1 : index
    %c0_161 = arith.constant 0 : index
    %c0_162 = arith.constant 0 : index
    %524 = vector.load %arg12[%c1_160, %c0_161, %c0_162] : memref<2x8x128xf32, #tpu.memory_space<vmem>>, vector<1x8x128xf32>
    %525 = vector.shape_cast %524 : vector<1x8x128xf32> to vector<8x128xf32>
    %526 = vector.shape_cast %509 : vector<8x128xf32> to vector<1x8x128xf32>
    tpu.vector_store %arg12[%c1_160, %c0_161, %c0_162], %526 {strides = array<i32>} : memref<2x8x128xf32, #tpu.memory_space<vmem>>, vector<1x8x128xf32>,
    %c1_i32_163 = arith.constant 1 : i32
    %527 = arith.cmpi eq, %arg0, %c1_i32_163 : i32
    %528 = arith.extui %527 : i1 to i32
    %c0_i32_164 = arith.constant 0 : i32
    %529 = arith.cmpi ne, %528, %c0_i32_164 : i32
    scf.if %529 {
      %c0_165 = arith.constant 0 : index
      %c0_166 = arith.constant 0 : index
      %c0_167 = arith.constant 0 : index
      %530 = vector.load %arg9[%c0_165, %c0_166, %c0_167] : memref<2x8x128xf32, #tpu.memory_space<vmem>>, vector<1x8x128xf32>
      %531 = vector.shape_cast %530 : vector<1x8x128xf32> to vector<8x128xf32>
      %532 = vector.shape_cast %505 : vector<8x128xf32> to vector<1x8x128xf32>
      tpu.vector_store %arg9[%c0_165, %c0_166, %c0_167], %532 {strides = array<i32>} : memref<2x8x128xf32, #tpu.memory_space<vmem>>, vector<1x8x128xf32>,
      %c1_168 = arith.constant 1 : index
      %c0_169 = arith.constant 0 : index
      %c0_170 = arith.constant 0 : index
      %533 = vector.load %arg9[%c1_168, %c0_169, %c0_170] : memref<2x8x128xf32, #tpu.memory_space<vmem>>, vector<1x8x128xf32>
      %534 = vector.shape_cast %533 : vector<1x8x128xf32> to vector<8x128xf32>
      %535 = vector.shape_cast %509 : vector<8x128xf32> to vector<1x8x128xf32>
      tpu.vector_store %arg9[%c1_168, %c0_169, %c0_170], %535 {strides = array<i32>} : memref<2x8x128xf32, #tpu.memory_space<vmem>>, vector<1x8x128xf32>,
    } else {
    }
    return
  }
  func.func @transform_0(%arg0: i32) -> (i32, i32, i32) {
    %c0_i32 = arith.constant 0 : i32
    %c0_i32_0 = arith.constant 0 : i32
    %c0_i32_1 = arith.constant 0 : i32
    return %arg0, %c0_i32, %c0_i32_0 : i32, i32, i32
  }
  func.func @transform_1(%arg0: i32) -> (i32, i32, i32) {
    %c1_i32 = arith.constant 1 : i32
    %0 = arith.subi %c1_i32, %arg0 : i32
    %c0_i32 = arith.constant 0 : i32
    %c0_i32_0 = arith.constant 0 : i32
    %c0_i32_1 = arith.constant 0 : i32
    return %0, %c0_i32, %c0_i32_0 : i32, i32, i32
  }
  func.func @transform_2(%arg0: i32) -> (i32, i32, i32, i32) {
    %c0_i32 = arith.constant 0 : i32
    %c0_i32_0 = arith.constant 0 : i32
    %c0_i32_1 = arith.constant 0 : i32
    %c0_i32_2 = arith.constant 0 : i32
    %c0_i32_3 = arith.constant 0 : i32
    return %c0_i32, %c0_i32_0, %c0_i32_1, %c0_i32_2 : i32, i32, i32, i32
  }
  func.func @transform_3(%arg0: i32) -> (i32, i32, i32) {
    %c0_i32 = arith.constant 0 : i32
    %c0_i32_0 = arith.constant 0 : i32
    %c0_i32_1 = arith.constant 0 : i32
    %c0_i32_2 = arith.constant 0 : i32
    return %c0_i32, %c0_i32_0, %c0_i32_1 : i32, i32, i32
  }
  func.func @transform_4(%arg0: i32) -> (i32, i32, i32) {
    %c0_i32 = arith.constant 0 : i32
    %c0_i32_0 = arith.constant 0 : i32
    %c0_i32_1 = arith.constant 0 : i32
    %c0_i32_2 = arith.constant 0 : i32
    return %c0_i32, %c0_i32_0, %c0_i32_1 : i32, i32, i32
  }
  func.func @transform_5(%arg0: i32) -> (i32, i32, i32) {
    %c0_i32 = arith.constant 0 : i32
    %c0_i32_0 = arith.constant 0 : i32
    %c0_i32_1 = arith.constant 0 : i32
    %c0_i32_2 = arith.constant 0 : i32
    return %c0_i32, %c0_i32_0, %c0_i32_1 : i32, i32, i32
  }
  func.func @transform_6(%arg0: i32) -> (i32, i32, i32) {
    %c0_i32 = arith.constant 0 : i32
    %c0_i32_0 = arith.constant 0 : i32
    %c0_i32_1 = arith.constant 0 : i32
    return %arg0, %c0_i32, %c0_i32_0 : i32, i32, i32
  }
  func.func @transform_7(%arg0: i32) -> (i32, i32, i32) {
    %c1_i32 = arith.constant 1 : i32
    %0 = arith.subi %c1_i32, %arg0 : i32
    %c0_i32 = arith.constant 0 : i32
    %c0_i32_0 = arith.constant 0 : i32
    %c0_i32_1 = arith.constant 0 : i32
    return %0, %c0_i32, %c0_i32_0 : i32, i32, i32
  }
  func.func @transform_8(%arg0: i32) -> (i32, i32, i32) {
    %c0_i32 = arith.constant 0 : i32
    %c0_i32_0 = arith.constant 0 : i32
    %c0_i32_1 = arith.constant 0 : i32
    %c0_i32_2 = arith.constant 0 : i32
    return %c0_i32, %c0_i32_0, %c0_i32_1 : i32, i32, i32
  }
}

</mosaic_0001>

<bundles_post_ra>
// kernel: tpu_custom_call.1
= control target key start
LH: loop header
LB: loop body
LE: loop exit
PB: predicated region body
PF: predicated region fallthrough
CT: control target
= control target key end

     0   :  { %s5550_s0 = inlined_call_operand.hbm [shape: bf16[16,8,128], index: 0, kind: input, shape index: {}]   ;;  %s5551_s1 = inlined_call_operand.hbm [shape: bf16[16,8,128], index: 1, kind: input, shape index: {}]   ;;  %s5552_s2 = inlined_call_operand.hbm [shape: bf16[2,1,128,384], index: 2, kind: input, shape index: {}]   ;;  %s5553_s3 = inlined_call_operand.hbm [shape: bf16[2,128,384], index: 3, kind: input, shape index: {}]   ;;  %s5554_s4 = inlined_call_operand.hbm [shape: f32[2,1,384], index: 4, kind: input, shape index: {}]   ;;  %s5555_s5 = inlined_call_operand.vmem [shape: f32[2,1,128], index: 5, kind: input, shape index: {}]   ;;  %s5556_s6 = inlined_call_operand.hbm [shape: bf16[16,8,128], index: 6, kind: output, shape index: {0}]   ;;  %s5557_s7 = inlined_call_operand.hbm [shape: bf16[16,8,128], index: 7, kind: output, shape index: {1}]   ;;  %s5558_s8 = inlined_call_operand.hbm [shape: f32[2,8,128], index: 8, kind: output, shape index: {2}]  }
   0x1   :  { %5608 = sst [smem:[#allocation89_spill]] %s5550_s0 }
   0x2   :  { %5609 = sst [smem:[#allocation90_spill]] %s5551_s1 }
   0x3   :  { %5610 = sst [smem:[#allocation91_spill]] %s5552_s2 }
   0x4   :  { %5611 = sst [smem:[#allocation92_spill]] %s5553_s3 }
   0x5   :  { %5612 = sst [smem:[#allocation93_spill]] %s5554_s4 }
   0x6   :  { %14 = vsyncpa [#allocation6], 0 }
   0x7   :  { %16 = vsyncpa [#allocation6 + $0x1], 0 }
   0x8   :  { %17 = vsyncpa [#allocation9], 0 }
   0x9   :  { %19 = vsyncpa [#allocation9 + $0x1], 0 }
   0xa   :  { %20 = vsyncpa [#allocation12], 0 }
   0xb   :  { %21 = vsyncpa [#allocation7], 0 }
   0xc   :  { %23 = vsyncpa [#allocation7 + $0x1], 0 }
   0xd   :  { %24 = vsyncpa [#allocation16], 0 }
   0xe   :  { %26 = vsyncpa [#allocation16 + $0x1], 0  ;;  %s4391_s27 = smov 0   ;;  %s4393_s28 = smov 0  }
   0xf   :  { %s4395_s29 = smov 0   ;;  %s4397_s30 = smov 0  }
  0x10   :  { %s4399_s9 = smov 0   ;;  %s4401_s10 = smov 0  }
  0x11   :  { %s4403_s11 = smov 0  }
  0x12 LB: > { %5613 = sst [smem:[#allocation25_spill]] %s4325_s10  ;;  %s4427_s12 = sadd.s32 4294967295, %s4329_s11   ;;  %s4329_s11 = sphi %s4403_s11, %s5834_s11   ;;  %s4325_s10 = sphi %s4401_s10, %s5828_s10   ;;  %s4321_s9 = sphi %s4399_s9, %s5833_s9   ;;  %s4317_s30 = sphi %s4397_s30, %s5832_s30   ;;  %s4313_s29 = sphi %s4395_s29, %s5831_s29   ;;  %s4309_s28 = sphi %s4393_s28, %s5830_s28   ;;  %s4305_s27 = sphi %s4391_s27, %s5829_s27  }
  0x13   : > { %p80_p0 = scmp.ne.s32.totalorder %s4309_s28, %s4305_s27  ;;  %p5563_p1 = scmp.eq.s32.totalorder %s4427_s12, 0 }
  0x14   : > { %p5565_p2 = scmp.eq.s32.totalorder %s4427_s12, 1  ;;  %p3116_p3 = scmp.ge.s32.totalorder %s4329_s11, 1 }
  0x15   : > { %p250_p4 = scmp.lt.s32.totalorder %s4329_s11, 3  ;;  %p4440_p5 = por %p80_p0, %p5563_p1 }
  0x16   : > { %s5616_s2 = sld [smem:[#allocation91_spill]]  ;;  %s4331_s18 = smov [#allocation10]  }
  0x17   : > { %p4445_p7 = pnand %p3116_p3, %p250_p4  ;;  %s263_s19 = sshll.u32 %s4331_s18, 4  ;;  %s264_s19 = int_to_ptr.vmem [resolvable:$true] %s263_s19 }
  0x18   : > { %s5618_s3 = sld [smem:[#allocation92_spill]]  ;;  %s4332_s24 = smov 192  }
  0x19   : > { %p3742_p8 = pneg %p4445_p7  ;;  %s4333_s25 = smov 12  }
  0x1a   : > { %s5619_s4 = sld [smem:[#allocation93_spill]]  ;;  %s4334_s18 = smov [#allocation11]  }
  0x1b   : > { %p4456_p9 = pnand %p3742_p8, %p5563_p1  ;;  %s277_s21 = sshll.u32 %s4334_s18, 4  ;;  %s278_s21 = int_to_ptr.vmem [resolvable:$true] %s277_s21 }
  0x1c   : > { %s261_s17 = sshll.u32 %s5616_s2, 4  ;;  %s4335_s22 = smov [#allocation13]   ;;  %s262_s17 = int_to_ptr.hbm [resolvable:$true] %s261_s17 }
  0x1d   : > { %3745 = dma.hbm_to_vmem [thread:$0]  (!%p4456_p9), %s262_s17, 6144, %s264_s19, [#allocation9], %s4332_s24, %s4332_s24, %s4333_s25  }
  0x1e   : > { %s275_s23 = sshll.u32 %s5618_s3, 4  ;;  %s291_s17 = sshll.u32 %s4335_s22, 4  ;;  %s276_s23 = int_to_ptr.hbm [resolvable:$true] %s275_s23  ;;  %s292_s17 = int_to_ptr.vmem [resolvable:$true] %s291_s17 }
  0x1f   : > { %3748 = dma.hbm_to_vmem [thread:$0]  (!%p4456_p9), %s276_s23, 6144, %s278_s21, [#allocation12], %s4332_s24, %s4332_s24, %s4333_s25  }
  0x20   : > { %s289_s16 = sshll.u32 %s5619_s4, 4  ;;  %s4336_s19 = smov 48   ;;  %s290_s16 = int_to_ptr.hbm [resolvable:$true] %s289_s16 }
  0x21   : > { %s4337_s26 = smov 3   ;;  %s5560_s15 = sadd.s32 4294967294, %s4329_s11  }
  0x22   : > { %3751 = dma.hbm_to_vmem [thread:$0]  (!%p4456_p9), %s290_s16, 96, %s292_s17, [#allocation12], %s4336_s19, %s4336_s19, %s4337_s26  }
  0x23   : > { %p46_p11 = scmp.ne.s32.totalorder %s4325_s10, %s4321_s9  ;;  %p5559_p12 = scmp.eq.s32.totalorder %s4329_s11, 0 }
  0x24   : > { %p52_p13 = scmp.ne.s32.totalorder %s4321_s9, %s4317_s30  ;;  %p194_p3 = scmp.eq.s32.totalorder %s5560_s15, 1 }
  0x25   : > { %p4484_p4 = por %p5559_p12, %p46_p11  ;;  %p4490_p8 = por %p5565_p2, %p46_p11 }
  0x26   : > { %p4496_p9 = por %p5563_p1, %p52_p13  ;;  %p4500_p10 = por %p194_p3, %p52_p13 }
  0x27   : > { %p4507_p6 = por %p194_p3, %p80_p0  ;;  %p5564_p12 = scmp.lt.s32.totalorder %s4329_s11, 2 }
  0x28   : > { %s5623_s25 = scalar_select %p4500_p10, 1, 0 }
  0x29   : > { %s5625_s16 = scalar_select %p4507_p6, 1, 0 }
  0x2a   : > { %5624 = sst [smem:[#allocation26_spill]] %s5623_s25  ;;  %s308_s21 = sand.u32 1, %s4325_s10  }
  0x2b   : > { %5626 = sst [smem:[#allocation27_spill]] %s5625_s16  ;;  %s3610_s22 = sshll.u32 %s4329_s11, 5 }
  0x2c   : > { %s3121_s17 = sshll.u32 %s308_s21, 5  ;;  %s5627_s0 = sld [smem:[#allocation89_spill]] }
  0x2d   : > { %s312_s2 = scalar_lea.vmem [#allocation5], %s3121_s17  ;;  %p4521_p11 = pnand %p5564_p12, %p4484_p4 }
  0x2e   : > { %s320_s3 = sshll.u32 %s312_s2, 4  ;;  %s309_s4 = scalar_lea.sflag [#allocation6], %s308_s21  ;;  %s321_s3 = int_to_ptr.vmem [resolvable:$true] %s320_s3 }
  0x2f   : > { %p4107_p13 = pneg %p4521_p11 }
  0x32   : > { %s317_s15 = scalar_lea.hbm %s5627_s0, %s3610_s22  ;;  %s4110_s22 = scalar_lea.hbm %s5627_s0, 64 }
  0x33   : > { %s318_s18 = sshll.u32 %s317_s15, 4  ;;  %s319_s18 = int_to_ptr.hbm [resolvable:$true] %s318_s18 }
  0x34   : > { %s4103_s16 = sshra.s32 %s319_s18, 4  ;;  %s4104_s16 = int_to_ptr.hbm [resolvable:$true] %s4103_s16 }
  0x35   : > { %s4105_s25 = scalar_lea.hbm %s4104_s16, 32  ;;  %p4111_p4 = scmp.lt.s32.totalorder %s4104_s16, %s5627_s0 }
  0x36   : > { %p4106_p0 = scmp.ne.s32.totalorder %s4104_s16, %s4105_s25  ;;  %p4112_p12 = scmp.lt.s32.totalorder %s4110_s22, %s4105_s25 }
  0x38   : > { %p4108_p3 = pnand %p4107_p13, %p4106_p0  ;;  %p4113_p2 = por %p4112_p12, %p4111_p4 }
  0x3a   : > { %p4109_p1 = pneg %p4108_p3 }
  0x3c   : > { %p4114_p6 = pnand %p4113_p2, %p4109_p1 }
  0x3e   : > { %4117 = shalt.err (!%p4114_p6)
}
  0x3f   : > { %s5566_s21 = smov 64   ;;  %s5567_s19 = smov 4  }
  0x40   : > { %3755 = dma.hbm_to_vmem [thread:$0]  (!%p4521_p11), %s319_s18, 512, %s321_s3, %s309_s4, %s5566_s21, %s5566_s21, %s5567_s19  }
  0x41   : > { %s4539_s25 = sadd.s32 1, %s4329_s11   ;;  %s62_s16 = ssub.s32 1, %s4329_s11 }
  0x42   : > { %s36_s26 = ssub.s32 %s4329_s11, %s4539_s25  ;;  %s63_s15 = ssub.s32 1, %s4539_s25 }
  0x43   : > { %p37_p1 = scmp.eq.s32.totalorder %s36_s26, 0  ;;  %s64_s2 = ssub.s32 %s62_s16, %s63_s15 }
  0x44   : > { %p65_p2 = scmp.eq.s32.totalorder %s64_s2, 0  ;;  %s67_s22 = sadd.s32 1, %s4313_s29 }
  0x45   : > { %s5629_s23 = sadd.s32 1, %s4325_s10  ;;  %p74_p6 = scmp.ne.s32.totalorder %s4313_s29, %s4309_s28 }
  0x46   : > { %s4549_s17 = scalar_select %p37_p1, %s4325_s10, %s5629_s23  }
  0x47   : > { %s4552_s27 = scalar_select %p65_p2, %s4313_s29, %s67_s22  }
  0x48   : > { %5630 = sst [smem:[#allocation28_spill]] %s4549_s17  ;;  %s330_s0 = sand.u32 1, %s4329_s11  }
  0x49   : > { %5631 = sst [smem:[#allocation29_spill]] %s4552_s27  ;;  %s332_s3 = sand.u32 1, %s4313_s29  }
  0x4a   : > { %p5632_p12 = scmp.eq.s32.totalorder %s4329_s11, 0  ;;  %p5633_p0 = scmp.eq.s32.totalorder %s4427_s12, 1 }
  0x4b   : > { %s3124_s18 = sshll.u32 %s332_s3, 5  ;;  %s3611_s26 = sshll.u32 %s62_s16, 5 }
  0x4c   : > { %p76_p11 = por %p74_p6, %p5632_p12  ;;  %p4562_p13 = por %p5633_p0, %p74_p6 }
  0x4d   : > { %s5635_s1 = sld [smem:[#allocation90_spill]]  ;;  %s334_s19 = scalar_lea.vmem [#allocation8], %s3124_s18 }
  0x4e   : > { %s343_s22 = sshll.u32 %s334_s19, 4  ;;  %p5636_p3 = scmp.lt.s32.totalorder %s4329_s11, 2  ;;  %s344_s22 = int_to_ptr.vmem [resolvable:$true] %s343_s22 }
  0x4f   : > { %s331_s10 = scalar_lea.sflag [#allocation9], %s330_s0 }
  0x50   : > { %p4571_p4 = pnand %p5636_p3, %p76_p11 }
  0x52   : > { %p4137_p2 = pneg %p4571_p4 }
  0x53   : > { %s340_s21 = scalar_lea.hbm %s5635_s1, %s3611_s26  ;;  %s4140_s19 = scalar_lea.hbm %s5635_s1, 64 }
  0x54   : > { %s341_s23 = sshll.u32 %s340_s21, 4  ;;  %s342_s23 = int_to_ptr.hbm [resolvable:$true] %s341_s23 }
  0x55   : > { %s4133_s27 = sshra.s32 %s342_s23, 4  ;;  %s4134_s27 = int_to_ptr.hbm [resolvable:$true] %s4133_s27 }
  0x56   : > { %s4135_s3 = scalar_lea.hbm %s4134_s27, 32  ;;  %p4141_p11 = scmp.lt.s32.totalorder %s4134_s27, %s5635_s1 }
  0x57   : > { %p4136_p1 = scmp.ne.s32.totalorder %s4134_s27, %s4135_s3  ;;  %p4142_p0 = scmp.lt.s32.totalorder %s4140_s19, %s4135_s3 }
  0x59   : > { %p4138_p6 = pnand %p4137_p2, %p4136_p1  ;;  %p4143_p3 = por %p4142_p0, %p4141_p11 }
  0x5b   : > { %p4139_p12 = pneg %p4138_p6 }
  0x5d   : > { %p4144_p10 = pnand %p4143_p3, %p4139_p12 }
  0x5f   : > { %4147 = shalt.err (!%p4144_p10)
}
  0x60   : > { %s5638_s0 = smov 4   ;;  %s5639_s15 = smov 64  }
  0x61   : > { %3758 = dma.hbm_to_vmem [thread:$0]  (!%p4571_p4), %s342_s23, 512, %s344_s22, %s331_s10, %s5639_s15, %s5639_s15, %s5638_s0  }
  0x62   : > { %355 = sbr.rel (%p4445_p7) target bundleno = 1738 (0x6ca), region = 44 }
  0x67   : > { %s4591_s2 = sand.u32 1, %s4321_s9  }
  0x68   : > { %s3128_s27 = sshll.u32 %s4591_s2, 5  ;;  %s358_s3 = scalar_lea.sflag [#allocation6], %s4591_s2 }
  0x69   : > { %s4595_s21 = scalar_lea.vmem [#allocation5], %s3128_s27 }
  0x6a   : > { %4276 = dma.done.wait (%p4496_p9), %s358_s3, 512  }
  0x6b   : > { %4278 = vsyncadd (%p4496_p9), %s358_s3, 4294966784  ;;  %s367_s10 = sand.u32 1, %s4427_s12   ;;  %s369_s14 = sand.u32 1, %s4309_s28  }
  0x6c   : > { %s3129_s17 = sshll.u32 %s369_s14, 5  ;;  %s368_s23 = scalar_lea.sflag [#allocation9], %s367_s10 }
  0x6d   : > { %s4605_s22 = scalar_lea.vmem [#allocation8], %s3129_s17 }
  0x6e   : > { %4280 = dma.done.wait (%p4440_p5), %s368_s23, 512  }
  0x6f   : > { %4282 = vsyncadd (%p4440_p5), %s368_s23, 4294966784  ;;  %p5640_p7 = scmp.eq.s32.totalorder %s4427_s12, 0 }
  0x71   : > { %4284 = dma.done.wait (%p5640_p7), [#allocation9], 6144   ;;  %p5641_p10 = pmov %p5640_p7 }
  0x72   : > { %p5642_p9 = pmov %p5640_p7 }
  0x73   : > { %4286 = vsyncadd (%p5641_p10), [#allocation9], 4294961152 }
  0x74   : > { %4288 = dma.done.wait (%p5642_p9), [#allocation12], 6240   ;;  %p5643_p4 = pmov %p5640_p7 }
  0x75   : > { %s4619_s20 = scalar_lea.vmem [#allocation14], %s3128_s27  ;;  %s4621_s16 = scalar_lea.vmem [#allocation15], %s3129_s17 }
  0x76   : > { %4290 = vsyncadd (%p5643_p4), [#allocation12], 4294961056  ;;  %p5644_p1 = scmp.ne.s32.totalorder %s4427_s12, 0 }
  0x78   : > { %439 = sbr.rel (%p5644_p1) target bundleno = 128 (0x80), region = 68 }
  0x7d   : > { %v4340_v0 = vmov 0.0  }
  0x7e   : > { %440 = vst [vmem:[#allocation4] sm:$0xff] %v4340_v0 }
  0x7f   : > { %441 = vst [vmem:[#allocation4 + $0x8] sm:$0xff] %v4340_v0 }
  0x80 PF: > { %v3238_v1 = vld [vmem:[#allocation10 + $0xa8] sm:$0xf]  ;;  %v3638_v2 = vld [vmem:[#allocation10 + $0xb0] sm:$0xf0]  ;;  %v3637_v3 = vld [vmem:[#allocation10 + $0xac] sm:$0xf] }
  0x81   : > { %v3239_v4 = vor.u32 %v3638_v2, %v3238_v1  ;;  %v3240_v5 = vld [vmem:[#allocation10 + $0xb4] sm:$0xf0]  ;;  %v3246_v6 = vld [vmem:[#allocation10 + $0xb0] sm:$0xf]  ;;  %v3639_v7 = vld [vmem:[#allocation10 + $0xb8] sm:$0xf0] }
  0x82   : > { %v3243_v8 = vor.u32 %v3637_v3, %v3240_v5  ;;  %v3247_v9 = vor.u32 %v3639_v7, %v3246_v6  ;;  %v3350_v10 = vld [vmem:[#allocation10 + $0x168] sm:$0xf]  ;;  %v3666_v11 = vld [vmem:[#allocation10 + $0x170] sm:$0xf0]  ;;  %v3226_v12 = vld [vmem:[#allocation10 + $0x90] sm:$0xf] }
  0x83   : > { %642 = vmatpush.bf16.msra.mxu0 %v3239_v4  ;;  %v3351_v13 = vor.u32 %v3666_v11, %v3350_v10  ;;  %v3635_v14 = vld [vmem:[#allocation10 + $0x98] sm:$0xf0]  ;;  %v3634_v15 = vld [vmem:[#allocation10 + $0x94] sm:$0xf]  ;;  %v3228_v16 = vld [vmem:[#allocation10 + $0x9c] sm:$0xf0] }
  0x84   : > { %671 = vmatpush.bf16.msra.mxu1 %v3243_v8  ;;  %700 = vmatpush.bf16.msra.mxu2 %v3247_v9  ;;  %v3227_v17 = vor.u32 %v3635_v14, %v3226_v12  ;;  %v3231_v18 = vor.u32 %v3634_v15, %v3228_v16  ;;  %v3234_v19 = vld [vmem:[#allocation10 + $0x98] sm:$0xf]  ;;  %v3636_v20 = vld [vmem:[#allocation10 + $0xa0] sm:$0xf0]  ;;  %v3338_v21 = vld [vmem:[#allocation10 + $0x150] sm:$0xf] }
  0x85   : > { %955 = vmatpush.bf16.msra.mxu3 %v3351_v13  ;;  %v3235_v22 = vor.u32 %v3636_v20, %v3234_v19  ;;  %v3663_v23 = vld [vmem:[#allocation10 + $0x158] sm:$0xf0]  ;;  %v3214_v24 = vld [vmem:[#allocation10 + $0x78] sm:$0xf]  ;;  %v3632_v25 = vld [vmem:[#allocation10 + $0x80] sm:$0xf0] }
  0x86   : > { %v3339_v26 = vor.u32 %v3663_v23, %v3338_v21  ;;  %v3631_v27 = vld [vmem:[#allocation10 + $0x7c] sm:$0xf]  ;;  %v3216_v28 = vld [vmem:[#allocation10 + $0x84] sm:$0xf0]  ;;  %v3222_v29 = vld [vmem:[#allocation10 + $0x80] sm:$0xf]  ;;  %v3215_v30 = vor.u32 %v3632_v25, %v3214_v24 }
  0x87   : > { %643 = vmatpush.bf16.msra.mxu0 %v3227_v17  ;;  %v3633_v31 = vld [vmem:[#allocation10 + $0x88] sm:$0xf0]  ;;  %v3326_v32 = vld [vmem:[#allocation10 + $0x138] sm:$0xf]  ;;  %v3660_v33 = vld [vmem:[#allocation10 + $0x140] sm:$0xf0]  ;;  %v3219_v34 = vor.u32 %v3631_v27, %v3216_v28 }
  0x88   : > { %672 = vmatpush.bf16.msra.mxu1 %v3231_v18  ;;  %701 = vmatpush.bf16.msra.mxu2 %v3235_v22  ;;  %v3223_v35 = vor.u32 %v3633_v31, %v3222_v29  ;;  %v3202_v36 = vld [vmem:[#allocation10 + $0x60] sm:$0xf]  ;;  %v3629_v37 = vld [vmem:[#allocation10 + $0x68] sm:$0xf0]  ;;  %v3628_v38 = vld [vmem:[#allocation10 + $0x64] sm:$0xf]  ;;  %v3327_v39 = vor.u32 %v3660_v33, %v3326_v32 }
  0x89   : > { %956 = vmatpush.bf16.msra.mxu3 %v3339_v26  ;;  %v3204_v40 = vld [vmem:[#allocation10 + $0x6c] sm:$0xf0]  ;;  %v3210_v41 = vld [vmem:[#allocation10 + $0x68] sm:$0xf]  ;;  %v3630_v42 = vld [vmem:[#allocation10 + $0x70] sm:$0xf0]  ;;  %v3203_v45 = vor.u32 %v3629_v37, %v3202_v36 }
  0x8a   : > { %v3314_v43 = vld [vmem:[#allocation10 + $0x120] sm:$0xf]  ;;  %v3657_v44 = vld [vmem:[#allocation10 + $0x128] sm:$0xf0]  ;;  %v3207_v46 = vor.u32 %v3628_v38, %v3204_v40  ;;  %v3211_v47 = vor.u32 %v3630_v42, %v3210_v41  ;;  %v3190_v48 = vld [vmem:[#allocation10 + $0x48] sm:$0xf] }
  0x8b   : > { %644 = vmatpush.bf16.msra.mxu0 %v3215_v30  ;;  %v3626_v49 = vld [vmem:[#allocation10 + $0x50] sm:$0xf0]  ;;  %v3625_v50 = vld [vmem:[#allocation10 + $0x4c] sm:$0xf]  ;;  %v3315_v51 = vor.u32 %v3657_v44, %v3314_v43  ;;  %v3192_v52 = vld [vmem:[#allocation10 + $0x54] sm:$0xf0] }
  0x8c   : > { %673 = vmatpush.bf16.msra.mxu1 %v3219_v34  ;;  %702 = vmatpush.bf16.msra.mxu2 %v3223_v35  ;;  %v3198_v53 = vld [vmem:[#allocation10 + $0x50] sm:$0xf]  ;;  %v3627_v54 = vld [vmem:[#allocation10 + $0x58] sm:$0xf0]  ;;  %v3302_v55 = vld [vmem:[#allocation10 + $0x108] sm:$0xf]  ;;  %v3191_v57 = vor.u32 %v3626_v49, %v3190_v48  ;;  %v3195_v58 = vor.u32 %v3625_v50, %v3192_v52 }
  0x8d   : > { %957 = vmatpush.bf16.msra.mxu3 %v3327_v39  ;;  %v3654_v56 = vld [vmem:[#allocation10 + $0x110] sm:$0xf0]  ;;  %v3199_v59 = vor.u32 %v3627_v54, %v3198_v53  ;;  %v3178_v60 = vld [vmem:[#allocation10 + $0x30] sm:$0xf]  ;;  %v3623_v61 = vld [vmem:[#allocation10 + $0x38] sm:$0xf0] }
  0x8e   : > { %v3622_v62 = vld [vmem:[#allocation10 + $0x34] sm:$0xf]  ;;  %v3303_v63 = vor.u32 %v3654_v56, %v3302_v55  ;;  %v3180_v0 = vld [vmem:[#allocation10 + $0x3c] sm:$0xf0]  ;;  %v3186_v1 = vld [vmem:[#allocation10 + $0x38] sm:$0xf]  ;;  %v3179_v5 = vor.u32 %v3623_v61, %v3178_v60 }
  0x8f   : > { %645 = vmatpush.bf16.msra.mxu0 %v3203_v45  ;;  %v3624_v2 = vld [vmem:[#allocation10 + $0x40] sm:$0xf0]  ;;  %v3290_v3 = vld [vmem:[#allocation10 + $0xf0] sm:$0xf]  ;;  %v3651_v4 = vld [vmem:[#allocation10 + $0xf8] sm:$0xf0]  ;;  %v3183_v6 = vor.u32 %v3622_v62, %v3180_v0 }
  0x90   : > { %674 = vmatpush.bf16.msra.mxu1 %v3207_v46  ;;  %703 = vmatpush.bf16.msra.mxu2 %v3211_v47  ;;  %v3187_v7 = vor.u32 %v3624_v2, %v3186_v1  ;;  %v3166_v8 = vld [vmem:[#allocation10 + $0x18] sm:$0xf]  ;;  %v3620_v9 = vld [vmem:[#allocation10 + $0x20] sm:$0xf0]  ;;  %v3619_v10 = vld [vmem:[#allocation10 + $0x1c] sm:$0xf]  ;;  %v3291_v11 = vor.u32 %v3651_v4, %v3290_v3 }
  0x91   : > { %958 = vmatpush.bf16.msra.mxu3 %v3315_v51  ;;  %v3168_v12 = vld [vmem:[#allocation10 + $0x24] sm:$0xf0]  ;;  %v3174_v13 = vld [vmem:[#allocation10 + $0x20] sm:$0xf]  ;;  %v3621_v14 = vld [vmem:[#allocation10 + $0x28] sm:$0xf0]  ;;  %v3167_v17 = vor.u32 %v3620_v9, %v3166_v8 }
  0x92   : > { %v3278_v15 = vld [vmem:[#allocation10 + $0xd8] sm:$0xf]  ;;  %v3648_v16 = vld [vmem:[#allocation10 + $0xe0] sm:$0xf0]  ;;  %v3154_v18 = vld [vmem:[#allocation10] sm:$0xf]  ;;  %v3171_v19 = vor.u32 %v3619_v10, %v3168_v12  ;;  %v3175_v20 = vor.u32 %v3621_v14, %v3174_v13 }
  0x93   : > { %646 = vmatpush.bf16.msra.mxu0 %v3191_v57  ;;  %v3617_v21 = vld [vmem:[#allocation10 + $0x8] sm:$0xf0]  ;;  %v3616_v22 = vld [vmem:[#allocation10 + $0x4] sm:$0xf]  ;;  %v3156_v23 = vld [vmem:[#allocation10 + $0xc] sm:$0xf0]  ;;  %v3279_v24 = vor.u32 %v3648_v16, %v3278_v15 }
  0x94   : > { %675 = vmatpush.bf16.msra.mxu1 %v3195_v58  ;;  %704 = vmatpush.bf16.msra.mxu2 %v3199_v59  ;;  %v3162_v25 = vld [vmem:[#allocation10 + $0x8] sm:$0xf]  ;;  %v3618_v26 = vld [vmem:[#allocation10 + $0x10] sm:$0xf0]  ;;  %v3266_v27 = vld [vmem:[#allocation10 + $0xc0] sm:$0xf]  ;;  %v3155_v31 = vor.u32 %v3617_v21, %v3154_v18  ;;  %v3159_v34 = vor.u32 %v3616_v22, %v3156_v23 }
  0x95   : > { %959 = vmatpush.bf16.msra.mxu3 %v3303_v63  ;;  %v3645_v28 = vld [vmem:[#allocation10 + $0xc8] sm:$0xf0]  ;;  %v3352_v30 = vld [vmem:[#allocation10 + $0x174] sm:$0xf0]  ;;  %v3358_v32 = vld [vmem:[#allocation10 + $0x170] sm:$0xf]  ;;  %v3163_v35 = vor.u32 %v3618_v26, %v3162_v25 }
  0x96   : > { %v3665_v29 = vld [vmem:[#allocation10 + $0x16c] sm:$0xf]  ;;  %v3667_v33 = vld [vmem:[#allocation10 + $0x178] sm:$0xf0]  ;;  %v3612_v36 = vld [vmem:[%s4595_s21] sm:$0xff]  ;;  %v3267_v37 = vor.u32 %v3645_v28, %v3266_v27  ;;  %p3599_p5 = scmp.ne.s32.totalorder %s4427_s12, 1 }
  0x97   : > { %647 = vmatpush.bf16.msra.mxu0 %v3179_v5  ;;  %v3355_v38 = vor.u32 %v3665_v29, %v3352_v30  ;;  %v3662_v39 = vld [vmem:[#allocation10 + $0x154] sm:$0xf]  ;;  %v3340_v40 = vld [vmem:[#allocation10 + $0x15c] sm:$0xf0]  ;;  %v3359_v41 = vor.u32 %v3667_v33, %v3358_v32  ;;  %v3689_v42 = vld [vmem:[#allocation11 + $0xac] sm:$0xf] }
  0x98   : > { %676 = vmatpush.bf16.msra.mxu1 %v3183_v6  ;;  %705 = vmatpush.bf16.msra.mxu2 %v3187_v7  ;;  %v3449_v43 = vld [vmem:[#allocation11 + $0xb4] sm:$0xf0]  ;;  %v3664_v45 = vld [vmem:[#allocation10 + $0x160] sm:$0xf0]  ;;  %v3343_v47 = vor.u32 %v3662_v39, %v3340_v40  ;;  %v3659_v48 = vld [vmem:[#allocation10 + $0x13c] sm:$0xf] }
  0x99   : > { %960 = vmatpush.bf16.msra.mxu3 %v3291_v11  ;;  %v3346_v44 = vld [vmem:[#allocation10 + $0x158] sm:$0xf]  ;;  %v4627_v46 = vld [vmem:[%s4605_s22] sm:$0xff]  ;;  %v4629_v49 = vor.u32 %v3689_v42, %v3449_v43  ;;  %v3447_v50 = vld [vmem:[#allocation11 + $0xa8] sm:$0xf] }
  0x9a   : > { %v3690_v51 = vld [vmem:[#allocation11 + $0xb0] sm:$0xf0]  ;;  %v3328_v52 = vld [vmem:[#allocation10 + $0x144] sm:$0xf0]  ;;  %v3347_v53 = vor.u32 %v3664_v45, %v3346_v44  ;;  %v3437_v55 = vld [vmem:[#allocation11 + $0x9c] sm:$0xf0] }
  0x9b   : > { %648 = vmatpush.bf16.msra.mxu0 %v3167_v17  ;;  %v3686_v54 = vld [vmem:[#allocation11 + $0x94] sm:$0xf]  ;;  %v4631_v56 = vor.u32 %v3690_v51, %v3447_v50  ;;  %v3334_v57 = vld [vmem:[#allocation10 + $0x140] sm:$0xf]  ;;  %v3661_v58 = vld [vmem:[#allocation10 + $0x148] sm:$0xf0]  ;;  %v3331_v60 = vor.u32 %v3659_v48, %v3328_v52 }
  0x9c   : > { %677 = vmatpush.bf16.msra.mxu1 %v3171_v19  ;;  %706 = vmatpush.bf16.msra.mxu2 %v3175_v20  ;;  %v3435_v59 = vld [vmem:[#allocation11 + $0x90] sm:$0xf]  ;;  %v3656_v61 = vld [vmem:[#allocation10 + $0x124] sm:$0xf]  ;;  %v4636_v63 = vor.u32 %v3686_v54, %v3437_v55  ;;  %v3687_v0 = vld [vmem:[#allocation11 + $0x98] sm:$0xf0]  ;;  %v3335_v3 = vor.u32 %v3661_v58, %v3334_v57 }
  0x9d   : > { %961 = vmatpush.bf16.msra.mxu3 %v3279_v24  ;;  %v3316_v62 = vld [vmem:[#allocation10 + $0x12c] sm:$0xf0]  ;;  %v3683_v1 = vld [vmem:[#allocation11 + $0x7c] sm:$0xf]  ;;  %v3425_v2 = vld [vmem:[#allocation11 + $0x84] sm:$0xf0]  ;;  %v4638_v4 = vor.u32 %v3687_v0, %v3435_v59 }
  0x9e   : > { %v3322_v5 = vld [vmem:[#allocation10 + $0x128] sm:$0xf]  ;;  %v3658_v6 = vld [vmem:[#allocation10 + $0x130] sm:$0xf0]  ;;  %v3423_v7 = vld [vmem:[#allocation11 + $0x78] sm:$0xf]  ;;  %v3319_v10 = vor.u32 %v3656_v61, %v3316_v62  ;;  %v4644_v11 = vor.u32 %v3683_v1, %v3425_v2 }
  0x9f   : > { %649 = vmatpush.bf16.msra.mxu0 %v3155_v31  ;;  %v3684_v8 = vld [vmem:[#allocation11 + $0x80] sm:$0xf0]  ;;  %v3411_v13 = vld [vmem:[#allocation11 + $0x60] sm:$0xf]  ;;  %v3681_v14 = vld [vmem:[#allocation11 + $0x68] sm:$0xf0]  ;;  %v3323_v18 = vor.u32 %v3658_v6, %v3322_v5 }
  0xa0   : > { %678 = vmatpush.bf16.msra.mxu1 %v3159_v34  ;;  %707 = vmatpush.bf16.msra.mxu2 %v3163_v35  ;;  %v4641_v9 = vor.u32 %v3684_v8, %v3423_v7  ;;  %v3680_v12 = vld [vmem:[#allocation11 + $0x64] sm:$0xf]  ;;  %v3653_v15 = vld [vmem:[#allocation10 + $0x10c] sm:$0xf]  ;;  %v3304_v16 = vld [vmem:[#allocation10 + $0x114] sm:$0xf0]  ;;  %v4647_v21 = vor.u32 %v3681_v14, %v3411_v13 }
  0xa1   : > { %962 = vmatpush.bf16.msra.mxu3 %v3267_v37  ;;  %v3413_v17 = vld [vmem:[#allocation11 + $0x6c] sm:$0xf0]  ;;  %v3655_v20 = vld [vmem:[#allocation10 + $0x118] sm:$0xf0]  ;;  %v3613_v22 = vld [vmem:[%s4595_s21 + $0x8] sm:$0xff]  ;;  %v3307_v23 = vor.u32 %v3653_v15, %v3304_v16 }
  0xa2   : > { %650 = vmatmul.bf16.vlgmr.msra.gmra.mxu0 %v3612_v36  ;;  %v3310_v19 = vld [vmem:[#allocation10 + $0x110] sm:$0xf]  ;;  %v4651_v24 = vor.u32 %v3680_v12, %v3413_v17  ;;  %v3677_v25 = vld [vmem:[#allocation11 + $0x4c] sm:$0xf]  ;;  %v3401_v26 = vld [vmem:[#allocation11 + $0x54] sm:$0xf0] }
  0xa3   : > { %984 = vmatpush.bf16.msrb.mxu0 %v3355_v38  ;;  %679 = vmatmul.bf16.vlgmr.msra.gmra.mxu1 %v3612_v36  ;;  %v3650_v27 = vld [vmem:[#allocation10 + $0xf4] sm:$0xf]  ;;  %v3292_v28 = vld [vmem:[#allocation10 + $0xfc] sm:$0xf0]  ;;  %v3311_v29 = vor.u32 %v3655_v20, %v3310_v19  ;;  %v4654_v30 = vld [vmem:[%s4605_s22 + $0x8] sm:$0xff]  ;;  %v4658_v31 = vor.u32 %v3677_v25, %v3401_v26 }
  0xa4   : > { %1013 = vmatpush.bf16.msrb.mxu1 %v3359_v41  ;;  %708 = vmatmul.bf16.vlgmr.msra.gmra.mxu2 %v3612_v36  ;;  %5645 = vst [vmem:[#allocation30_spill] sm:$0xff] %v4651_v24  ;;  %v3295_v32 = vor.u32 %v3650_v27, %v3292_v28  ;;  %v3399_v33 = vld [vmem:[#allocation11 + $0x48] sm:$0xf]  ;;  %v3678_v34 = vld [vmem:[#allocation11 + $0x50] sm:$0xf0] }
  0xa5   : > { %963 = vmatmul.bf16.vlgmr.msra.gmra.mxu3 %v4627_v46  ;;  %1272 = vmatpush.bf16.msrb.mxu2 %v4631_v56  ;;  %5646 = vst [vmem:[#allocation31_spill] sm:$0xff] %v4658_v31  ;;  %v3674_v35 = vld [vmem:[#allocation11 + $0x34] sm:$0xf]  ;;  %v3389_v36 = vld [vmem:[#allocation11 + $0x3c] sm:$0xf0]  ;;  %v4660_v37 = vor.u32 %v3678_v34, %v3399_v33 }
  0xa6   : > { %1285 = vmatpush.bf16.msrb.mxu3 %v4629_v49  ;;  %v3647_v38 = vld [vmem:[#allocation10 + $0xdc] sm:$0xf]  ;;  %v3280_v39 = vld [vmem:[#allocation10 + $0xe4] sm:$0xf0]  ;;  %v3387_v40 = vld [vmem:[#allocation11 + $0x30] sm:$0xf]  ;;  %v4665_v41 = vor.u32 %v3674_v35, %v3389_v36 }
  0xa7   : > { %985 = vmatpush.bf16.msrb.mxu0 %v3343_v47  ;;  %5647 = vst [vmem:[#allocation32_spill] sm:$0xff] %v4660_v37  ;;  %v3283_v42 = vor.u32 %v3647_v38, %v3280_v39  ;;  %v3675_v43 = vld [vmem:[#allocation11 + $0x38] sm:$0xf0]  ;;  %v3298_v44 = vld [vmem:[#allocation10 + $0xf8] sm:$0xf]  ;;  %v3614_v17 = vld [vmem:[%s4595_s21 + $0x10] sm:$0xff] }
  0xa8   : > { %1014 = vmatpush.bf16.msrb.mxu1 %v3347_v53  ;;  %5648 = vst [vmem:[#allocation33_spill] sm:$0xff] %v4665_v41  ;;  %v3652_v45 = vld [vmem:[#allocation10 + $0x100] sm:$0xf0]  ;;  %v3671_v47 = vld [vmem:[#allocation11 + $0x1c] sm:$0xf]  ;;  %v4667_v50 = vor.u32 %v3675_v43, %v3387_v40 }
  0xa9   : > { %1273 = vmatpush.bf16.msrb.mxu2 %v4638_v4  ;;  %v3377_v48 = vld [vmem:[#allocation11 + $0x24] sm:$0xf0]  ;;  %v3299_v51 = vor.u32 %v3652_v45, %v3298_v44  ;;  %v3644_v52 = vld [vmem:[#allocation10 + $0xc4] sm:$0xf]  ;;  %v3268_v53 = vld [vmem:[#allocation10 + $0xcc] sm:$0xf0] }
  0xaa   : > { %1286 = vmatpush.bf16.msrb.mxu3 %v4636_v63  ;;  %5649 = vst [vmem:[#allocation34_spill] sm:$0xff] %v4667_v50  ;;  %v3375_v54 = vld [vmem:[#allocation11 + $0x18] sm:$0xf]  ;;  %v3672_v55 = vld [vmem:[#allocation11 + $0x20] sm:$0xf0]  ;;  %v4673_v61 = vor.u32 %v3671_v47, %v3377_v48  ;;  %v3271_v0 = vor.u32 %v3644_v52, %v3268_v53 }
  0xab   : > { %986 = vmatpush.bf16.msrb.mxu0 %v3331_v60  ;;  %v3668_v57 = vld [vmem:[#allocation11 + $0x4] sm:$0xf]  ;;  %v4670_v58 = vor.u32 %v3672_v55, %v3375_v54  ;;  %v3286_v59 = vld [vmem:[#allocation10 + $0xe0] sm:$0xf]  ;;  %v3649_v60 = vld [vmem:[#allocation10 + $0xe8] sm:$0xf0] }
  0xac   : > { %1015 = vmatpush.bf16.msrb.mxu1 %v3335_v3  ;;  %5651 = vst [vmem:[#allocation36_spill] sm:$0xff] %v4673_v61  ;;  %v3365_v62 = vld [vmem:[#allocation11 + $0xc] sm:$0xf0]  ;;  %v3287_v1 = vor.u32 %v3649_v60, %v3286_v59  ;;  %v3363_v2 = vld [vmem:[#allocation11] sm:$0xf] }
  0xad   : > { %1274 = vmatpush.bf16.msrb.mxu2 %v4641_v9  ;;  %5650 = vst [vmem:[#allocation35_spill] sm:$0xff] %v4670_v58  ;;  %v3669_v3 = vld [vmem:[#allocation11 + $0x8] sm:$0xf0]  ;;  %v3274_v5 = vld [vmem:[#allocation10 + $0xc8] sm:$0xf]  ;;  %v4679_v15 = vor.u32 %v3668_v57, %v3365_v62 }
  0xae   : > { %1287 = vmatpush.bf16.msrb.mxu3 %v4644_v11  ;;  %v3646_v6 = vld [vmem:[#allocation10 + $0xd0] sm:$0xf0]  ;;  %v3455_v7 = vld [vmem:[#allocation11 + $0xb0] sm:$0xf]  ;;  %v3543_v8 = vld [vmem:[#allocation11 + $0x168] sm:$0xf]  ;;  %v4676_v13 = vor.u32 %v3669_v3, %v3363_v2 }
  0xaf   : > { %987 = vmatpush.bf16.msrb.mxu0 %v3319_v10  ;;  %v3714_v10 = vld [vmem:[#allocation11 + $0x170] sm:$0xf0]  ;;  %v3691_v12 = vld [vmem:[#allocation11 + $0xb8] sm:$0xf0]  ;;  %v3275_v14 = vor.u32 %v3646_v6, %v3274_v5  ;;  %5653 = vst [vmem:[#allocation38_spill] sm:$0xff] %v4679_v15 }
  0xb0   : > { %1016 = vmatpush.bf16.msrb.mxu1 %v3323_v18  ;;  %5652 = vst [vmem:[#allocation37_spill] sm:$0xff] %v4676_v13  ;;  %v4681_v16 = vor.u32 %v3691_v12, %v3455_v7  ;;  %v4684_v18 = vor.u32 %v3714_v10, %v3543_v8  ;;  %v3531_v19 = vld [vmem:[#allocation11 + $0x150] sm:$0xf]  ;;  %v3711_v20 = vld [vmem:[#allocation11 + $0x158] sm:$0xf0] }
  0xb1   : > { %1275 = vmatpush.bf16.msrb.mxu2 %v4647_v21  ;;  %v3443_v25 = vld [vmem:[#allocation11 + $0x98] sm:$0xf]  ;;  %v3688_v26 = vld [vmem:[#allocation11 + $0xa0] sm:$0xf0]  ;;  %v3431_v34 = vld [vmem:[#allocation11 + $0x80] sm:$0xf] }
  0xb2   : > { %1288 = vmatpush.bf16.msrb.mxu3 %v4651_v24  ;;  %655 = vmatmul.bf16.gmra.mxu0 %v3613_v22  ;;  %v3519_v27 = vld [vmem:[#allocation11 + $0x138] sm:$0xf]  ;;  %v3708_v28 = vld [vmem:[#allocation11 + $0x140] sm:$0xf0]  ;;  %v3685_v36 = vld [vmem:[#allocation11 + $0x88] sm:$0xf0] }
  0xb3   : > { %988 = vmatpush.bf16.msrb.mxu0 %v3307_v23  ;;  %684 = vmatmul.bf16.gmra.mxu1 %v3613_v22  ;;  %v4693_v23 = vor.u32 %v3711_v20, %v3531_v19  ;;  %v3545_v33 = vld [vmem:[#allocation11 + $0x174] sm:$0xf0]  ;;  %v4702_v38 = vor.u32 %v3708_v28, %v3519_v27  ;;  %v4704_v39 = vor.u32 %v3685_v36, %v3431_v34  ;;  %v3710_v40 = vld [vmem:[#allocation11 + $0x154] sm:$0xf]  ;;  %v3419_v43 = vld [vmem:[#allocation11 + $0x68] sm:$0xf] }
  0xb4   : > { %1017 = vmatpush.bf16.msrb.mxu1 %v3311_v29  ;;  %713 = vmatmul.bf16.gmra.mxu2 %v3613_v22  ;;  %v4687_v22 = vld [vmem:[%s4605_s22 + $0x10] sm:$0xff]  ;;  %v4695_v29 = vor.u32 %v3688_v26, %v3443_v25  ;;  %v3507_v44 = vld [vmem:[#allocation11 + $0x120] sm:$0xf]  ;;  %v3705_v45 = vld [vmem:[#allocation11 + $0x128] sm:$0xf0] }
  0xb5   : > { %968 = vmatmul.bf16.gmra.mxu3 %v4654_v30  ;;  %1276 = vmatpush.bf16.msrb.mxu2 %v4660_v37  ;;  %v3682_v48 = vld [vmem:[#allocation11 + $0x70] sm:$0xf0]  ;;  %v3551_v52 = vld [vmem:[#allocation11 + $0x170] sm:$0xf]  ;;  %v3715_v53 = vld [vmem:[#allocation11 + $0x178] sm:$0xf0]  ;;  %v4713_v54 = vor.u32 %v3705_v45, %v3507_v44 }
  0xb6   : > { %1289 = vmatpush.bf16.msrb.mxu3 %v4658_v31  ;;  %v3407_v55 = vld [vmem:[#allocation11 + $0x50] sm:$0xf]  ;;  %v3679_v57 = vld [vmem:[#allocation11 + $0x58] sm:$0xf0]  ;;  %v4715_v59 = vor.u32 %v3715_v53, %v3551_v52  ;;  %v3495_v60 = vld [vmem:[#allocation11 + $0x108] sm:$0xf] }
  0xb7   : > { %989 = vmatpush.bf16.msrb.mxu0 %v3295_v32  ;;  %v3713_v32 = vld [vmem:[#allocation11 + $0x16c] sm:$0xf]  ;;  %v3702_v62 = vld [vmem:[#allocation11 + $0x110] sm:$0xf0]  ;;  %v3483_v3 = vld [vmem:[#allocation11 + $0xf0] sm:$0xf] }
  0xb8   : > { %1018 = vmatpush.bf16.msrb.mxu1 %v3299_v51  ;;  %v4698_v35 = vor.u32 %v3713_v32, %v3545_v33  ;;  %v4710_v51 = vor.u32 %v3682_v48, %v3419_v43  ;;  %v4724_v2 = vor.u32 %v3702_v62, %v3495_v60  ;;  %v3699_v5 = vld [vmem:[#allocation11 + $0xf8] sm:$0xf0]  ;;  %v3395_v8 = vld [vmem:[#allocation11 + $0x38] sm:$0xf]  ;;  %v3676_v10 = vld [vmem:[#allocation11 + $0x40] sm:$0xf0] }
  0xb9   : > { %1277 = vmatpush.bf16.msrb.mxu2 %v4667_v50  ;;  %v4727_v6 = vld [vmem:[%s4605_s22 + $0x18] sm:$0xff]  ;;  %v4731_v7 = vor.u32 %v3699_v5, %v3483_v3  ;;  %v3521_v20 = vld [vmem:[#allocation11 + $0x144] sm:$0xf0]  ;;  %v3383_v25 = vld [vmem:[#allocation11 + $0x20] sm:$0xf] }
  0xba   : > { %1290 = vmatpush.bf16.msrb.mxu3 %v4665_v41  ;;  %v3471_v12 = vld [vmem:[#allocation11 + $0xd8] sm:$0xf]  ;;  %v3707_v19 = vld [vmem:[#allocation11 + $0x13c] sm:$0xf]  ;;  %v3459_v26 = vld [vmem:[#allocation11 + $0xc0] sm:$0xf] }
  0xbb   : > { %990 = vmatpush.bf16.msrb.mxu0 %v3283_v42  ;;  %v3533_v42 = vld [vmem:[#allocation11 + $0x15c] sm:$0xf0]  ;;  %v3693_v27 = vld [vmem:[#allocation11 + $0xc8] sm:$0xf0]  ;;  %v4736_v28 = vor.u32 %v3707_v19, %v3521_v20  ;;  %v3539_v33 = vld [vmem:[#allocation11 + $0x158] sm:$0xf] }
  0xbc   : > { %1019 = vmatpush.bf16.msrb.mxu1 %v3287_v1  ;;  %v4707_v47 = vor.u32 %v3710_v40, %v3533_v42  ;;  %v3615_v1 = vld [vmem:[%s4595_s21 + $0x18] sm:$0xff]  ;;  %v3673_v32 = vld [vmem:[#allocation11 + $0x28] sm:$0xf0]  ;;  %v3712_v34 = vld [vmem:[#allocation11 + $0x160] sm:$0xf0]  ;;  %v4756_v62 = vor.u32 %v3693_v27, %v3459_v26 }
  0xbd   : > { %1278 = vmatpush.bf16.msrb.mxu2 %v4670_v58  ;;  %v4742_v40 = vor.u32 %v3673_v32, %v3383_v25  ;;  %v4744_v42 = vor.u32 %v3712_v34, %v3539_v33  ;;  %v3704_v43 = vld [vmem:[#allocation11 + $0x124] sm:$0xf]  ;;  %v3509_v44 = vld [vmem:[#allocation11 + $0x12c] sm:$0xf0]  ;;  %v3371_v45 = vld [vmem:[#allocation11 + $0x8] sm:$0xf] }
  0xbe   : > { %1291 = vmatpush.bf16.msrb.mxu3 %v4673_v61  ;;  %v4747_v48 = vor.u32 %v3704_v43, %v3509_v44  ;;  %v3670_v52 = vld [vmem:[#allocation11 + $0x10] sm:$0xf0]  ;;  %v3527_v53 = vld [vmem:[#allocation11 + $0x140] sm:$0xf]  ;;  %v3701_v5 = vld [vmem:[#allocation11 + $0x10c] sm:$0xf] }
  0xbf   : > { %991 = vmatpush.bf16.msrb.mxu0 %v3271_v0  ;;  %v4720_v0 = vor.u32 %v3679_v57, %v3407_v55  ;;  %v3709_v55 = vld [vmem:[#allocation11 + $0x148] sm:$0xf0]  ;;  %v4753_v60 = vor.u32 %v3670_v52, %v3371_v45  ;;  %v3698_v19 = vld [vmem:[#allocation11 + $0xf4] sm:$0xf]  ;;  %v3485_v20 = vld [vmem:[#allocation11 + $0xfc] sm:$0xf0] }
  0xc0   : > { %1020 = vmatpush.bf16.msrb.mxu1 %v3275_v14  ;;  %v3696_v14 = vld [vmem:[#allocation11 + $0xe0] sm:$0xf0]  ;;  %v4750_v57 = vor.u32 %v3709_v55, %v3527_v53  ;;  %v3503_v26 = vld [vmem:[#allocation11 + $0x110] sm:$0xf]  ;;  %v3703_v27 = vld [vmem:[#allocation11 + $0x118] sm:$0xf0] }
  0xc1   : > { %1279 = vmatpush.bf16.msrb.mxu2 %v4676_v13  ;;  %v4740_v36 = vor.u32 %v3696_v14, %v3471_v12  ;;  %v3706_v14 = vld [vmem:[#allocation11 + $0x130] sm:$0xf0]  ;;  %v4778_v32 = vor.u32 %v3703_v27, %v3503_v26  ;;  %v4785_v33 = vld [vmem:[#allocation4 + $0x8] sm:$0xff]  ;;  %v3473_v44 = vld [vmem:[#allocation11 + $0xe4] sm:$0xf0] }
  0xc2   : > { %1292 = vmatpush.bf16.msrb.mxu3 %v4679_v15  ;;  %660 = vmatmul.bf16.gmra.mxu0 %v3614_v17  ;;  %v4790_v34 = vpack.c.bf16 %v4785_v33, %v4785_v33  ;;  %v3695_v43 = vld [vmem:[#allocation11 + $0xdc] sm:$0xf]  ;;  %v3491_v45 = vld [vmem:[#allocation11 + $0xf8] sm:$0xf]  ;;  %v3700_v53 = vld [vmem:[#allocation11 + $0x100] sm:$0xf0] }
  0xc3   : > { %689 = vmatmul.bf16.gmra.mxu1 %v3614_v17  ;;  %1453 = vmatpush.bf16.msra.mxu0 %v4698_v35  ;;  %5654 = vst [vmem:[#allocation39_spill] sm:$0xff] %v4778_v32  ;;  %v4797_v52 = vor.u32 %v3695_v43, %v3473_v44  ;;  %v3692_v55 = vld [vmem:[#allocation11 + $0xc4] sm:$0xf] }
  0xc4   : > { %718 = vmatmul.bf16.gmra.mxu2 %v3614_v17  ;;  %1466 = vmatpush.bf16.msra.mxu1 %v4715_v59  ;;  %v4733_v17 = vor.u32 %v3676_v10, %v3395_v8  ;;  %v3497_v8 = vld [vmem:[#allocation11 + $0x114] sm:$0xf0]  ;;  %v3515_v10 = vld [vmem:[#allocation11 + $0x128] sm:$0xf]  ;;  %v4860_v27 = vld [vmem:[#allocation13 + $0x3] sm:$0x7] }
  0xc5   : > { %1298 = vmatpush.bf16.msra.mxu2 %v4681_v16  ;;  %973 = vmatmul.bf16.gmra.mxu3 %v4687_v22  ;;  %v4768_v12 = vor.u32 %v3701_v5, %v3497_v8  ;;  %v4771_v25 = vor.u32 %v3706_v14, %v3515_v10  ;;  %v3461_v5 = vld [vmem:[#allocation11 + $0xcc] sm:$0xf0]  ;;  %v4800_v8 = vor.u32 %v3700_v53, %v3491_v45  ;;  %v3479_v10 = vld [vmem:[#allocation11 + $0xe0] sm:$0xf]  ;;  %v3697_v14 = vld [vmem:[#allocation11 + $0xe8] sm:$0xf0] }
  0xc6   : > { %1440 = vmatpush.bf16.msra.mxu3 %v4684_v18  ;;  %v4866_v43 = vperm.slane %v4860_v27, 0 }
  0xc7   : > { %1454 = vmatpush.bf16.msra.mxu0 %v4707_v47  ;;  %5655 = vst [vmem:[#allocation40_spill] sm:$0xff] %v4800_v8 }
  0xc8   : > { %1467 = vmatpush.bf16.msra.mxu1 %v4744_v42  ;;  %5658 = vst [vmem:[#allocation43_spill] sm:$0xff] %v4866_v43 }
  0xc9   : > { %1299 = vmatpush.bf16.msra.mxu2 %v4695_v29 }
  0xca   : > { %1441 = vmatpush.bf16.msra.mxu3 %v4693_v23 }
  0xcb   : > { %1455 = vmatpush.bf16.msra.mxu0 %v4736_v28 }
  0xcc   : > { %1468 = vmatpush.bf16.msra.mxu1 %v4750_v57 }
  0xcd   : > { %1300 = vmatpush.bf16.msra.mxu2 %v4704_v39 }
  0xce   : > { %1442 = vmatpush.bf16.msra.mxu3 %v4702_v38 }
  0xcf   : > { %1456 = vmatpush.bf16.msra.mxu0 %v4747_v48 }
  0xd0   : > { %1469 = vmatpush.bf16.msra.mxu1 %v4771_v25 }
  0xd1   : > { %1301 = vmatpush.bf16.msra.mxu2 %v4710_v51 }
  0xd2   : > { %1443 = vmatpush.bf16.msra.mxu3 %v4713_v54  ;;  %665 = vmatmul.bf16.gmra.mxu0 %v3615_v1 }
  0xd3   : > { %694 = vmatmul.bf16.gmra.mxu1 %v3615_v1  ;;  %1457 = vmatpush.bf16.msra.mxu0 %v4768_v12 }
  0xd4   : > { %723 = vmatmul.bf16.gmra.mxu2 %v3615_v1  ;;  %v4759_v1 = vld [vmem:[#allocation4] sm:$0xff]  ;;  %1470 = vmatpush.bf16.msra.mxu1 %v4778_v32 }
  0xd5   : > { %1302 = vmatpush.bf16.msra.mxu2 %v4720_v0  ;;  %978 = vmatmul.bf16.gmra.mxu3 %v4727_v6  ;;  %v1143_v3 = vpack.c.bf16 %v4759_v1, %v4759_v1 }
  0xd6   : > { %1444 = vmatpush.bf16.msra.mxu3 %v4724_v2 }
  0xd8   : > { %1471 = vmatpush.bf16.msra.mxu1 %v4800_v8 }
  0xd9   : > { %1303 = vmatpush.bf16.msra.mxu2 %v4733_v17 }
  0xda   : > { %1445 = vmatpush.bf16.msra.mxu3 %v4731_v7 }
  0xdd   : > { %1304 = vmatpush.bf16.msra.mxu2 %v4742_v40 }
  0xde   : > { %1446 = vmatpush.bf16.msra.mxu3 %v4740_v36 }
  0xe1   : > { %1305 = vmatpush.bf16.msra.mxu2 %v4753_v60 }
  0xe2   : > { %1447 = vmatpush.bf16.msra.mxu3 %v4756_v62  ;;  %992 = vmatmul.bf16.vlgmr.msrb.gmra.mxu0 %v4627_v46 }
  0xe3   : > { %1021 = vmatmul.bf16.vlgmr.msrb.gmra.mxu1 %v4627_v46  ;;  %v4775_v46 = vor.u32 %v3698_v19, %v3485_v20  ;;  %v3467_v19 = vld [vmem:[#allocation11 + $0xc8] sm:$0xf]  ;;  %v3694_v20 = vld [vmem:[#allocation11 + $0xd0] sm:$0xf0] }
  0xe4   : > { %1280 = vmatmul.bf16.vlgmr.msrb.gmra.mxu2 %v1143_v3  ;;  %v4816_v26 = vor.u32 %v3694_v20, %v3467_v19 }
  0xe5   : > { %1293 = vmatmul.bf16.vlgmr.msrb.gmra.mxu3 %v1143_v3  ;;  %1585 = vmatpush.bf16.msrb.mxu2 %v4631_v56 }
  0xe6   : > { %1598 = vmatpush.bf16.msrb.mxu3 %v4629_v49  ;;  %1458 = vmatpush.bf16.msra.mxu0 %v4775_v46  ;;  %5657 = vst [vmem:[#allocation42_spill] sm:$0xff] %v4816_v26 }
  0xe9   : > { %1586 = vmatpush.bf16.msrb.mxu2 %v4638_v4 }
  0xea   : > { %1599 = vmatpush.bf16.msrb.mxu3 %v4636_v63  ;;  %1459 = vmatpush.bf16.msra.mxu0 %v4797_v52 }
  0xed   : > { %1587 = vmatpush.bf16.msrb.mxu2 %v4641_v9 }
  0xee   : > { %1600 = vmatpush.bf16.msrb.mxu3 %v4644_v11 }
  0xf1   : > { %1588 = vmatpush.bf16.msrb.mxu2 %v4647_v21 }
  0xf2   : > { %1601 = vmatpush.bf16.msrb.mxu3 %v4651_v24  ;;  %997 = vmatmul.bf16.gmra.mxu0 %v4654_v30 }
  0xf3   : > { %1026 = vmatmul.bf16.gmra.mxu1 %v4654_v30  ;;  %v4804_v30 = vor.u32 %v3692_v55, %v3461_v5 }
  0xf4   : > { %1306 = vmatmul.bf16.vlgmr.msra.gmra.mxu2 %v1143_v3  ;;  %v4807_v3 = vor.u32 %v3697_v14, %v3479_v10 }
  0xf5   : > { %1448 = vmatmul.bf16.vlgmr.msra.gmra.mxu3 %v4790_v34  ;;  %1589 = vmatpush.bf16.msrb.mxu2 %v4660_v37 }
  0xf6   : > { %1602 = vmatpush.bf16.msrb.mxu3 %v4658_v31  ;;  %5656 = vst [vmem:[#allocation41_spill] sm:$0xff] %v4807_v3  ;;  %1460 = vmatpush.bf16.msra.mxu0 %v4804_v30 }
  0xf7   : > { %1472 = vmatpush.bf16.msra.mxu1 %v4807_v3 }
  0xf9   : > { %1590 = vmatpush.bf16.msrb.mxu2 %v4667_v50 }
  0xfa   : > { %1603 = vmatpush.bf16.msrb.mxu3 %v4665_v41  ;;  %1611 = vmatpush.bf16.msrb.mxu0 %v4681_v16 }
  0xfb   : > { %1473 = vmatpush.bf16.msra.mxu1 %v4816_v26 }
  0xfd   : > { %1591 = vmatpush.bf16.msrb.mxu2 %v4670_v58 }
  0xfe   : > { %1604 = vmatpush.bf16.msrb.mxu3 %v4673_v61  ;;  %1612 = vmatpush.bf16.msrb.mxu0 %v4695_v29 }
  0xff   : > { %1624 = vmatpush.bf16.msrb.mxu1 %v4684_v18 }
 0x101   : > { %1592 = vmatpush.bf16.msrb.mxu2 %v4676_v13 }
 0x102   : > { %1605 = vmatpush.bf16.msrb.mxu3 %v4679_v15  ;;  %1002 = vmatmul.bf16.gmra.mxu0 %v4687_v22 }
 0x103   : > { %1031 = vmatmul.bf16.gmra.mxu1 %v4687_v22  ;;  %1613 = vmatpush.bf16.msrb.mxu0 %v4704_v39 }
 0x104   : > { %1625 = vmatpush.bf16.msrb.mxu1 %v4693_v23 }
 0x105   : > { %1637 = vmatpush.bf16.msra.mxu2 %v4698_v35 }
 0x106   : > { %1650 = vmatpush.bf16.msra.mxu3 %v4715_v59 }
 0x107   : > { %1614 = vmatpush.bf16.msrb.mxu0 %v4710_v51 }
 0x108   : > { %1626 = vmatpush.bf16.msrb.mxu1 %v4702_v38 }
 0x109   : > { %1638 = vmatpush.bf16.msra.mxu2 %v4707_v47 }
 0x10a   : > { %1651 = vmatpush.bf16.msra.mxu3 %v4744_v42 }
 0x10b   : > { %1615 = vmatpush.bf16.msrb.mxu0 %v4720_v0 }
 0x10c   : > { %1627 = vmatpush.bf16.msrb.mxu1 %v4713_v54 }
 0x10d   : > { %1639 = vmatpush.bf16.msra.mxu2 %v4736_v28 }
 0x10e   : > { %1652 = vmatpush.bf16.msra.mxu3 %v4750_v57 }
 0x10f   : > { %1616 = vmatpush.bf16.msrb.mxu0 %v4733_v17 }
 0x110   : > { %1628 = vmatpush.bf16.msrb.mxu1 %v4724_v2 }
 0x111   : > { %1640 = vmatpush.bf16.msra.mxu2 %v4747_v48 }
 0x112   : > { %1653 = vmatpush.bf16.msra.mxu3 %v4771_v25  ;;  %1007 = vmatmul.bf16.gmra.mxu0 %v4727_v6 }
 0x113   : > { %1036 = vmatmul.bf16.gmra.mxu1 %v4727_v6  ;;  %1617 = vmatpush.bf16.msrb.mxu0 %v4742_v40 }
 0x114   : > { %1629 = vmatpush.bf16.msrb.mxu1 %v4731_v7 }
 0x115   : > { %1641 = vmatpush.bf16.msra.mxu2 %v4768_v12 }
 0x116   : > { %1654 = vmatpush.bf16.msra.mxu3 %v4778_v32 }
 0x117   : > { %1618 = vmatpush.bf16.msrb.mxu0 %v4753_v60 }
 0x118   : > { %1630 = vmatpush.bf16.msrb.mxu1 %v4740_v36 }
 0x119   : > { %1642 = vmatpush.bf16.msra.mxu2 %v4775_v46 }
 0x11a   : > { %1655 = vmatpush.bf16.msra.mxu3 %v4800_v8 }
 0x11c   : > { %1631 = vmatpush.bf16.msrb.mxu1 %v4756_v62 }
 0x11d   : > { %1643 = vmatpush.bf16.msra.mxu2 %v4797_v52 }
 0x11e   : > { %1656 = vmatpush.bf16.msra.mxu3 %v4807_v3 }
 0x11f   : > { %v4854_v22 = vpop.f32.mrf.mxu0 }
 0x120   : > { %v4856_v6 = vpop.f32.mrf.mxu1 }
 0x121   : > { %1644 = vmatpush.bf16.msra.mxu2 %v4804_v30 }
 0x122   : > { %1657 = vmatpush.bf16.msra.mxu3 %v4816_v26  ;;  %1461 = vmatmul.bf16.vlgmr.msra.gmra.mxu0 %v4790_v34 }
 0x123   : > { %1474 = vmatmul.bf16.vlgmr.msra.gmra.mxu1 %v4790_v34  ;;  %1771 = vmatpush.bf16.msra.mxu0 %v4631_v56  ;;  %v482_v34 = vld [vmem:[#allocation13] sm:$0x7] }
 0x124   : > { %1784 = vmatpush.bf16.msra.mxu1 %v4629_v49  ;;  %v4882_v10 = vperm.slane %v482_v34, 0  ;;  %v4886_v19 = vperm.slane %v482_v34, 1 }
 0x126   : > { %5662 = vst [vmem:[#allocation47_spill] sm:$0xff] %v4882_v10 }
 0x127   : > { %v4869_v44 = vpop.f32.mrf.mxu2  ;;  %v4871_v53 = vpop.f32.mrf.mxu0  ;;  %1772 = vmatpush.bf16.msra.mxu0 %v4638_v4  ;;  %5664 = vst [vmem:[#allocation49_spill] sm:$0xff] %v4886_v19 }
 0x128   : > { %v964_v45 = vpop.f32.mrf.mxu3  ;;  %5659 = vst [vmem:[#allocation44_spill] sm:$0xff] %v4871_v53  ;;  %v4877_v5 = vpop.f32.mrf.mxu1  ;;  %1785 = vmatpush.bf16.msra.mxu1 %v4636_v63 }
 0x129   : > { %v4875_v55 = vadd.f32 %v964_v45, %v4866_v43  ;;  %5661 = vst [vmem:[#allocation46_spill] sm:$0xff] %v4877_v5 }
 0x12b   : > { %5660 = vst [vmem:[#allocation45_spill] sm:$0xff] %v4875_v55  ;;  %1773 = vmatpush.bf16.msra.mxu0 %v4641_v9 }
 0x12c   : > { %1786 = vmatpush.bf16.msra.mxu1 %v4644_v11 }
 0x12f   : > { %v4884_v14 = vpop.f32.mrf.mxu2  ;;  %v656_v53 = vpop.f32.mrf.mxu0  ;;  %1774 = vmatpush.bf16.msra.mxu0 %v4647_v21 }
 0x130   : > { %5663 = vst [vmem:[#allocation48_spill] sm:$0xff] %v4884_v14  ;;  %v4888_v20 = vpop.f32.mrf.mxu3  ;;  %v4892_v45 = vadd.f32 %v656_v53, %v4882_v10  ;;  %v685_v55 = vpop.f32.mrf.mxu1  ;;  %1787 = vmatpush.bf16.msra.mxu1 %v4651_v24  ;;  %v4900_v14 = vperm.slane %v482_v34, 2 }
 0x131   : > { %5665 = vst [vmem:[#allocation50_spill] sm:$0xff] %v4888_v20  ;;  %v4896_v5 = vadd.f32 %v685_v55, %v4886_v19 }
 0x132   : > { %5666 = vst [vmem:[#allocation51_spill] sm:$0xff] %v4892_v45 }
 0x133   : > { %5667 = vst [vmem:[#allocation52_spill] sm:$0xff] %v4896_v5  ;;  %1775 = vmatpush.bf16.msra.mxu0 %v4660_v37 }
 0x134   : > { %1788 = vmatpush.bf16.msra.mxu1 %v4658_v31  ;;  %5668 = vst [vmem:[#allocation53_spill] sm:$0xff] %v4900_v14 }
 0x137   : > { %v714_v26 = vpop.f32.mrf.mxu2  ;;  %v4905_v8 = vpop.f32.mrf.mxu0  ;;  %1776 = vmatpush.bf16.msra.mxu0 %v4667_v50 }
 0x138   : > { %v4903_v20 = vadd.f32 %v714_v26, %v4900_v14  ;;  %v969_v3 = vpop.f32.mrf.mxu3  ;;  %5670 = vst [vmem:[#allocation55_spill] sm:$0xff] %v4905_v8  ;;  %v4911_v55 = vpop.f32.mrf.mxu1  ;;  %1789 = vmatpush.bf16.msra.mxu1 %v4665_v41 }
 0x139   : > { %v4909_v53 = vadd.f32 %v969_v3, %v4866_v43  ;;  %5672 = vst [vmem:[#allocation57_spill] sm:$0xff] %v4911_v55 }
 0x13a   : > { %5669 = vst [vmem:[#allocation54_spill] sm:$0xff] %v4903_v20 }
 0x13b   : > { %5671 = vst [vmem:[#allocation56_spill] sm:$0xff] %v4909_v53  ;;  %1777 = vmatpush.bf16.msra.mxu0 %v4670_v58 }
 0x13c   : > { %1790 = vmatpush.bf16.msra.mxu1 %v4673_v61 }
 0x13f   : > { %v4916_v34 = vpop.f32.mrf.mxu2  ;;  %v661_v20 = vpop.f32.mrf.mxu0  ;;  %1778 = vmatpush.bf16.msra.mxu0 %v4676_v13 }
 0x140   : > { %5673 = vst [vmem:[#allocation58_spill] sm:$0xff] %v4916_v34  ;;  %v4918_v26 = vpop.f32.mrf.mxu3  ;;  %v4922_v8 = vadd.f32 %v661_v20, %v4882_v10  ;;  %v690_v3 = vpop.f32.mrf.mxu1  ;;  %1791 = vmatpush.bf16.msra.mxu1 %v4679_v15 }
 0x141   : > { %5674 = vst [vmem:[#allocation59_spill] sm:$0xff] %v4918_v26  ;;  %v4926_v53 = vadd.f32 %v690_v3, %v4886_v19 }
 0x142   : > { %5675 = vst [vmem:[#allocation60_spill] sm:$0xff] %v4922_v8 }
 0x143   : > { %5676 = vst [vmem:[#allocation61_spill] sm:$0xff] %v4926_v53 }
 0x147   : > { %v719_v55 = vpop.f32.mrf.mxu2  ;;  %v4931_v34 = vpop.f32.mrf.mxu0 }
 0x148   : > { %v4929_v5 = vadd.f32 %v719_v55, %v4900_v14  ;;  %v974_v45 = vpop.f32.mrf.mxu3  ;;  %5678 = vst [vmem:[#allocation63_spill] sm:$0xff] %v4931_v34  ;;  %v4936_v13 = vpop.f32.mrf.mxu1 }
 0x149   : > { %v4934_v26 = vadd.f32 %v974_v45, %v4866_v43  ;;  %5680 = vst [vmem:[#allocation65_spill] sm:$0xff] %v4936_v13 }
 0x14a   : > { %5677 = vst [vmem:[#allocation62_spill] sm:$0xff] %v4929_v5 }
 0x14b   : > { %5679 = vst [vmem:[#allocation64_spill] sm:$0xff] %v4934_v26 }
 0x14f   : > { %v4938_v20 = vpop.f32.mrf.mxu2  ;;  %v666_v15 = vpop.f32.mrf.mxu0 }
 0x150   : > { %5681 = vst [vmem:[#allocation66_spill] sm:$0xff] %v4938_v20  ;;  %v4940_v8 = vpop.f32.mrf.mxu3  ;;  %v4943_v3 = vadd.f32 %v666_v15, %v4882_v10  ;;  %v695_v53 = vpop.f32.mrf.mxu1  ;;  %v4962_v15 = vperm.slane %v4860_v27, 2 }
 0x151   : > { %5682 = vst [vmem:[#allocation67_spill] sm:$0xff] %v4940_v8  ;;  %v4946_v55 = vadd.f32 %v695_v53, %v4886_v19  ;;  %v4959_v8 = vperm.slane %v4860_v27, 1 }
 0x152   : > { %5683 = vst [vmem:[#allocation68_spill] sm:$0xff] %v4943_v3 }
 0x153   : > { %5684 = vst [vmem:[#allocation69_spill] sm:$0xff] %v4946_v55 }
 0x154   : > { %5689 = vst [vmem:[#allocation74_spill] sm:$0xff] %v4959_v8 }
 0x155   : > { %5690 = vst [vmem:[#allocation75_spill] sm:$0xff] %v4962_v15 }
 0x157   : > { %v724_v5 = vpop.f32.mrf.mxu2  ;;  %v4951_v26 = vpop.f32.mrf.mxu0 }
 0x158   : > { %v4949_v34 = vadd.f32 %v724_v5, %v4900_v14  ;;  %v979_v45 = vpop.f32.mrf.mxu3  ;;  %5686 = vst [vmem:[#allocation71_spill] sm:$0xff] %v4951_v26  ;;  %v4956_v20 = vpop.f32.mrf.mxu1 }
 0x159   : > { %v4954_v13 = vadd.f32 %v979_v45, %v4866_v43  ;;  %5688 = vst [vmem:[#allocation73_spill] sm:$0xff] %v4956_v20  ;;  %v652_v45 = vadd.f32 %v4854_v22, %v4882_v10  ;;  %v681_v20 = vadd.f32 %v4856_v6, %v4886_v19 }
 0x15a   : > { %5685 = vst [vmem:[#allocation70_spill] sm:$0xff] %v4949_v34 }
 0x15b   : > { %5687 = vst [vmem:[#allocation72_spill] sm:$0xff] %v4954_v13 }
 0x15f   : > { %v4964_v53 = vpop.f32.mrf.mxu2  ;;  %v993_v3 = vpop.f32.mrf.mxu0 }
 0x160   : > { %5691 = vst [vmem:[#allocation76_spill] sm:$0xff] %v4964_v53  ;;  %v981_v55 = vpop.f32.mrf.mxu3  ;;  %v4967_v5 = vadd.f32 %v993_v3, %v4959_v8  ;;  %v1022_v34 = vpop.f32.mrf.mxu1 }
 0x161   : > { %v4970_v26 = vadd.f32 %v1022_v34, %v4962_v15 }
 0x162   : > { %5692 = vst [vmem:[#allocation77_spill] sm:$0xff] %v4967_v5 }
 0x163   : > { %5693 = vst [vmem:[#allocation78_spill] sm:$0xff] %v4970_v26 }
 0x167   : > { %v1281_v13 = vpop.f32.mrf.mxu2  ;;  %v4976_v58 = vpop.f32.mrf.mxu0 }
 0x168   : > { %v1486_v27 = vadd.f32 %v1281_v13, %v652_v45  ;;  %v1294_v61 = vpop.f32.mrf.mxu3  ;;  %5694 = vst [vmem:[#allocation79_spill] sm:$0xff] %v4976_v58  ;;  %v4978_v41 = vpop.f32.mrf.mxu1 }
 0x169   : > { %v1487_v53 = vadd.f32 %v1294_v61, %v681_v20  ;;  %5695 = vst [vmem:[#allocation80_spill] sm:$0xff] %v4978_v41  ;;  %v982_v20 = vadd.f32 %v981_v55, %v4866_v43 }
 0x16a   : > { %v3553_v3 = vmul.f32 -1.442695, %v1486_v27 }
 0x16b   : > { %v3554_v5 = vmul.f32 -1.442695, %v1487_v53 }
 0x16c   : > { %3849 = vpow2.f32 %v3553_v3 }
 0x16d   : > { %3851 = vpow2.f32 %v3554_v5 }
 0x16f   : > { %v1283_v34 = vpop.f32.mrf.mxu2  ;;  %v998_v50 = vpop.f32.mrf.mxu0 }
 0x170   : > { %v1296_v26 = vpop.f32.mrf.mxu3  ;;  %v4981_v22 = vadd.f32 %v998_v50, %v4959_v8  ;;  %v1027_v10 = vpop.f32.mrf.mxu1 }
 0x171   : > { %v4984_v13 = vadd.f32 %v1027_v10, %v4962_v15  ;;  %v4994_v10 = vld [vmem:[%s5555_s5] ss:$0 sm:$0xff] }
 0x172   : > { %5696 = vst [vmem:[#allocation81_spill] sm:$0xff] %v4981_v22  ;;  %v3850_v6 = vpop.eup %3849 }
 0x173   : > { %5697 = vst [vmem:[#allocation82_spill] sm:$0xff] %v4984_v13  ;;  %v3852_v45 = vpop.eup %3851  ;;  %v1494_v58 = vadd.f32 1.0, %v3850_v6 }
 0x174   : > { %v1495_v61 = vadd.f32 1.0, %v3852_v45 }
 0x175   : > { %3853 = vrcp.f32 %v1494_v58  ;;  %v1507_v55 = vand.u32 2147483648, %v1494_v58  ;;  %vm1501_vm1 = vweird.f32 %v1494_v58 }
 0x176   : > { %3855 = vrcp.f32 %v1495_v61  ;;  %vm1516_vm5 = vweird.f32 %v1495_v61 }
 0x177   : > { %v1307_v53 = vpop.f32.mrf.mxu2  ;;  %v4987_v27 = vpop.f32.mrf.mxu0 }
 0x178   : > { %v1449_v5 = vpop.f32.mrf.mxu3  ;;  %5698 = vst [vmem:[#allocation83_spill] sm:$0xff] %v4987_v27  ;;  %v4989_v26 = vpop.f32.mrf.mxu1  ;;  %v1505_v27 = vand.u32 2147483647, %v1494_v58 }
 0x179   : > { %5699 = vst [vmem:[#allocation84_spill] sm:$0xff] %v4989_v26  ;;  %v1526_v50 = vadd.f32 %v1449_v5, %v982_v20 }
 0x17a   : > { %vm1506_vm3 = vcmp.eq.f32.partialorder %v1505_v27, 8.507059e+37 }
 0x17b   : > { %v3854_v3 = vpop.eup %3853  ;;  %v3555_v22 = vmul.f32 -1.442695, %v1526_v50 }
 0x17c   : > { %v3856_v34 = vpop.eup %3855  ;;  %v1497_v41 = vmul.f32 %v3854_v3, %v1494_v58  ;;  %vm1502_vm0 = vweird.f32 %v3854_v3 }
 0x17d   : > { %v1512_v45 = vmul.f32 %v3856_v34, %v1495_v61  ;;  %3857 = vpow2.f32 %v3555_v22  ;;  %vm1503_vm2 = vmor %vm1501_vm1, %vm1502_vm0  ;;  %vm1517_vm4 = vweird.f32 %v3856_v34 }
 0x17e   : > { %v1498_v6 = vsub.f32 1.0, %v1497_v41  ;;  %v1566_v41 = vadd.f32 %v4994_v10, %v1307_v53  ;;  %vm1518_vm6 = vmor %vm1516_vm5, %vm1517_vm4 }
 0x17f   : > { %v1309_v13 = vpop.f32.mrf.mxu2  ;;  %v1003_v43 = vpop.f32.mrf.mxu0  ;;  %v1513_v37 = vsub.f32 1.0, %v1512_v45  ;;  %v1522_v45 = vand.u32 2147483648, %v1495_v61 }
 0x180   : > { %v1499_v19 = vmul.f32 %v3854_v3, %v1498_v6  ;;  %v1451_v31 = vpop.f32.mrf.mxu3  ;;  %v4997_v20 = vadd.f32 %v1003_v43, %v4959_v8  ;;  %v1032_v5 = vpop.f32.mrf.mxu1  ;;  %v1508_v13 = vor.u32 1.1754944e-38, %v1507_v55 }
 0x181   : > { %v5000_v50 = vadd.f32 %v1032_v5, %v4962_v15  ;;  %v710_v31 = vadd.f32 %v4869_v44, %v4900_v14  ;;  %v1523_v44 = vor.u32 1.1754944e-38, %v1522_v45 }
 0x182   : > { %5700 = vst [vmem:[#allocation85_spill] sm:$0xff] %v4997_v20  ;;  %v1500_v26 = vadd.f32 %v3854_v3, %v1499_v19  ;;  %v1514_v20 = vmul.f32 %v3856_v34, %v1513_v37 }
 0x183   : > { %5701 = vst [vmem:[#allocation86_spill] sm:$0xff] %v5000_v50  ;;  %v3858_v24 = vpop.eup %3857  ;;  %v5719_v50 = vld [vmem:[#allocation49_spill] sm:$0xff] }
 0x184   : > { %v1504_v32 = vsel %vm1503_vm2, %v3854_v3, %v1500_v26  ;;  %v1534_v19 = vadd.f32 1.0, %v3858_v24  ;;  %v1515_v53 = vadd.f32 %v3856_v34, %v1514_v20  ;;  %v1520_v26 = vand.u32 2147483647, %v1495_v61 }
 0x185   : > { %v1509_v6 = vsel %vm1506_vm3, %v1508_v13, %v1504_v32 }
 0x186   : > { %v1567_v43 = vmul.f32 %v1566_v41, %v1509_v6  ;;  %v1519_v32 = vsel %vm1518_vm6, %v3856_v34, %v1515_v53  ;;  %vm1521_vm7 = vcmp.eq.f32.partialorder %v1520_v26, 8.507059e+37  ;;  %vm1541_vm9 = vweird.f32 %v1534_v19 }
 0x187   : > { %v5005_v22 = vpop.f32.mrf.mxu0  ;;  %v1524_v20 = vsel %vm1521_vm7, %v1523_v44, %v1519_v32 }
 0x188   : > { %v1568_v58 = vadd.f32 %v1567_v43, %v710_v31  ;;  %5702 = vst [vmem:[#allocation87_spill] sm:$0xff] %v5005_v22  ;;  %v5007_v5 = vpop.f32.mrf.mxu1 }
 0x189   : > { %5703 = vst [vmem:[#allocation88_spill] sm:$0xff] %v5007_v5  ;;  %v5720_v5 = vld [vmem:[#allocation46_spill] sm:$0xff] }
 0x18a   : > { %3859 = vtanh.f32 %v1568_v58 }
 0x18b   : > { %3861 = vrcp.f32 %v1534_v19 }
 0x18f   : > { %v1008_v37 = vpop.f32.mrf.mxu0 }
 0x190   : > { %v3860_v27 = vpop.eup %3859  ;;  %v5011_v55 = vadd.f32 %v1008_v37, %v4959_v8  ;;  %v1037_v41 = vpop.f32.mrf.mxu1  ;;  %v5034_v37 = vld [vmem:[%s5555_s5 + $0x1] ss:$0 sm:$0xff] }
 0x191   : > { %v1574_v3 = vsub.f32 %v4759_v1, %v3860_v27  ;;  %v5014_v24 = vadd.f32 %v1037_v41, %v4962_v15  ;;  %v3862_v61 = vpop.eup %3861  ;;  %v1547_v41 = vand.u32 2147483648, %v1534_v19 }
 0x192   : > { %v1537_v43 = vmul.f32 %v3862_v61, %v1534_v19  ;;  %vm1542_vm8 = vweird.f32 %v3862_v61 }
 0x193   : > { %v1575_v13 = vmul.f32 %v1574_v3, %v1524_v20  ;;  %v1545_v20 = vand.u32 2147483647, %v1534_v19  ;;  %vm1543_vm10 = vmor %vm1541_vm9, %vm1542_vm8 }
 0x194   : > { %v1538_v1 = vsub.f32 1.0, %v1537_v43  ;;  %v1548_v43 = vor.u32 1.1754944e-38, %v1547_v41 }
 0x195   : > { %v5016_v6 = vadd.f32 %v3860_v27, %v1575_v13  ;;  %vm1546_vm11 = vcmp.eq.f32.partialorder %v1545_v20, 8.507059e+37 }
 0x196   : > { %v1539_v26 = vmul.f32 %v3862_v61, %v1538_v1 }
 0x197   : > { %v1580_v34 = vpack.c.bf16 %v5016_v6, %v5016_v6  ;;  %v1010_v31 = vpop.f32.mrf.mxu0 }
 0x198   : > { %v1039_v58 = vpop.f32.mrf.mxu1  ;;  %v1011_v53 = vadd.f32 %v1010_v31, %v4959_v8  ;;  %v1540_v3 = vadd.f32 %v3862_v61, %v1539_v26 }
 0x199   : > { %1581 = vst [vmem:[%s4619_s20] sm:$0xf] %v1580_v34  ;;  %1593 = vmatmul.bf16.vlgmr.msrb.gmra.mxu2 %v1580_v34  ;;  %1606 = vmatmul.bf16.vlgmr.msrb.gmra.mxu3 %v1580_v34 }
 0x19a   : > { %1619 = vmatmul.bf16.vlgmr.msrb.gmra.mxu0 %v1580_v34  ;;  %1797 = vmatpush.bf16.msrb.mxu2 %v4681_v16  ;;  %v1544_v13 = vsel %vm1543_vm10, %v3862_v61, %v1540_v3 }
 0x19b   : > { %1810 = vmatpush.bf16.msrb.mxu3 %v4684_v18  ;;  %1823 = vmatpush.bf16.msrb.mxu0 %v4698_v35 }
 0x19e   : > { %1798 = vmatpush.bf16.msrb.mxu2 %v4695_v29 }
 0x19f   : > { %1811 = vmatpush.bf16.msrb.mxu3 %v4693_v23  ;;  %1824 = vmatpush.bf16.msrb.mxu0 %v4707_v47  ;;  %v1462_v45 = vpop.f32.mrf.mxu0 }
 0x1a0   : > { %v1527_v32 = vadd.f32 %v1462_v45, %v1011_v53  ;;  %v1475_v27 = vpop.f32.mrf.mxu1  ;;  %v1549_v45 = vsel %vm1546_vm11, %v1548_v43, %v1544_v13 }
 0x1a1   : > { %v1570_v34 = vadd.f32 %v5034_v37, %v1475_v27 }
 0x1a2   : > { %1799 = vmatpush.bf16.msrb.mxu2 %v4704_v39  ;;  %v3556_v44 = vmul.f32 -1.442695, %v1527_v32  ;;  %v1040_v32 = vadd.f32 %v1039_v58, %v4962_v15  ;;  %v683_v15 = vadd.f32 %v5720_v5, %v5719_v50 }
 0x1a3   : > { %1812 = vmatpush.bf16.msrb.mxu3 %v4702_v38  ;;  %1825 = vmatpush.bf16.msrb.mxu0 %v4736_v28  ;;  %v1571_v26 = vmul.f32 %v1570_v34, %v1549_v45 }
 0x1a4   : > { %3863 = vpow2.f32 %v3556_v44 }
 0x1a5   : > { %v1572_v61 = vadd.f32 %v1571_v26, %v1040_v32 }
 0x1a6   : > { %1800 = vmatpush.bf16.msrb.mxu2 %v4710_v51 }
 0x1a7   : > { %1813 = vmatpush.bf16.msrb.mxu3 %v4713_v54  ;;  %1826 = vmatpush.bf16.msrb.mxu0 %v4747_v48  ;;  %v1464_v31 = vpop.f32.mrf.mxu0 }
 0x1a8   : > { %v1477_v1 = vpop.f32.mrf.mxu1 }
 0x1aa   : > { %1801 = vmatpush.bf16.msrb.mxu2 %v4720_v0  ;;  %v3864_v53 = vpop.eup %3863 }
 0x1ab   : > { %1814 = vmatpush.bf16.msrb.mxu3 %v4724_v2  ;;  %1827 = vmatpush.bf16.msrb.mxu0 %v4768_v12  ;;  %v1535_v19 = vadd.f32 1.0, %v3864_v53 }
 0x1ad   : > { %3865 = vrcp.f32 %v1535_v19  ;;  %v1562_v3 = vand.u32 2147483648, %v1535_v19  ;;  %v1560_v20 = vand.u32 2147483647, %v1535_v19  ;;  %vm1556_vm13 = vweird.f32 %v1535_v19 }
 0x1ae   : > { %1802 = vmatpush.bf16.msrb.mxu2 %v4733_v17  ;;  %3867 = vtanh.f32 %v1572_v61  ;;  %v5706_v61 = vld [vmem:[#allocation32_spill] sm:$0xff] }
 0x1af   : > { %1815 = vmatpush.bf16.msrb.mxu3 %v4731_v7  ;;  %1828 = vmatpush.bf16.msrb.mxu0 %v4775_v46  ;;  %v1563_v31 = vor.u32 1.1754944e-38, %v1562_v3  ;;  %vm1561_vm15 = vcmp.eq.f32.partialorder %v1560_v20, 8.507059e+37  ;;  %v5710_v3 = vld [vmem:[#allocation33_spill] sm:$0xff]  ;;  %v5712_v20 = vld [vmem:[#allocation35_spill] sm:$0xff] }
 0x1b2   : > { %1803 = vmatpush.bf16.msrb.mxu2 %v4742_v40 }
 0x1b3   : > { %1816 = vmatpush.bf16.msrb.mxu3 %v4740_v36  ;;  %1829 = vmatpush.bf16.msrb.mxu0 %v4797_v52  ;;  %v3866_v27 = vpop.eup %3865 }
 0x1b4   : > { %v1552_v44 = vmul.f32 %v3866_v27, %v1535_v19  ;;  %vm1557_vm12 = vweird.f32 %v3866_v27  ;;  %v3868_v13 = vpop.eup %3867  ;;  %v5705_v19 = vld [vmem:[#allocation39_spill] sm:$0xff] }
 0x1b5   : > { %vm1558_vm14 = vmor %vm1556_vm13, %vm1557_vm12  ;;  %v1577_v43 = vsub.f32 %v4785_v33, %v3868_v13  ;;  %v5704_v33 = vld [vmem:[#allocation30_spill] sm:$0xff] }
 0x1b6   : > { %1804 = vmatpush.bf16.msrb.mxu2 %v4753_v60  ;;  %v1553_v58 = vsub.f32 1.0, %v1552_v44  ;;  %v5708_v44 = vld [vmem:[#allocation40_spill] sm:$0xff] }
 0x1b7   : > { %1817 = vmatpush.bf16.msrb.mxu3 %v4756_v62  ;;  %1830 = vmatpush.bf16.msrb.mxu0 %v4804_v30 }
 0x1b8   : > { %v1554_v41 = vmul.f32 %v3866_v27, %v1553_v58  ;;  %v5709_v58 = vld [vmem:[#allocation34_spill] sm:$0xff] }
 0x1ba   : > { %v1555_v34 = vadd.f32 %v3866_v27, %v1554_v41  ;;  %v5711_v41 = vld [vmem:[#allocation41_spill] sm:$0xff] }
 0x1bc   : > { %v1559_v1 = vsel %vm1558_vm14, %v3866_v27, %v1555_v34  ;;  %v5707_v27 = vld [vmem:[#allocation31_spill] sm:$0xff]  ;;  %v5714_v34 = vld [vmem:[#allocation42_spill] sm:$0xff] }
 0x1bd   : > { %v1564_v53 = vsel %vm1561_vm15, %v1563_v31, %v1559_v1  ;;  %v5715_v31 = vld [vmem:[#allocation37_spill] sm:$0xff] }
 0x1be   : > { %v1578_v45 = vmul.f32 %v1577_v43, %v1564_v53  ;;  %v5716_v43 = vld [vmem:[#allocation38_spill] sm:$0xff]  ;;  %v5717_v53 = vld [vmem:[#allocation47_spill] sm:$0xff] }
 0x1c0   : > { %v5054_v26 = vadd.f32 %v3868_v13, %v1578_v45  ;;  %v5713_v13 = vld [vmem:[#allocation36_spill] sm:$0xff] }
 0x1c1   : > { %v5718_v45 = vld [vmem:[#allocation44_spill] sm:$0xff] }
 0x1c2   : > { %v1582_v32 = vpack.c.bf16 %v5054_v26, %v5054_v26 }
 0x1c4   : > { %3557 = vst [vmem:[%s4621_s16 + $0x1c] sm:$0xf] %v1582_v32  ;;  %1632 = vmatmul.bf16.vlgmr.msrb.gmra.mxu1 %v1582_v32  ;;  %1645 = vmatmul.bf16.vlgmr.msra.gmra.mxu2 %v1582_v32 }
 0x1c5   : > { %1658 = vmatmul.bf16.vlgmr.msra.gmra.mxu3 %v1582_v32  ;;  %1836 = vmatpush.bf16.msrb.mxu1 %v4715_v59  ;;  %v654_v32 = vadd.f32 %v5718_v45, %v5717_v53 }
 0x1c6   : > { %1957 = vmatpush.bf16.msra.mxu2 %v4631_v56  ;;  %1970 = vmatpush.bf16.msra.mxu3 %v4629_v49 }
 0x1c9   : > { %1837 = vmatpush.bf16.msrb.mxu1 %v4744_v42 }
 0x1ca   : > { %1958 = vmatpush.bf16.msra.mxu2 %v4638_v4  ;;  %1971 = vmatpush.bf16.msra.mxu3 %v4636_v63 }
 0x1cd   : > { %1838 = vmatpush.bf16.msrb.mxu1 %v4750_v57 }
 0x1ce   : > { %1959 = vmatpush.bf16.msra.mxu2 %v4641_v9  ;;  %1972 = vmatpush.bf16.msra.mxu3 %v4644_v11 }
 0x1d1   : > { %1839 = vmatpush.bf16.msrb.mxu1 %v4771_v25 }
 0x1d2   : > { %1960 = vmatpush.bf16.msra.mxu2 %v4647_v21  ;;  %1973 = vmatpush.bf16.msra.mxu3 %v5704_v33 }
 0x1d5   : > { %1840 = vmatpush.bf16.msrb.mxu1 %v5705_v19 }
 0x1d6   : > { %1961 = vmatpush.bf16.msra.mxu2 %v5706_v61  ;;  %1974 = vmatpush.bf16.msra.mxu3 %v5707_v27 }
 0x1d9   : > { %1841 = vmatpush.bf16.msrb.mxu1 %v5708_v44 }
 0x1da   : > { %1962 = vmatpush.bf16.msra.mxu2 %v5709_v58  ;;  %1975 = vmatpush.bf16.msra.mxu3 %v5710_v3 }
 0x1dd   : > { %1842 = vmatpush.bf16.msrb.mxu1 %v5711_v41 }
 0x1de   : > { %1963 = vmatpush.bf16.msra.mxu2 %v5712_v20  ;;  %1976 = vmatpush.bf16.msra.mxu3 %v5713_v13 }
 0x1e1   : > { %1843 = vmatpush.bf16.msrb.mxu1 %v5714_v34 }
 0x1e2   : > { %1964 = vmatpush.bf16.msra.mxu2 %v5715_v31  ;;  %1977 = vmatpush.bf16.msra.mxu3 %v5716_v43 }
 0x217   : > { %v1620_v1 = vpop.f32.mrf.mxu0 }
 0x21c   : > { %v1594_v22 = vpop.f32.mrf.mxu2  ;;  %v1607_v8 = vpop.f32.mrf.mxu3 }
 0x21d   : > { %v1671_v41 = vadd.f32 %v1594_v22, %v654_v32  ;;  %v1672_v3 = vadd.f32 %v1607_v8, %v683_v15 }
 0x21f   : > { %v3558_v20 = vmul.f32 -1.442695, %v1671_v41  ;;  %v3559_v58 = vmul.f32 -1.442695, %v1672_v3  ;;  %v1622_v13 = vpop.f32.mrf.mxu0 }
 0x221   : > { %3869 = vpow2.f32 %v3558_v20  ;;  %v1751_v20 = vadd.f32 %v4994_v10, %v1620_v1 }
 0x222   : > { %3871 = vpow2.f32 %v3559_v58 }
 0x224   : > { %v1596_v34 = vpop.f32.mrf.mxu2  ;;  %v1609_v31 = vpop.f32.mrf.mxu3 }
 0x225   : > { %v5721_v34 = vld [vmem:[#allocation48_spill] sm:$0xff] }
 0x226   : > { %v712_v31 = vadd.f32 %v5721_v34, %v4900_v14 }
 0x227   : > { %v3870_v44 = vpop.eup %3869 }
 0x228   : > { %v3872_v43 = vpop.eup %3871  ;;  %v1679_v27 = vadd.f32 1.0, %v3870_v44 }
 0x229   : > { %v1680_v61 = vadd.f32 1.0, %v3872_v43 }
 0x22a   : > { %3873 = vrcp.f32 %v1679_v27  ;;  %v1692_v19 = vand.u32 2147483648, %v1679_v27  ;;  %v1690_v15 = vand.u32 2147483647, %v1679_v27  ;;  %vm1686_vm1 = vweird.f32 %v1679_v27 }
 0x22b   : > { %3875 = vrcp.f32 %v1680_v61  ;;  %v1707_v33 = vand.u32 2147483648, %v1680_v61  ;;  %vm1701_vm5 = vweird.f32 %v1680_v61 }
 0x22c   : > { %v1693_v58 = vor.u32 1.1754944e-38, %v1692_v19  ;;  %vm1691_vm3 = vcmp.eq.f32.partialorder %v1690_v15, 8.507059e+37  ;;  %v5722_v19 = vld [vmem:[#allocation72_spill] sm:$0xff] }
 0x22d   : > { %v1708_v15 = vor.u32 1.1754944e-38, %v1707_v33 }
 0x230   : > { %v3874_v45 = vpop.eup %3873 }
 0x231   : > { %v3876_v53 = vpop.eup %3875  ;;  %v1682_v5 = vmul.f32 %v3874_v45, %v1679_v27  ;;  %vm1687_vm0 = vweird.f32 %v3874_v45 }
 0x232   : > { %v1697_v22 = vmul.f32 %v3876_v53, %v1680_v61  ;;  %vm1688_vm2 = vmor %vm1686_vm1, %vm1687_vm0  ;;  %vm1702_vm4 = vweird.f32 %v3876_v53 }
 0x233   : > { %v1683_v50 = vsub.f32 1.0, %v1682_v5  ;;  %vm1703_vm6 = vmor %vm1701_vm5, %vm1702_vm4 }
 0x234   : > { %v1698_v41 = vsub.f32 1.0, %v1697_v22 }
 0x235   : > { %v1684_v8 = vmul.f32 %v3874_v45, %v1683_v50 }
 0x236   : > { %v1699_v32 = vmul.f32 %v3876_v53, %v1698_v41 }
 0x237   : > { %v1685_v3 = vadd.f32 %v3874_v45, %v1684_v8  ;;  %v1705_v8 = vand.u32 2147483647, %v1680_v61 }
 0x238   : > { %v1700_v50 = vadd.f32 %v3876_v53, %v1699_v32 }
 0x239   : > { %v1689_v44 = vsel %vm1688_vm2, %v3874_v45, %v1685_v3  ;;  %vm1706_vm7 = vcmp.eq.f32.partialorder %v1705_v8, 8.507059e+37 }
 0x23a   : > { %v1694_v13 = vsel %vm1691_vm3, %v1693_v58, %v1689_v44  ;;  %v1704_v1 = vsel %vm1703_vm6, %v3876_v53, %v1700_v50 }
 0x23b   : > { %v1752_v43 = vmul.f32 %v1751_v20, %v1694_v13  ;;  %v1709_v41 = vsel %vm1706_vm7, %v1708_v15, %v1704_v1 }
 0x23d   : > { %v1753_v5 = vadd.f32 %v1752_v43, %v712_v31 }
 0x23f   : > { %3877 = vtanh.f32 %v1753_v5 }
 0x241   : > { %v1633_v27 = vpop.f32.mrf.mxu1 }
 0x242   : > { %v1711_v22 = vadd.f32 %v1633_v27, %v5722_v19 }
 0x244   : > { %v3560_v3 = vmul.f32 -1.442695, %v1711_v22 }
 0x245   : > { %v3878_v45 = vpop.eup %3877 }
 0x246   : > { %v1759_v58 = vsub.f32 %v5016_v6, %v3878_v45  ;;  %3879 = vpow2.f32 %v3560_v3 }
 0x247   : > { %v1646_v20 = vpop.f32.mrf.mxu2 }
 0x248   : > { %v1760_v44 = vmul.f32 %v1759_v58, %v1709_v41  ;;  %v1712_v13 = vadd.f32 %v1646_v20, %v5011_v55  ;;  %v1659_v34 = vpop.f32.mrf.mxu3 }
 0x249   : > { %v1635_v31 = vpop.f32.mrf.mxu1 }
 0x24a   : > { %v5093_v61 = vadd.f32 %v3878_v45, %v1760_v44  ;;  %v3561_v43 = vmul.f32 -1.442695, %v1712_v13  ;;  %v1755_v13 = vadd.f32 %v5034_v37, %v1659_v34 }
 0x24c   : > { %v1765_v53 = vpack.c.bf16 %v5093_v61, %v5093_v61  ;;  %v3880_v33 = vpop.eup %3879  ;;  %3881 = vpow2.f32 %v3561_v43 }
 0x24d   : > { %v1719_v32 = vadd.f32 1.0, %v3880_v33 }
 0x24e   : > { %3562 = vst [vmem:[%s4619_s20 + $0x4] sm:$0xf] %v1765_v53  ;;  %1779 = vmatmul.bf16.vlgmr.msra.gmra.mxu0 %v1765_v53  ;;  %1792 = vmatmul.bf16.vlgmr.msra.gmra.mxu1 %v1765_v53 }
 0x24f   : > { %1805 = vmatmul.bf16.vlgmr.msrb.gmra.mxu2 %v1765_v53  ;;  %1983 = vmatpush.bf16.msra.mxu0 %v4681_v16  ;;  %3883 = vrcp.f32 %v1719_v32  ;;  %v1648_v6 = vpop.f32.mrf.mxu2  ;;  %v1732_v22 = vand.u32 2147483648, %v1719_v32  ;;  %v1730_v45 = vand.u32 2147483647, %v1719_v32  ;;  %vm1726_vm9 = vweird.f32 %v1719_v32 }
 0x250   : > { %1996 = vmatpush.bf16.msra.mxu1 %v4684_v18  ;;  %2009 = vmatpush.bf16.msrb.mxu2 %v4698_v35  ;;  %v1661_v55 = vpop.f32.mrf.mxu3 }
 0x251   : > { %v1733_v41 = vor.u32 1.1754944e-38, %v1732_v22  ;;  %vm1731_vm11 = vcmp.eq.f32.partialorder %v1730_v45, 8.507059e+37  ;;  %v5725_v45 = vld [vmem:[#allocation32_spill] sm:$0xff] }
 0x252   : > { %v3882_v5 = vpop.eup %3881 }
 0x253   : > { %1984 = vmatpush.bf16.msra.mxu0 %v4695_v29  ;;  %v1720_v50 = vadd.f32 1.0, %v3882_v5 }
 0x254   : > { %1997 = vmatpush.bf16.msra.mxu1 %v4693_v23  ;;  %2010 = vmatpush.bf16.msrb.mxu2 %v4707_v47 }
 0x255   : > { %v3884_v27 = vpop.eup %3883  ;;  %3885 = vrcp.f32 %v1720_v50  ;;  %vm1741_vm13 = vweird.f32 %v1720_v50  ;;  %v1745_v6 = vand.u32 2147483647, %v1720_v50 }
 0x256   : > { %v1722_v8 = vmul.f32 %v3884_v27, %v1719_v32  ;;  %vm1727_vm8 = vweird.f32 %v3884_v27  ;;  %v1747_v32 = vand.u32 2147483648, %v1720_v50 }
 0x257   : > { %1985 = vmatpush.bf16.msra.mxu0 %v4704_v39  ;;  %vm1728_vm10 = vmor %vm1726_vm9, %vm1727_vm8  ;;  %vm1746_vm15 = vcmp.eq.f32.partialorder %v1745_v6, 8.507059e+37 }
 0x258   : > { %1998 = vmatpush.bf16.msra.mxu1 %v4702_v38  ;;  %2011 = vmatpush.bf16.msrb.mxu2 %v4736_v28  ;;  %v1723_v19 = vsub.f32 1.0, %v1722_v8  ;;  %v1748_v5 = vor.u32 1.1754944e-38, %v1747_v32  ;;  %v5736_v32 = vld [vmem:[#allocation51_spill] sm:$0xff] }
 0x25a   : > { %v1724_v1 = vmul.f32 %v3884_v27, %v1723_v19 }
 0x25b   : > { %1986 = vmatpush.bf16.msra.mxu0 %v4710_v51  ;;  %v3886_v15 = vpop.eup %3885 }
 0x25c   : > { %1999 = vmatpush.bf16.msra.mxu1 %v4713_v54  ;;  %2012 = vmatpush.bf16.msrb.mxu2 %v4747_v48  ;;  %v1737_v3 = vmul.f32 %v3886_v15, %v1720_v50  ;;  %v1725_v58 = vadd.f32 %v3884_v27, %v1724_v1  ;;  %vm1742_vm12 = vweird.f32 %v3886_v15  ;;  %v5724_v1 = vld [vmem:[#allocation39_spill] sm:$0xff] }
 0x25d   : > { %vm1743_vm14 = vmor %vm1741_vm13, %vm1742_vm12 }
 0x25e   : > { %v1738_v20 = vsub.f32 1.0, %v1737_v3  ;;  %v1729_v44 = vsel %vm1728_vm10, %v3884_v27, %v1725_v58  ;;  %v5727_v3 = vld [vmem:[#allocation40_spill] sm:$0xff]  ;;  %v5728_v58 = vld [vmem:[#allocation34_spill] sm:$0xff] }
 0x25f   : > { %1987 = vmatpush.bf16.msra.mxu0 %v4720_v0  ;;  %v1734_v31 = vsel %vm1731_vm11, %v1733_v41, %v1729_v44  ;;  %v5729_v41 = vld [vmem:[#allocation33_spill] sm:$0xff]  ;;  %v5731_v44 = vld [vmem:[#allocation35_spill] sm:$0xff] }
 0x260   : > { %2000 = vmatpush.bf16.msra.mxu1 %v4724_v2  ;;  %2013 = vmatpush.bf16.msrb.mxu2 %v4768_v12  ;;  %v1756_v43 = vmul.f32 %v1755_v13, %v1734_v31  ;;  %v1739_v53 = vmul.f32 %v3886_v15, %v1738_v20  ;;  %v5730_v20 = vld [vmem:[#allocation41_spill] sm:$0xff]  ;;  %v5732_v13 = vld [vmem:[#allocation36_spill] sm:$0xff]  ;;  %v5733_v31 = vld [vmem:[#allocation42_spill] sm:$0xff] }
 0x262   : > { %v1757_v33 = vadd.f32 %v1756_v43, %v5014_v24  ;;  %v1740_v34 = vadd.f32 %v3886_v15, %v1739_v53  ;;  %v5734_v43 = vld [vmem:[#allocation37_spill] sm:$0xff]  ;;  %v5735_v53 = vld [vmem:[#allocation38_spill] sm:$0xff] }
 0x263   : > { %1988 = vmatpush.bf16.msra.mxu0 %v4733_v17 }
 0x264   : > { %2001 = vmatpush.bf16.msra.mxu1 %v4731_v7  ;;  %2014 = vmatpush.bf16.msrb.mxu2 %v4775_v46  ;;  %3887 = vtanh.f32 %v1757_v33  ;;  %v1744_v24 = vsel %vm1743_vm14, %v3886_v15, %v1740_v34  ;;  %v5726_v15 = vld [vmem:[#allocation31_spill] sm:$0xff] }
 0x265   : > { %v1749_v8 = vsel %vm1746_vm15, %v1748_v5, %v1744_v24  ;;  %v5737_v24 = vld [vmem:[#allocation52_spill] sm:$0xff] }
 0x267   : > { %1989 = vmatpush.bf16.msra.mxu0 %v4742_v40 }
 0x268   : > { %2002 = vmatpush.bf16.msra.mxu1 %v4740_v36  ;;  %2015 = vmatpush.bf16.msrb.mxu2 %v4797_v52 }
 0x26a   : > { %v3888_v55 = vpop.eup %3887 }
 0x26b   : > { %1990 = vmatpush.bf16.msra.mxu0 %v4753_v60  ;;  %v1762_v27 = vsub.f32 %v5054_v26, %v3888_v55  ;;  %v5723_v26 = vld [vmem:[#allocation30_spill] sm:$0xff] }
 0x26c   : > { %2003 = vmatpush.bf16.msra.mxu1 %v4756_v62  ;;  %2016 = vmatpush.bf16.msrb.mxu2 %v4804_v30 }
 0x26d   : > { %v1763_v50 = vmul.f32 %v1762_v27, %v1749_v8 }
 0x26f   : > { %v5125_v19 = vadd.f32 %v3888_v55, %v1763_v50 }
 0x271   : > { %v1768_v22 = vpack.c.bf16 %v5125_v19, %v5125_v19 }
 0x273   : > { %3563 = vst [vmem:[%s4621_s16 + $0x18] sm:$0xf] %v1768_v22  ;;  %1818 = vmatmul.bf16.vlgmr.msrb.gmra.mxu3 %v1768_v22  ;;  %1831 = vmatmul.bf16.vlgmr.msrb.gmra.mxu0 %v1768_v22 }
 0x274   : > { %1844 = vmatmul.bf16.vlgmr.msrb.gmra.mxu1 %v1768_v22  ;;  %2022 = vmatpush.bf16.msrb.mxu3 %v4715_v59 }
 0x275   : > { %2143 = vmatpush.bf16.msrb.mxu0 %v4631_v56  ;;  %2156 = vmatpush.bf16.msrb.mxu1 %v4629_v49 }
 0x278   : > { %2023 = vmatpush.bf16.msrb.mxu3 %v4744_v42 }
 0x279   : > { %2144 = vmatpush.bf16.msrb.mxu0 %v4638_v4  ;;  %2157 = vmatpush.bf16.msrb.mxu1 %v4636_v63 }
 0x27c   : > { %2024 = vmatpush.bf16.msrb.mxu3 %v4750_v57 }
 0x27d   : > { %2145 = vmatpush.bf16.msrb.mxu0 %v4641_v9  ;;  %2158 = vmatpush.bf16.msrb.mxu1 %v4644_v11 }
 0x280   : > { %2025 = vmatpush.bf16.msrb.mxu3 %v4771_v25 }
 0x281   : > { %2146 = vmatpush.bf16.msrb.mxu0 %v4647_v21  ;;  %2159 = vmatpush.bf16.msrb.mxu1 %v5723_v26 }
 0x284   : > { %2026 = vmatpush.bf16.msrb.mxu3 %v5724_v1 }
 0x285   : > { %2147 = vmatpush.bf16.msrb.mxu0 %v5725_v45  ;;  %2160 = vmatpush.bf16.msrb.mxu1 %v5726_v15  ;;  %v5740_v15 = vld [vmem:[#allocation87_spill] sm:$0xff] }
 0x288   : > { %2027 = vmatpush.bf16.msrb.mxu3 %v5727_v3 }
 0x289   : > { %2148 = vmatpush.bf16.msrb.mxu0 %v5728_v58  ;;  %2161 = vmatpush.bf16.msrb.mxu1 %v5729_v41  ;;  %v5738_v58 = vld [vmem:[#allocation54_spill] sm:$0xff] }
 0x28c   : > { %2028 = vmatpush.bf16.msrb.mxu3 %v5730_v20 }
 0x28d   : > { %2149 = vmatpush.bf16.msrb.mxu0 %v5731_v44  ;;  %2162 = vmatpush.bf16.msrb.mxu1 %v5732_v13 }
 0x290   : > { %2029 = vmatpush.bf16.msrb.mxu3 %v5733_v31 }
 0x291   : > { %2150 = vmatpush.bf16.msrb.mxu0 %v5734_v43  ;;  %2163 = vmatpush.bf16.msrb.mxu1 %v5735_v53 }
 0x2cb   : > { %v1780_v33 = vpop.f32.mrf.mxu0  ;;  %v1793_v34 = vpop.f32.mrf.mxu1 }
 0x2cc   : > { %v1857_v6 = vadd.f32 %v1780_v33, %v5736_v32  ;;  %v1858_v55 = vadd.f32 %v1793_v34, %v5737_v24 }
 0x2ce   : > { %v3564_v5 = vmul.f32 -1.442695, %v1857_v6  ;;  %v3565_v27 = vmul.f32 -1.442695, %v1858_v55 }
 0x2d0   : > { %3889 = vpow2.f32 %v3564_v5 }
 0x2d1   : > { %3891 = vpow2.f32 %v3565_v27 }
 0x2d2   : > { %v1806_v8 = vpop.f32.mrf.mxu2 }
 0x2d3   : > { %v1782_v50 = vpop.f32.mrf.mxu0  ;;  %v1795_v22 = vpop.f32.mrf.mxu1 }
 0x2d6   : > { %v3890_v14 = vpop.eup %3889 }
 0x2d7   : > { %v3892_v13 = vpop.eup %3891  ;;  %v1865_v31 = vadd.f32 1.0, %v3890_v14  ;;  %v1937_v14 = vadd.f32 %v4994_v10, %v1806_v8 }
 0x2d8   : > { %v1866_v44 = vadd.f32 1.0, %v3892_v13 }
 0x2d9   : > { %3893 = vrcp.f32 %v1865_v31  ;;  %v1878_v34 = vand.u32 2147483648, %v1865_v31  ;;  %v1876_v24 = vand.u32 2147483647, %v1865_v31  ;;  %vm1872_vm1 = vweird.f32 %v1865_v31 }
 0x2da   : > { %3895 = vrcp.f32 %v1866_v44  ;;  %v1808_v53 = vpop.f32.mrf.mxu2  ;;  %vm1887_vm5 = vweird.f32 %v1866_v44 }
 0x2db   : > { %v1879_v27 = vor.u32 1.1754944e-38, %v1878_v34  ;;  %vm1877_vm3 = vcmp.eq.f32.partialorder %v1876_v24, 8.507059e+37 }
 0x2df   : > { %v3894_v43 = vpop.eup %3893 }
 0x2e0   : > { %v3896_v20 = vpop.eup %3895  ;;  %v1868_v41 = vmul.f32 %v3894_v43, %v1865_v31  ;;  %vm1873_vm0 = vweird.f32 %v3894_v43 }
 0x2e1   : > { %v1883_v32 = vmul.f32 %v3896_v20, %v1866_v44  ;;  %vm1874_vm2 = vmor %vm1872_vm1, %vm1873_vm0  ;;  %vm1888_vm4 = vweird.f32 %v3896_v20 }
 0x2e2   : > { %v1869_v33 = vsub.f32 1.0, %v1868_v41  ;;  %vm1889_vm6 = vmor %vm1887_vm5, %vm1888_vm4 }
 0x2e3   : > { %v1884_v5 = vsub.f32 1.0, %v1883_v32  ;;  %v1891_v32 = vand.u32 2147483647, %v1866_v44 }
 0x2e4   : > { %v1870_v6 = vmul.f32 %v3894_v43, %v1869_v33  ;;  %v5739_v33 = vld [vmem:[#allocation74_spill] sm:$0xff] }
 0x2e5   : > { %v1885_v22 = vmul.f32 %v3896_v20, %v1884_v5  ;;  %v1006_v45 = vadd.f32 %v5740_v15, %v5739_v33  ;;  %vm1892_vm7 = vcmp.eq.f32.partialorder %v1891_v32, 8.507059e+37  ;;  %v5742_v5 = vld [vmem:[#allocation67_spill] sm:$0xff] }
 0x2e6   : > { %v1871_v55 = vadd.f32 %v3894_v43, %v1870_v6  ;;  %v1893_v6 = vand.u32 2147483648, %v1866_v44 }
 0x2e7   : > { %v1886_v41 = vadd.f32 %v3896_v20, %v1885_v22 }
 0x2e8   : > { %v1875_v50 = vsel %vm1874_vm2, %v3894_v43, %v1871_v55  ;;  %v1894_v8 = vor.u32 1.1754944e-38, %v1893_v6 }
 0x2e9   : > { %v1880_v13 = vsel %vm1877_vm3, %v1879_v27, %v1875_v50  ;;  %v1890_v24 = vsel %vm1889_vm6, %v3896_v20, %v1886_v41 }
 0x2ea   : > { %v1938_v53 = vmul.f32 %v1937_v14, %v1880_v13  ;;  %v1895_v50 = vsel %vm1892_vm7, %v1894_v8, %v1890_v24 }
 0x2ec   : > { %v1939_v3 = vadd.f32 %v1938_v53, %v5738_v58 }
 0x2ee   : > { %3897 = vtanh.f32 %v1939_v3  ;;  %v5741_v3 = vld [vmem:[#allocation43_spill] sm:$0xff] }
 0x2ef   : > { %v977_v27 = vadd.f32 %v5742_v5, %v5741_v3 }
 0x2f0   : > { %v1832_v31 = vpop.f32.mrf.mxu0 }
 0x2f1   : > { %v1898_v43 = vadd.f32 %v1832_v31, %v1006_v45  ;;  %v1845_v34 = vpop.f32.mrf.mxu1 }
 0x2f3   : > { %v3567_v58 = vmul.f32 -1.442695, %v1898_v43 }
 0x2f4   : > { %v3898_v10 = vpop.eup %3897 }
 0x2f5   : > { %v1945_v55 = vsub.f32 %v5093_v61, %v3898_v10  ;;  %3899 = vpow2.f32 %v3567_v58 }
 0x2f6   : > { %v1819_v15 = vpop.f32.mrf.mxu3 }
 0x2f7   : > { %v1946_v14 = vmul.f32 %v1945_v55, %v1895_v50  ;;  %v1897_v13 = vadd.f32 %v1819_v15, %v977_v27 }
 0x2f8   : > { %v1834_v44 = vpop.f32.mrf.mxu0 }
 0x2f9   : > { %v5163_v53 = vadd.f32 %v3898_v10, %v1946_v14  ;;  %v3566_v45 = vmul.f32 -1.442695, %v1897_v13  ;;  %v1847_v20 = vpop.f32.mrf.mxu1  ;;  %v1941_v13 = vadd.f32 %v5034_v37, %v1845_v34 }
 0x2fa   : > { %v5743_v20 = vld [vmem:[#allocation75_spill] sm:$0xff] }
 0x2fb   : > { %v1951_v22 = vpack.c.bf16 %v5163_v53, %v5163_v53  ;;  %3901 = vpow2.f32 %v3566_v45  ;;  %v3900_v61 = vpop.eup %3899 }
 0x2fc   : > { %v1906_v31 = vadd.f32 1.0, %v3900_v61 }
 0x2fd   : > { %3568 = vst [vmem:[%s4619_s20 + $0x8] sm:$0xf] %v1951_v22  ;;  %1965 = vmatmul.bf16.vlgmr.msra.gmra.mxu2 %v1951_v22  ;;  %1978 = vmatmul.bf16.vlgmr.msra.gmra.mxu3 %v1951_v22 }
 0x2fe   : > { %1991 = vmatmul.bf16.vlgmr.msra.gmra.mxu0 %v1951_v22  ;;  %2169 = vmatpush.bf16.msra.mxu2 %v4681_v16  ;;  %v1821_v41 = vpop.f32.mrf.mxu3  ;;  %v5744_v22 = vld [vmem:[#allocation88_spill] sm:$0xff]  ;;  %v1933_v37 = vand.u32 2147483648, %v1906_v31  ;;  %vm1927_vm13 = vweird.f32 %v1906_v31  ;;  %v1931_v34 = vand.u32 2147483647, %v1906_v31 }
 0x2ff   : > { %2182 = vmatpush.bf16.msra.mxu3 %v4684_v18  ;;  %2195 = vmatpush.bf16.msra.mxu0 %v4698_v35  ;;  %v1035_v61 = vadd.f32 %v5744_v22, %v5743_v20  ;;  %v5752_v22 = vld [vmem:[#allocation36_spill] sm:$0xff] }
 0x300   : > { %vm1932_vm15 = vcmp.eq.f32.partialorder %v1931_v34, 8.507059e+37 }
 0x301   : > { %v3902_v6 = vpop.eup %3901 }
 0x302   : > { %2170 = vmatpush.bf16.msra.mxu2 %v4695_v29  ;;  %v1905_v32 = vadd.f32 1.0, %v3902_v6 }
 0x303   : > { %2183 = vmatpush.bf16.msra.mxu3 %v4693_v23  ;;  %2196 = vmatpush.bf16.msra.mxu0 %v4707_v47 }
 0x304   : > { %3903 = vrcp.f32 %v1905_v32  ;;  %v1918_v58 = vand.u32 2147483648, %v1905_v32  ;;  %v1916_v27 = vand.u32 2147483647, %v1905_v32  ;;  %vm1912_vm9 = vweird.f32 %v1905_v32 }
 0x305   : > { %3905 = vrcp.f32 %v1906_v31 }
 0x306   : > { %2171 = vmatpush.bf16.msra.mxu2 %v4704_v39  ;;  %v1919_v14 = vor.u32 1.1754944e-38, %v1918_v58  ;;  %vm1917_vm11 = vcmp.eq.f32.partialorder %v1916_v27, 8.507059e+37 }
 0x307   : > { %2184 = vmatpush.bf16.msra.mxu3 %v4702_v38  ;;  %2197 = vmatpush.bf16.msra.mxu0 %v4736_v28 }
 0x30a   : > { %2172 = vmatpush.bf16.msra.mxu2 %v4710_v51  ;;  %v3904_v43 = vpop.eup %3903 }
 0x30b   : > { %2185 = vmatpush.bf16.msra.mxu3 %v4713_v54  ;;  %2198 = vmatpush.bf16.msra.mxu0 %v4747_v48  ;;  %v3906_v24 = vpop.eup %3905  ;;  %v1908_v10 = vmul.f32 %v3904_v43, %v1905_v32  ;;  %vm1913_vm8 = vweird.f32 %v3904_v43 }
 0x30c   : > { %v1923_v55 = vmul.f32 %v3906_v24, %v1906_v31  ;;  %vm1914_vm10 = vmor %vm1912_vm9, %vm1913_vm8  ;;  %vm1928_vm12 = vweird.f32 %v3906_v24  ;;  %v5746_v31 = vld [vmem:[#allocation31_spill] sm:$0xff] }
 0x30d   : > { %v1909_v8 = vsub.f32 1.0, %v1908_v10  ;;  %vm1929_vm14 = vmor %vm1927_vm13, %vm1928_vm12 }
 0x30e   : > { %2173 = vmatpush.bf16.msra.mxu2 %v4720_v0  ;;  %v1924_v15 = vsub.f32 1.0, %v1923_v55  ;;  %v1934_v55 = vor.u32 1.1754944e-38, %v1933_v37  ;;  %v5757_v37 = vld [vmem:[#allocation55_spill] sm:$0xff] }
 0x30f   : > { %2186 = vmatpush.bf16.msra.mxu3 %v4724_v2  ;;  %2199 = vmatpush.bf16.msra.mxu0 %v4768_v12  ;;  %v1910_v5 = vmul.f32 %v3904_v43, %v1909_v8 }
 0x310   : > { %v1925_v6 = vmul.f32 %v3906_v24, %v1924_v15 }
 0x311   : > { %v1911_v50 = vadd.f32 %v3904_v43, %v1910_v5 }
 0x312   : > { %2174 = vmatpush.bf16.msra.mxu2 %v4733_v17  ;;  %v1926_v10 = vadd.f32 %v3906_v24, %v1925_v6  ;;  %v5755_v6 = vld [vmem:[#allocation38_spill] sm:$0xff] }
 0x313   : > { %2187 = vmatpush.bf16.msra.mxu3 %v4731_v7  ;;  %2200 = vmatpush.bf16.msra.mxu0 %v4775_v46  ;;  %v1915_v44 = vsel %vm1914_vm10, %v3904_v43, %v1911_v50 }
 0x314   : > { %v1920_v45 = vsel %vm1917_vm11, %v1919_v14, %v1915_v44  ;;  %v1930_v43 = vsel %vm1929_vm14, %v3906_v24, %v1926_v10  ;;  %v5747_v24 = vld [vmem:[#allocation40_spill] sm:$0xff]  ;;  %v5748_v14 = vld [vmem:[#allocation34_spill] sm:$0xff]  ;;  %v5750_v44 = vld [vmem:[#allocation41_spill] sm:$0xff] }
 0x315   : > { %v1942_v41 = vmul.f32 %v1941_v13, %v1920_v45  ;;  %v1935_v5 = vsel %vm1932_vm15, %v1934_v55, %v1930_v43  ;;  %v5749_v13 = vld [vmem:[#allocation33_spill] sm:$0xff]  ;;  %v5751_v45 = vld [vmem:[#allocation35_spill] sm:$0xff] }
 0x316   : > { %2175 = vmatpush.bf16.msra.mxu2 %v4742_v40  ;;  %v5756_v10 = vld [vmem:[#allocation47_spill] sm:$0xff]  ;;  %v5758_v43 = vld [vmem:[#allocation49_spill] sm:$0xff] }
 0x317   : > { %2188 = vmatpush.bf16.msra.mxu3 %v4740_v36  ;;  %2201 = vmatpush.bf16.msra.mxu0 %v4797_v52  ;;  %v1943_v32 = vadd.f32 %v1942_v41, %v1035_v61  ;;  %v5753_v61 = vld [vmem:[#allocation42_spill] sm:$0xff]  ;;  %v5754_v41 = vld [vmem:[#allocation37_spill] sm:$0xff]  ;;  %v659_v34 = vadd.f32 %v5757_v37, %v5756_v10 }
 0x319   : > { %3907 = vtanh.f32 %v1943_v32 }
 0x31a   : > { %2176 = vmatpush.bf16.msra.mxu2 %v4753_v60 }
 0x31b   : > { %2189 = vmatpush.bf16.msra.mxu3 %v4756_v62  ;;  %2202 = vmatpush.bf16.msra.mxu0 %v4804_v30 }
 0x31f   : > { %v3908_v8 = vpop.eup %3907 }
 0x320   : > { %v1948_v58 = vsub.f32 %v5125_v19, %v3908_v8  ;;  %v5745_v19 = vld [vmem:[#allocation32_spill] sm:$0xff] }
 0x322   : > { %v1949_v27 = vmul.f32 %v1948_v58, %v1935_v5 }
 0x324   : > { %v5196_v50 = vadd.f32 %v3908_v8, %v1949_v27  ;;  %v5759_v8 = vld [vmem:[#allocation57_spill] sm:$0xff] }
 0x325   : > { %v688_v55 = vadd.f32 %v5759_v8, %v5758_v43 }
 0x326   : > { %v1954_v15 = vpack.c.bf16 %v5196_v50, %v5196_v50 }
 0x328   : > { %3569 = vst [vmem:[%s4621_s16 + $0x14] sm:$0xf] %v1954_v15  ;;  %2004 = vmatmul.bf16.vlgmr.msra.gmra.mxu1 %v1954_v15  ;;  %2017 = vmatmul.bf16.vlgmr.msrb.gmra.mxu2 %v1954_v15 }
 0x329   : > { %2030 = vmatmul.bf16.vlgmr.msrb.gmra.mxu3 %v1954_v15  ;;  %2208 = vmatpush.bf16.msra.mxu1 %v4715_v59 }
 0x32a   : > { %2329 = vmatpush.bf16.msrb.mxu2 %v4631_v56  ;;  %2342 = vmatpush.bf16.msrb.mxu3 %v4629_v49 }
 0x32d   : > { %2209 = vmatpush.bf16.msra.mxu1 %v4744_v42 }
 0x32e   : > { %2330 = vmatpush.bf16.msrb.mxu2 %v4638_v4  ;;  %2343 = vmatpush.bf16.msrb.mxu3 %v4636_v63 }
 0x331   : > { %2210 = vmatpush.bf16.msra.mxu1 %v4750_v57 }
 0x332   : > { %2331 = vmatpush.bf16.msrb.mxu2 %v4641_v9  ;;  %2344 = vmatpush.bf16.msrb.mxu3 %v4644_v11 }
 0x335   : > { %2211 = vmatpush.bf16.msra.mxu1 %v4771_v25 }
 0x336   : > { %2332 = vmatpush.bf16.msrb.mxu2 %v4647_v21  ;;  %2345 = vmatpush.bf16.msrb.mxu3 %v5723_v26 }
 0x339   : > { %2212 = vmatpush.bf16.msra.mxu1 %v5724_v1 }
 0x33a   : > { %2333 = vmatpush.bf16.msrb.mxu2 %v5745_v19  ;;  %2346 = vmatpush.bf16.msrb.mxu3 %v5746_v31 }
 0x33d   : > { %2213 = vmatpush.bf16.msra.mxu1 %v5747_v24  ;;  %v5762_v24 = vld [vmem:[#allocation64_spill] sm:$0xff] }
 0x33e   : > { %2334 = vmatpush.bf16.msrb.mxu2 %v5748_v14  ;;  %2347 = vmatpush.bf16.msrb.mxu3 %v5749_v13 }
 0x341   : > { %2214 = vmatpush.bf16.msra.mxu1 %v5750_v44 }
 0x342   : > { %2335 = vmatpush.bf16.msrb.mxu2 %v5751_v45  ;;  %2348 = vmatpush.bf16.msrb.mxu3 %v5752_v22 }
 0x345   : > { %2215 = vmatpush.bf16.msra.mxu1 %v5753_v61 }
 0x346   : > { %2336 = vmatpush.bf16.msrb.mxu2 %v5754_v41  ;;  %2349 = vmatpush.bf16.msrb.mxu3 %v5755_v6 }
 0x37b   : > { %v1992_v32 = vpop.f32.mrf.mxu0 }
 0x380   : > { %v1966_v58 = vpop.f32.mrf.mxu2  ;;  %v1979_v5 = vpop.f32.mrf.mxu3 }
 0x381   : > { %v2043_v27 = vadd.f32 %v1966_v58, %v659_v34  ;;  %v2044_v15 = vadd.f32 %v1979_v5, %v688_v55  ;;  %v5760_v5 = vld [vmem:[#allocation53_spill] sm:$0xff] }
 0x383   : > { %v3570_v20 = vmul.f32 -1.442695, %v2043_v27  ;;  %v3571_v3 = vmul.f32 -1.442695, %v2044_v15  ;;  %v1994_v33 = vpop.f32.mrf.mxu0  ;;  %v5761_v27 = vld [vmem:[#allocation58_spill] sm:$0xff] }
 0x385   : > { %3909 = vpow2.f32 %v3570_v20 }
 0x386   : > { %3911 = vpow2.f32 %v3571_v3 }
 0x388   : > { %v1968_v61 = vpop.f32.mrf.mxu2  ;;  %v1981_v41 = vpop.f32.mrf.mxu3 }
 0x38b   : > { %v3910_v22 = vpop.eup %3909 }
 0x38c   : > { %v3912_v6 = vpop.eup %3911  ;;  %v2051_v45 = vadd.f32 1.0, %v3910_v22  ;;  %v5232_v22 = vld [vmem:[%s5555_s5] ss:$0 sm:$0xff] }
 0x38d   : > { %v2052_v44 = vadd.f32 1.0, %v3912_v6  ;;  %v2123_v61 = vadd.f32 %v5232_v22, %v1992_v32 }
 0x38e   : > { %3913 = vrcp.f32 %v2051_v45  ;;  %v2064_v13 = vand.u32 2147483648, %v2051_v45  ;;  %v2062_v58 = vand.u32 2147483647, %v2051_v45  ;;  %vm2058_vm1 = vweird.f32 %v2051_v45 }
 0x38f   : > { %3915 = vrcp.f32 %v2052_v44  ;;  %vm2073_vm5 = vweird.f32 %v2052_v44 }
 0x390   : > { %v2065_v3 = vor.u32 1.1754944e-38, %v2064_v13  ;;  %vm2063_vm3 = vcmp.eq.f32.partialorder %v2062_v58, 8.507059e+37  ;;  %v2079_v13 = vand.u32 2147483648, %v2052_v44 }
 0x392   : > { %v2080_v58 = vor.u32 1.1754944e-38, %v2079_v13 }
 0x394   : > { %v3914_v37 = vpop.eup %3913 }
 0x395   : > { %v3916_v10 = vpop.eup %3915  ;;  %v2054_v8 = vmul.f32 %v3914_v37, %v2051_v45  ;;  %vm2059_vm0 = vweird.f32 %v3914_v37 }
 0x396   : > { %v2069_v34 = vmul.f32 %v3916_v10, %v2052_v44  ;;  %vm2060_vm2 = vmor %vm2058_vm1, %vm2059_vm0  ;;  %vm2074_vm4 = vweird.f32 %v3916_v10 }
 0x397   : > { %v2055_v43 = vsub.f32 1.0, %v2054_v8  ;;  %vm2075_vm6 = vmor %vm2073_vm5, %vm2074_vm4 }
 0x398   : > { %v2070_v20 = vsub.f32 1.0, %v2069_v34  ;;  %v2077_v34 = vand.u32 2147483647, %v2052_v44 }
 0x399   : > { %v2056_v55 = vmul.f32 %v3914_v37, %v2055_v43  ;;  %v717_v43 = vadd.f32 %v5761_v27, %v5760_v5 }
 0x39a   : > { %v2071_v8 = vmul.f32 %v3916_v10, %v2070_v20  ;;  %vm2078_vm7 = vcmp.eq.f32.partialorder %v2077_v34, 8.507059e+37 }
 0x39b   : > { %v2057_v33 = vadd.f32 %v3914_v37, %v2056_v55 }
 0x39c   : > { %v2072_v45 = vadd.f32 %v3916_v10, %v2071_v8 }
 0x39d   : > { %v2061_v41 = vsel %vm2060_vm2, %v3914_v37, %v2057_v33 }
 0x39e   : > { %v2066_v6 = vsel %vm2063_vm3, %v2065_v3, %v2061_v41  ;;  %v2076_v32 = vsel %vm2075_vm6, %v3916_v10, %v2072_v45 }
 0x39f   : > { %v2124_v15 = vmul.f32 %v2123_v61, %v2066_v6  ;;  %v2081_v20 = vsel %vm2078_vm7, %v2080_v58, %v2076_v32  ;;  %v5763_v6 = vld [vmem:[#allocation85_spill] sm:$0xff] }
 0x3a1   : > { %v2125_v55 = vadd.f32 %v2124_v15, %v717_v43 }
 0x3a3   : > { %3917 = vtanh.f32 %v2125_v55 }
 0x3a5   : > { %v2005_v14 = vpop.f32.mrf.mxu1 }
 0x3a6   : > { %v2083_v31 = vadd.f32 %v2005_v14, %v5762_v24 }
 0x3a8   : > { %v3572_v33 = vmul.f32 -1.442695, %v2083_v31 }
 0x3a9   : > { %v3918_v37 = vpop.eup %3917 }
 0x3aa   : > { %v2131_v3 = vsub.f32 %v5163_v53, %v3918_v37  ;;  %3919 = vpow2.f32 %v3572_v33 }
 0x3ab   : > { %v2018_v61 = vpop.f32.mrf.mxu2 }
 0x3ac   : > { %v2132_v41 = vmul.f32 %v2131_v3, %v2081_v20  ;;  %v2084_v27 = vadd.f32 %v2018_v61, %v5763_v6  ;;  %v2031_v43 = vpop.f32.mrf.mxu3 }
 0x3ad   : > { %v2007_v44 = vpop.f32.mrf.mxu1 }
 0x3ae   : > { %v5240_v15 = vadd.f32 %v3918_v37, %v2132_v41  ;;  %v3573_v8 = vmul.f32 -1.442695, %v2084_v27  ;;  %v5260_v44 = vld [vmem:[%s5555_s5 + $0x1] ss:$0 sm:$0xff] }
 0x3b0   : > { %v2137_v24 = vpack.c.bf16 %v5240_v15, %v5240_v15  ;;  %v3920_v14 = vpop.eup %3919  ;;  %3921 = vpow2.f32 %v3573_v8  ;;  %v2127_v8 = vadd.f32 %v5260_v44, %v2031_v43 }
 0x3b1   : > { %v2091_v31 = vadd.f32 1.0, %v3920_v14 }
 0x3b2   : > { %3574 = vst [vmem:[%s4619_s20 + $0xc] sm:$0xf] %v2137_v24  ;;  %2151 = vmatmul.bf16.vlgmr.msrb.gmra.mxu0 %v2137_v24  ;;  %2164 = vmatmul.bf16.vlgmr.msrb.gmra.mxu1 %v2137_v24 }
 0x3b3   : > { %2177 = vmatmul.bf16.vlgmr.msra.gmra.mxu2 %v2137_v24  ;;  %2355 = vmatpush.bf16.msrb.mxu0 %v4681_v16  ;;  %3923 = vrcp.f32 %v2091_v31  ;;  %v2020_v53 = vpop.f32.mrf.mxu2  ;;  %v2104_v37 = vand.u32 2147483648, %v2091_v31  ;;  %v2102_v33 = vand.u32 2147483647, %v2091_v31  ;;  %vm2098_vm9 = vweird.f32 %v2091_v31 }
 0x3b4   : > { %2368 = vmatpush.bf16.msrb.mxu1 %v4684_v18  ;;  %2381 = vmatpush.bf16.msra.mxu2 %v4698_v35  ;;  %v2033_v10 = vpop.f32.mrf.mxu3  ;;  %v5764_v53 = vld [vmem:[#allocation86_spill] sm:$0xff] }
 0x3b5   : > { %v2105_v41 = vor.u32 1.1754944e-38, %v2104_v37  ;;  %vm2103_vm11 = vcmp.eq.f32.partialorder %v2102_v33, 8.507059e+37 }
 0x3b6   : > { %v3922_v55 = vpop.eup %3921 }
 0x3b7   : > { %2356 = vmatpush.bf16.msrb.mxu0 %v4695_v29  ;;  %v2092_v45 = vadd.f32 1.0, %v3922_v55 }
 0x3b8   : > { %2369 = vmatpush.bf16.msrb.mxu1 %v4693_v23  ;;  %2382 = vmatpush.bf16.msra.mxu2 %v4707_v47 }
 0x3b9   : > { %v3924_v13 = vpop.eup %3923  ;;  %3925 = vrcp.f32 %v2092_v45  ;;  %v2119_v55 = vand.u32 2147483648, %v2092_v45  ;;  %vm2113_vm13 = vweird.f32 %v2092_v45 }
 0x3ba   : > { %v2094_v34 = vmul.f32 %v3924_v13, %v2091_v31  ;;  %vm2099_vm8 = vweird.f32 %v3924_v13 }
 0x3bb   : > { %2357 = vmatpush.bf16.msrb.mxu0 %v4704_v39  ;;  %vm2100_vm10 = vmor %vm2098_vm9, %vm2099_vm8  ;;  %v2120_v37 = vor.u32 1.1754944e-38, %v2119_v55  ;;  %v5775_v55 = vld [vmem:[#allocation60_spill] sm:$0xff] }
 0x3bc   : > { %2370 = vmatpush.bf16.msrb.mxu1 %v4702_v38  ;;  %2383 = vmatpush.bf16.msra.mxu2 %v4736_v28  ;;  %v2095_v32 = vsub.f32 1.0, %v2094_v34 }
 0x3be   : > { %v2096_v58 = vmul.f32 %v3924_v13, %v2095_v32 }
 0x3bf   : > { %2358 = vmatpush.bf16.msrb.mxu0 %v4710_v51  ;;  %v3926_v3 = vpop.eup %3925 }
 0x3c0   : > { %2371 = vmatpush.bf16.msrb.mxu1 %v4713_v54  ;;  %2384 = vmatpush.bf16.msra.mxu2 %v4747_v48  ;;  %v2109_v20 = vmul.f32 %v3926_v3, %v2092_v45  ;;  %v2097_v61 = vadd.f32 %v3924_v13, %v2096_v58  ;;  %vm2114_vm12 = vweird.f32 %v3926_v3 }
 0x3c1   : > { %vm2115_vm14 = vmor %vm2113_vm13, %vm2114_vm12 }
 0x3c2   : > { %v2110_v6 = vsub.f32 1.0, %v2109_v20  ;;  %v2101_v27 = vsel %vm2100_vm10, %v3924_v13, %v2097_v61  ;;  %v2117_v13 = vand.u32 2147483647, %v2092_v45 }
 0x3c3   : > { %2359 = vmatpush.bf16.msrb.mxu0 %v4720_v0  ;;  %v2106_v24 = vsel %vm2103_vm11, %v2105_v41, %v2101_v27  ;;  %v5767_v41 = vld [vmem:[#allocation34_spill] sm:$0xff]  ;;  %v5769_v27 = vld [vmem:[#allocation41_spill] sm:$0xff] }
 0x3c4   : > { %2372 = vmatpush.bf16.msrb.mxu1 %v4724_v2  ;;  %2385 = vmatpush.bf16.msra.mxu2 %v4768_v12  ;;  %v2128_v14 = vmul.f32 %v2127_v8, %v2106_v24  ;;  %v2111_v31 = vmul.f32 %v3926_v3, %v2110_v6  ;;  %vm2118_vm15 = vcmp.eq.f32.partialorder %v2117_v13, 8.507059e+37  ;;  %v5768_v6 = vld [vmem:[#allocation33_spill] sm:$0xff]  ;;  %v5770_v8 = vld [vmem:[#allocation35_spill] sm:$0xff]  ;;  %v5771_v24 = vld [vmem:[#allocation36_spill] sm:$0xff] }
 0x3c6   : > { %v2129_v10 = vadd.f32 %v2128_v14, %v5764_v53  ;;  %v2112_v43 = vadd.f32 %v3926_v3, %v2111_v31  ;;  %v5772_v14 = vld [vmem:[#allocation42_spill] sm:$0xff]  ;;  %v5773_v31 = vld [vmem:[#allocation37_spill] sm:$0xff] }
 0x3c7   : > { %2360 = vmatpush.bf16.msrb.mxu0 %v4733_v17  ;;  %v5774_v53 = vld [vmem:[#allocation38_spill] sm:$0xff] }
 0x3c8   : > { %2373 = vmatpush.bf16.msrb.mxu1 %v4731_v7  ;;  %2386 = vmatpush.bf16.msra.mxu2 %v4775_v46  ;;  %3927 = vtanh.f32 %v2129_v10  ;;  %v2116_v34 = vsel %vm2115_vm14, %v3926_v3, %v2112_v43  ;;  %v5766_v3 = vld [vmem:[#allocation40_spill] sm:$0xff] }
 0x3c9   : > { %v2121_v33 = vsel %vm2118_vm15, %v2120_v37, %v2116_v34  ;;  %v5776_v34 = vld [vmem:[#allocation61_spill] sm:$0xff] }
 0x3cb   : > { %2361 = vmatpush.bf16.msrb.mxu0 %v4742_v40 }
 0x3cc   : > { %2374 = vmatpush.bf16.msrb.mxu1 %v4740_v36  ;;  %2387 = vmatpush.bf16.msra.mxu2 %v4797_v52 }
 0x3ce   : > { %v3928_v32 = vpop.eup %3927 }
 0x3cf   : > { %2362 = vmatpush.bf16.msrb.mxu0 %v4753_v60  ;;  %v2134_v58 = vsub.f32 %v5196_v50, %v3928_v32  ;;  %v5765_v50 = vld [vmem:[#allocation31_spill] sm:$0xff] }
 0x3d0   : > { %2375 = vmatpush.bf16.msrb.mxu1 %v4756_v62  ;;  %2388 = vmatpush.bf16.msra.mxu2 %v4804_v30 }
 0x3d1   : > { %v2135_v45 = vmul.f32 %v2134_v58, %v2121_v33 }
 0x3d3   : > { %v5277_v20 = vadd.f32 %v3928_v32, %v2135_v45 }
 0x3d5   : > { %v2140_v61 = vpack.c.bf16 %v5277_v20, %v5277_v20 }
 0x3d7   : > { %3575 = vst [vmem:[%s4621_s16 + $0x10] sm:$0xf] %v2140_v61  ;;  %2190 = vmatmul.bf16.vlgmr.msra.gmra.mxu3 %v2140_v61  ;;  %2203 = vmatmul.bf16.vlgmr.msra.gmra.mxu0 %v2140_v61 }
 0x3d8   : > { %2216 = vmatmul.bf16.vlgmr.msra.gmra.mxu1 %v2140_v61  ;;  %2394 = vmatpush.bf16.msra.mxu3 %v4715_v59 }
 0x3d9   : > { %2515 = vmatpush.bf16.msra.mxu0 %v4631_v56  ;;  %2528 = vmatpush.bf16.msra.mxu1 %v4629_v49 }
 0x3dc   : > { %2395 = vmatpush.bf16.msra.mxu3 %v4744_v42 }
 0x3dd   : > { %2516 = vmatpush.bf16.msra.mxu0 %v4638_v4  ;;  %2529 = vmatpush.bf16.msra.mxu1 %v4636_v63 }
 0x3e0   : > { %2396 = vmatpush.bf16.msra.mxu3 %v4750_v57 }
 0x3e1   : > { %2517 = vmatpush.bf16.msra.mxu0 %v4641_v9  ;;  %2530 = vmatpush.bf16.msra.mxu1 %v4644_v11 }
 0x3e4   : > { %2397 = vmatpush.bf16.msra.mxu3 %v4771_v25 }
 0x3e5   : > { %2518 = vmatpush.bf16.msra.mxu0 %v4647_v21  ;;  %2531 = vmatpush.bf16.msra.mxu1 %v5723_v26 }
 0x3e8   : > { %2398 = vmatpush.bf16.msra.mxu3 %v5724_v1 }
 0x3e9   : > { %2519 = vmatpush.bf16.msra.mxu0 %v5745_v19  ;;  %2532 = vmatpush.bf16.msra.mxu1 %v5765_v50  ;;  %v5779_v50 = vld [vmem:[#allocation83_spill] sm:$0xff] }
 0x3ec   : > { %2399 = vmatpush.bf16.msra.mxu3 %v5766_v3 }
 0x3ed   : > { %2520 = vmatpush.bf16.msra.mxu0 %v5767_v41  ;;  %2533 = vmatpush.bf16.msra.mxu1 %v5768_v6  ;;  %v5777_v41 = vld [vmem:[#allocation62_spill] sm:$0xff] }
 0x3f0   : > { %2400 = vmatpush.bf16.msra.mxu3 %v5769_v27 }
 0x3f1   : > { %2521 = vmatpush.bf16.msra.mxu0 %v5770_v8  ;;  %2534 = vmatpush.bf16.msra.mxu1 %v5771_v24 }
 0x3f4   : > { %2401 = vmatpush.bf16.msra.mxu3 %v5772_v14 }
 0x3f5   : > { %2522 = vmatpush.bf16.msra.mxu0 %v5773_v31  ;;  %2535 = vmatpush.bf16.msra.mxu1 %v5774_v53 }
 0x42f   : > { %v2152_v10 = vpop.f32.mrf.mxu0  ;;  %v2165_v43 = vpop.f32.mrf.mxu1 }
 0x430   : > { %v2229_v13 = vadd.f32 %v2152_v10, %v5775_v55  ;;  %v2230_v32 = vadd.f32 %v2165_v43, %v5776_v34 }
 0x432   : > { %v3576_v37 = vmul.f32 -1.442695, %v2229_v13  ;;  %v3577_v58 = vmul.f32 -1.442695, %v2230_v32 }
 0x434   : > { %3929 = vpow2.f32 %v3576_v37 }
 0x435   : > { %3931 = vpow2.f32 %v3577_v58 }
 0x436   : > { %v2178_v33 = vpop.f32.mrf.mxu2 }
 0x437   : > { %v2154_v45 = vpop.f32.mrf.mxu0  ;;  %v2167_v61 = vpop.f32.mrf.mxu1 }
 0x43a   : > { %v3930_v5 = vpop.eup %3929 }
 0x43b   : > { %v3932_v24 = vpop.eup %3931  ;;  %v2237_v14 = vadd.f32 1.0, %v3930_v5  ;;  %v2309_v5 = vadd.f32 %v5232_v22, %v2178_v33 }
 0x43c   : > { %v2238_v8 = vadd.f32 1.0, %v3932_v24 }
 0x43d   : > { %3933 = vrcp.f32 %v2237_v14  ;;  %v2250_v43 = vand.u32 2147483648, %v2237_v14  ;;  %v2248_v34 = vand.u32 2147483647, %v2237_v14  ;;  %vm2244_vm1 = vweird.f32 %v2237_v14 }
 0x43e   : > { %3935 = vrcp.f32 %v2238_v8  ;;  %v2180_v53 = vpop.f32.mrf.mxu2  ;;  %vm2259_vm5 = vweird.f32 %v2238_v8 }
 0x43f   : > { %v2251_v58 = vor.u32 1.1754944e-38, %v2250_v43  ;;  %vm2249_vm3 = vcmp.eq.f32.partialorder %v2248_v34, 8.507059e+37 }
 0x443   : > { %v3934_v31 = vpop.eup %3933 }
 0x444   : > { %v3936_v27 = vpop.eup %3935  ;;  %v2240_v6 = vmul.f32 %v3934_v31, %v2237_v14  ;;  %vm2245_vm0 = vweird.f32 %v3934_v31  ;;  %v2263_v14 = vand.u32 2147483647, %v2238_v8 }
 0x445   : > { %v2255_v55 = vmul.f32 %v3936_v27, %v2238_v8  ;;  %vm2246_vm2 = vmor %vm2244_vm1, %vm2245_vm0  ;;  %vm2260_vm4 = vweird.f32 %v3936_v27 }
 0x446   : > { %v2241_v10 = vsub.f32 1.0, %v2240_v6  ;;  %vm2261_vm6 = vmor %vm2259_vm5, %vm2260_vm4  ;;  %vm2264_vm7 = vcmp.eq.f32.partialorder %v2263_v14, 8.507059e+37 }
 0x447   : > { %v2256_v37 = vsub.f32 1.0, %v2255_v55 }
 0x448   : > { %v2242_v13 = vmul.f32 %v3934_v31, %v2241_v10  ;;  %v5778_v10 = vld [vmem:[#allocation74_spill] sm:$0xff] }
 0x449   : > { %v2257_v61 = vmul.f32 %v3936_v27, %v2256_v37  ;;  %v1001_v19 = vadd.f32 %v5779_v50, %v5778_v10  ;;  %v5780_v37 = vld [vmem:[#allocation43_spill] sm:$0xff] }
 0x44a   : > { %v2243_v32 = vadd.f32 %v3934_v31, %v2242_v13  ;;  %v2265_v13 = vand.u32 2147483648, %v2238_v8 }
 0x44b   : > { %v2258_v6 = vadd.f32 %v3936_v27, %v2257_v61 }
 0x44c   : > { %v2247_v45 = vsel %vm2246_vm2, %v3934_v31, %v2243_v32  ;;  %v2266_v32 = vor.u32 1.1754944e-38, %v2265_v13 }
 0x44d   : > { %v2252_v24 = vsel %vm2249_vm3, %v2251_v58, %v2247_v45  ;;  %v2262_v34 = vsel %vm2261_vm6, %v3936_v27, %v2258_v6  ;;  %v5781_v58 = vld [vmem:[#allocation59_spill] sm:$0xff] }
 0x44e   : > { %v2310_v53 = vmul.f32 %v2309_v5, %v2252_v24  ;;  %v972_v45 = vadd.f32 %v5781_v58, %v5780_v37  ;;  %v2267_v5 = vsel %vm2264_vm7, %v2266_v32, %v2262_v34 }
 0x450   : > { %v2311_v3 = vadd.f32 %v2310_v53, %v5777_v41 }
 0x452   : > { %3937 = vtanh.f32 %v2311_v3 }
 0x454   : > { %v2204_v55 = vpop.f32.mrf.mxu0 }
 0x455   : > { %v2270_v31 = vadd.f32 %v2204_v55, %v1001_v19  ;;  %v2217_v43 = vpop.f32.mrf.mxu1 }
 0x457   : > { %v3579_v3 = vmul.f32 -1.442695, %v2270_v31 }
 0x458   : > { %v3938_v33 = vpop.eup %3937 }
 0x459   : > { %v2317_v41 = vsub.f32 %v5240_v15, %v3938_v33  ;;  %3939 = vpow2.f32 %v3579_v3 }
 0x45a   : > { %v2191_v24 = vpop.f32.mrf.mxu3 }
 0x45b   : > { %v2318_v50 = vmul.f32 %v2317_v41, %v2267_v5  ;;  %v2269_v53 = vadd.f32 %v2191_v24, %v972_v45 }
 0x45c   : > { %v2206_v19 = vpop.f32.mrf.mxu0 }
 0x45d   : > { %v5315_v8 = vadd.f32 %v3938_v33, %v2318_v50  ;;  %v3578_v61 = vmul.f32 -1.442695, %v2269_v53  ;;  %v2219_v27 = vpop.f32.mrf.mxu1  ;;  %v2313_v19 = vadd.f32 %v5260_v44, %v2217_v43 }
 0x45f   : > { %v2323_v6 = vpack.c.bf16 %v5315_v8, %v5315_v8  ;;  %3941 = vpow2.f32 %v3578_v61  ;;  %v3940_v15 = vpop.eup %3939 }
 0x460   : > { %v2278_v55 = vadd.f32 1.0, %v3940_v15  ;;  %v5783_v15 = vld [vmem:[#allocation84_spill] sm:$0xff] }
 0x461   : > { %3580 = vst [vmem:[%s4619_s20 + $0x10] sm:$0xf] %v2323_v6  ;;  %2337 = vmatmul.bf16.vlgmr.msrb.gmra.mxu2 %v2323_v6  ;;  %2350 = vmatmul.bf16.vlgmr.msrb.gmra.mxu3 %v2323_v6 }
 0x462   : > { %2363 = vmatmul.bf16.vlgmr.msrb.gmra.mxu0 %v2323_v6  ;;  %2541 = vmatpush.bf16.msrb.mxu2 %v4681_v16  ;;  %v2193_v13 = vpop.f32.mrf.mxu3  ;;  %v5782_v6 = vld [vmem:[#allocation75_spill] sm:$0xff]  ;;  %v2305_v43 = vand.u32 2147483648, %v2278_v55  ;;  %vm2299_vm13 = vweird.f32 %v2278_v55 }
 0x463   : > { %2554 = vmatpush.bf16.msrb.mxu3 %v4684_v18  ;;  %2567 = vmatpush.bf16.msrb.mxu0 %v4698_v35  ;;  %v1030_v13 = vadd.f32 %v5783_v15, %v5782_v6  ;;  %v5796_v15 = vld [vmem:[#allocation63_spill] sm:$0xff] }
 0x465   : > { %v3942_v14 = vpop.eup %3941 }
 0x466   : > { %2542 = vmatpush.bf16.msrb.mxu2 %v4695_v29  ;;  %v2277_v31 = vadd.f32 1.0, %v3942_v14 }
 0x467   : > { %2555 = vmatpush.bf16.msrb.mxu3 %v4693_v23  ;;  %2568 = vmatpush.bf16.msrb.mxu0 %v4707_v47 }
 0x468   : > { %3943 = vrcp.f32 %v2277_v31  ;;  %v2290_v58 = vand.u32 2147483648, %v2277_v31  ;;  %v2288_v5 = vand.u32 2147483647, %v2277_v31  ;;  %vm2284_vm9 = vweird.f32 %v2277_v31 }
 0x469   : > { %3945 = vrcp.f32 %v2278_v55 }
 0x46a   : > { %2543 = vmatpush.bf16.msrb.mxu2 %v4704_v39  ;;  %v2291_v53 = vor.u32 1.1754944e-38, %v2290_v58  ;;  %vm2289_vm11 = vcmp.eq.f32.partialorder %v2288_v5, 8.507059e+37 }
 0x46b   : > { %2556 = vmatpush.bf16.msrb.mxu3 %v4702_v38  ;;  %2569 = vmatpush.bf16.msrb.mxu0 %v4736_v28 }
 0x46e   : > { %2544 = vmatpush.bf16.msrb.mxu2 %v4710_v51  ;;  %v3944_v34 = vpop.eup %3943 }
 0x46f   : > { %2557 = vmatpush.bf16.msrb.mxu3 %v4713_v54  ;;  %2570 = vmatpush.bf16.msrb.mxu0 %v4747_v48  ;;  %v3946_v33 = vpop.eup %3945  ;;  %v2280_v32 = vmul.f32 %v3944_v34, %v2277_v31  ;;  %vm2285_vm8 = vweird.f32 %v3944_v34 }
 0x470   : > { %v2295_v3 = vmul.f32 %v3946_v33, %v2278_v55  ;;  %vm2286_vm10 = vmor %vm2284_vm9, %vm2285_vm8  ;;  %vm2300_vm12 = vweird.f32 %v3946_v33 }
 0x471   : > { %v2281_v41 = vsub.f32 1.0, %v2280_v32  ;;  %vm2301_vm14 = vmor %vm2299_vm13, %vm2300_vm12 }
 0x472   : > { %2545 = vmatpush.bf16.msrb.mxu2 %v4720_v0  ;;  %v2296_v24 = vsub.f32 1.0, %v2295_v3 }
 0x473   : > { %2558 = vmatpush.bf16.msrb.mxu3 %v4724_v2  ;;  %2571 = vmatpush.bf16.msrb.mxu0 %v4768_v12  ;;  %v2282_v45 = vmul.f32 %v3944_v34, %v2281_v41 }
 0x474   : > { %v2297_v31 = vmul.f32 %v3946_v33, %v2296_v24 }
 0x475   : > { %v2283_v50 = vadd.f32 %v3944_v34, %v2282_v45  ;;  %v2306_v45 = vor.u32 1.1754944e-38, %v2305_v43 }
 0x476   : > { %2546 = vmatpush.bf16.msrb.mxu2 %v4733_v17  ;;  %v2298_v41 = vadd.f32 %v3946_v33, %v2297_v31  ;;  %v5798_v31 = vld [vmem:[#allocation65_spill] sm:$0xff] }
 0x477   : > { %2559 = vmatpush.bf16.msrb.mxu3 %v4731_v7  ;;  %2572 = vmatpush.bf16.msrb.mxu0 %v4775_v46  ;;  %v2287_v61 = vsel %vm2286_vm10, %v3944_v34, %v2283_v50  ;;  %v2303_v34 = vand.u32 2147483647, %v2278_v55  ;;  %v5791_v55 = vld [vmem:[#allocation36_spill] sm:$0xff] }
 0x478   : > { %v2292_v27 = vsel %vm2289_vm11, %v2291_v53, %v2287_v61  ;;  %v2302_v3 = vsel %vm2301_vm14, %v3946_v33, %v2298_v41  ;;  %v5794_v33 = vld [vmem:[#allocation38_spill] sm:$0xff] }
 0x479   : > { %v2314_v14 = vmul.f32 %v2313_v19, %v2292_v27  ;;  %vm2304_vm15 = vcmp.eq.f32.partialorder %v2303_v34, 8.507059e+37  ;;  %v5795_v27 = vld [vmem:[#allocation47_spill] sm:$0xff] }
 0x47a   : > { %2547 = vmatpush.bf16.msrb.mxu2 %v4742_v40  ;;  %v2307_v50 = vsel %vm2304_vm15, %v2306_v45, %v2302_v3 }
 0x47b   : > { %2560 = vmatpush.bf16.msrb.mxu3 %v4740_v36  ;;  %2573 = vmatpush.bf16.msrb.mxu0 %v4797_v52  ;;  %v2315_v32 = vadd.f32 %v2314_v14, %v1030_v13  ;;  %v664_v13 = vadd.f32 %v5796_v15, %v5795_v27  ;;  %v5797_v14 = vld [vmem:[#allocation49_spill] sm:$0xff] }
 0x47d   : > { %3947 = vtanh.f32 %v2315_v32  ;;  %v693_v32 = vadd.f32 %v5798_v31, %v5797_v14 }
 0x47e   : > { %2548 = vmatpush.bf16.msrb.mxu2 %v4753_v60 }
 0x47f   : > { %2561 = vmatpush.bf16.msrb.mxu3 %v4756_v62  ;;  %2574 = vmatpush.bf16.msrb.mxu0 %v4804_v30 }
 0x483   : > { %v3948_v58 = vpop.eup %3947 }
 0x484   : > { %v2320_v5 = vsub.f32 %v5277_v20, %v3948_v58  ;;  %v5788_v20 = vld [vmem:[#allocation33_spill] sm:$0xff] }
 0x486   : > { %v2321_v24 = vmul.f32 %v2320_v5, %v2307_v50 }
 0x488   : > { %v5348_v53 = vadd.f32 %v3948_v58, %v2321_v24 }
 0x48a   : > { %v2326_v19 = vpack.c.bf16 %v5348_v53, %v5348_v53 }
 0x48c   : > { %3581 = vst [vmem:[%s4621_s16 + $0xc] sm:$0xf] %v2326_v19  ;;  %2376 = vmatmul.bf16.vlgmr.msrb.gmra.mxu1 %v2326_v19  ;;  %2389 = vmatmul.bf16.vlgmr.msra.gmra.mxu2 %v2326_v19 }
 0x48d   : > { %2402 = vmatmul.bf16.vlgmr.msra.gmra.mxu3 %v2326_v19  ;;  %2580 = vmatpush.bf16.msrb.mxu1 %v4715_v59 }
 0x48e   : > { %2701 = vmatpush.bf16.msra.mxu2 %v4631_v56  ;;  %2714 = vmatpush.bf16.msra.mxu3 %v4629_v49  ;;  %v5784_v49 = vld [vmem:[#allocation32_spill] sm:$0xff]  ;;  %v5785_v56 = vld [vmem:[#allocation31_spill] sm:$0xff] }
 0x491   : > { %2581 = vmatpush.bf16.msrb.mxu1 %v4744_v42 }
 0x492   : > { %2702 = vmatpush.bf16.msra.mxu2 %v4638_v4  ;;  %2715 = vmatpush.bf16.msra.mxu3 %v4636_v63  ;;  %v5786_v4 = vld [vmem:[#allocation40_spill] sm:$0xff]  ;;  %v5787_v63 = vld [vmem:[#allocation34_spill] sm:$0xff] }
 0x495   : > { %2582 = vmatpush.bf16.msrb.mxu1 %v4750_v57 }
 0x496   : > { %2703 = vmatpush.bf16.msra.mxu2 %v4641_v9  ;;  %2716 = vmatpush.bf16.msra.mxu3 %v4644_v11  ;;  %v5789_v9 = vld [vmem:[#allocation41_spill] sm:$0xff]  ;;  %v5790_v11 = vld [vmem:[#allocation35_spill] sm:$0xff] }
 0x499   : > { %2583 = vmatpush.bf16.msrb.mxu1 %v4771_v25 }
 0x49a   : > { %2704 = vmatpush.bf16.msra.mxu2 %v4647_v21  ;;  %2717 = vmatpush.bf16.msra.mxu3 %v5723_v26  ;;  %v5792_v21 = vld [vmem:[#allocation42_spill] sm:$0xff]  ;;  %v5793_v26 = vld [vmem:[#allocation37_spill] sm:$0xff] }
 0x49d   : > { %2584 = vmatpush.bf16.msrb.mxu1 %v5724_v1 }
 0x49e   : > { %2705 = vmatpush.bf16.msra.mxu2 %v5784_v49  ;;  %2718 = vmatpush.bf16.msra.mxu3 %v5785_v56 }
 0x4a1   : > { %2585 = vmatpush.bf16.msrb.mxu1 %v5786_v4 }
 0x4a2   : > { %2706 = vmatpush.bf16.msra.mxu2 %v5787_v63  ;;  %2719 = vmatpush.bf16.msra.mxu3 %v5788_v20 }
 0x4a5   : > { %2586 = vmatpush.bf16.msrb.mxu1 %v5789_v9 }
 0x4a6   : > { %2707 = vmatpush.bf16.msra.mxu2 %v5790_v11  ;;  %2720 = vmatpush.bf16.msra.mxu3 %v5791_v55 }
 0x4a9   : > { %2587 = vmatpush.bf16.msrb.mxu1 %v5792_v21 }
 0x4aa   : > { %2708 = vmatpush.bf16.msra.mxu2 %v5793_v26  ;;  %2721 = vmatpush.bf16.msra.mxu3 %v5794_v33 }
 0x4df   : > { %v2364_v61 = vpop.f32.mrf.mxu0 }
 0x4e4   : > { %v2338_v41 = vpop.f32.mrf.mxu2  ;;  %v2351_v43 = vpop.f32.mrf.mxu3 }
 0x4e5   : > { %v2415_v34 = vadd.f32 %v2338_v41, %v664_v13  ;;  %v2416_v3 = vadd.f32 %v2351_v43, %v693_v32 }
 0x4e7   : > { %v3582_v58 = vmul.f32 -1.442695, %v2415_v34  ;;  %v3583_v45 = vmul.f32 -1.442695, %v2416_v3  ;;  %v2366_v5 = vpop.f32.mrf.mxu0  ;;  %v2495_v34 = vadd.f32 %v5232_v22, %v2364_v61 }
 0x4e8   : > { %v5800_v5 = vld [vmem:[#allocation66_spill] sm:$0xff] }
 0x4e9   : > { %3949 = vpow2.f32 %v3582_v58 }
 0x4ea   : > { %3951 = vpow2.f32 %v3583_v45  ;;  %v5799_v45 = vld [vmem:[#allocation53_spill] sm:$0xff] }
 0x4ec   : > { %v2340_v50 = vpop.f32.mrf.mxu2  ;;  %v2353_v24 = vpop.f32.mrf.mxu3 }
 0x4ed   : > { %v722_v50 = vadd.f32 %v5800_v5, %v5799_v45 }
 0x4ef   : > { %v3950_v19 = vpop.eup %3949 }
 0x4f0   : > { %v3952_v49 = vpop.eup %3951  ;;  %v2423_v56 = vadd.f32 1.0, %v3950_v19 }
 0x4f1   : > { %v2424_v63 = vadd.f32 1.0, %v3952_v49 }
 0x4f2   : > { %3953 = vrcp.f32 %v2423_v56  ;;  %v2436_v33 = vand.u32 2147483648, %v2423_v56  ;;  %v2434_v31 = vand.u32 2147483647, %v2423_v56  ;;  %vm2430_vm1 = vweird.f32 %v2423_v56 }
 0x4f3   : > { %3955 = vrcp.f32 %v2424_v63  ;;  %vm2445_vm5 = vweird.f32 %v2424_v63 }
 0x4f4   : > { %v2437_v41 = vor.u32 1.1754944e-38, %v2436_v33  ;;  %vm2435_vm3 = vcmp.eq.f32.partialorder %v2434_v31, 8.507059e+37  ;;  %v5801_v33 = vld [vmem:[#allocation56_spill] sm:$0xff] }
 0x4f8   : > { %v3954_v20 = vpop.eup %3953 }
 0x4f9   : > { %v3956_v11 = vpop.eup %3955  ;;  %v2426_v55 = vmul.f32 %v3954_v20, %v2423_v56  ;;  %vm2431_vm0 = vweird.f32 %v3954_v20  ;;  %v2449_v56 = vand.u32 2147483647, %v2424_v63 }
 0x4fa   : > { %v2441_v15 = vmul.f32 %v3956_v11, %v2424_v63  ;;  %vm2432_vm2 = vmor %vm2430_vm1, %vm2431_vm0  ;;  %vm2446_vm4 = vweird.f32 %v3956_v11 }
 0x4fb   : > { %v2427_v26 = vsub.f32 1.0, %v2426_v55  ;;  %vm2447_vm6 = vmor %vm2445_vm5, %vm2446_vm4  ;;  %vm2450_vm7 = vcmp.eq.f32.partialorder %v2449_v56, 8.507059e+37 }
 0x4fc   : > { %v2442_v43 = vsub.f32 1.0, %v2441_v15 }
 0x4fd   : > { %v2428_v13 = vmul.f32 %v3954_v20, %v2427_v26  ;;  %v2451_v26 = vand.u32 2147483648, %v2424_v63 }
 0x4fe   : > { %v2443_v19 = vmul.f32 %v3956_v11, %v2442_v43 }
 0x4ff   : > { %v2429_v32 = vadd.f32 %v3954_v20, %v2428_v13  ;;  %v2452_v31 = vor.u32 1.1754944e-38, %v2451_v26 }
 0x500   : > { %v2444_v55 = vadd.f32 %v3956_v11, %v2443_v19 }
 0x501   : > { %v2433_v3 = vsel %vm2432_vm2, %v3954_v20, %v2429_v32 }
 0x502   : > { %v2438_v58 = vsel %vm2435_vm3, %v2437_v41, %v2433_v3  ;;  %v2448_v61 = vsel %vm2447_vm6, %v3956_v11, %v2444_v55 }
 0x503   : > { %v2496_v24 = vmul.f32 %v2495_v34, %v2438_v58  ;;  %v2453_v43 = vsel %vm2450_vm7, %v2452_v31, %v2448_v61  ;;  %v5802_v58 = vld [vmem:[#allocation81_spill] sm:$0xff] }
 0x505   : > { %v2497_v49 = vadd.f32 %v2496_v24, %v722_v50 }
 0x507   : > { %3957 = vtanh.f32 %v2497_v49 }
 0x509   : > { %v2377_v13 = vpop.f32.mrf.mxu1 }
 0x50a   : > { %v2455_v15 = vadd.f32 %v2377_v13, %v5801_v33 }
 0x50c   : > { %v3584_v32 = vmul.f32 -1.442695, %v2455_v15 }
 0x50d   : > { %v3958_v20 = vpop.eup %3957 }
 0x50e   : > { %v2503_v41 = vsub.f32 %v5315_v8, %v3958_v20  ;;  %3959 = vpow2.f32 %v3584_v32 }
 0x50f   : > { %v2390_v34 = vpop.f32.mrf.mxu2 }
 0x510   : > { %v2504_v3 = vmul.f32 %v2503_v41, %v2453_v43  ;;  %v2456_v5 = vadd.f32 %v2390_v34, %v5802_v58  ;;  %v2403_v50 = vpop.f32.mrf.mxu3 }
 0x511   : > { %v2379_v63 = vpop.f32.mrf.mxu1 }
 0x512   : > { %v5387_v24 = vadd.f32 %v3958_v20, %v2504_v3  ;;  %v3585_v19 = vmul.f32 -1.442695, %v2456_v5 }
 0x514   : > { %v2509_v11 = vpack.c.bf16 %v5387_v24, %v5387_v24  ;;  %v3960_v49 = vpop.eup %3959  ;;  %3961 = vpow2.f32 %v3585_v19 }
 0x515   : > { %v2463_v55 = vadd.f32 1.0, %v3960_v49 }
 0x516   : > { %3586 = vst [vmem:[%s4619_s20 + $0x14] sm:$0xf] %v2509_v11  ;;  %2523 = vmatmul.bf16.vlgmr.msra.gmra.mxu0 %v2509_v11  ;;  %2536 = vmatmul.bf16.vlgmr.msra.gmra.mxu1 %v2509_v11 }
 0x517   : > { %2549 = vmatmul.bf16.vlgmr.msrb.gmra.mxu2 %v2509_v11  ;;  %2727 = vmatpush.bf16.msra.mxu0 %v4681_v16  ;;  %3963 = vrcp.f32 %v2463_v55  ;;  %v2392_v8 = vpop.f32.mrf.mxu2  ;;  %v2474_v61 = vand.u32 2147483647, %v2463_v55  ;;  %vm2470_vm9 = vweird.f32 %v2463_v55 }
 0x518   : > { %2740 = vmatpush.bf16.msra.mxu1 %v4684_v18  ;;  %2753 = vmatpush.bf16.msrb.mxu2 %v4698_v35  ;;  %v2405_v26 = vpop.f32.mrf.mxu3  ;;  %v2476_v18 = vand.u32 2147483648, %v2463_v55 }
 0x519   : > { %vm2475_vm11 = vcmp.eq.f32.partialorder %v2474_v61, 8.507059e+37 }
 0x51a   : > { %v3962_v56 = vpop.eup %3961 }
 0x51b   : > { %2728 = vmatpush.bf16.msra.mxu0 %v4695_v29  ;;  %v2464_v13 = vadd.f32 1.0, %v3962_v56 }
 0x51c   : > { %2741 = vmatpush.bf16.msra.mxu1 %v4693_v23  ;;  %2754 = vmatpush.bf16.msrb.mxu2 %v4707_v47 }
 0x51d   : > { %v3964_v33 = vpop.eup %3963  ;;  %3965 = vrcp.f32 %v2464_v13  ;;  %v2491_v43 = vand.u32 2147483648, %v2464_v13  ;;  %vm2485_vm13 = vweird.f32 %v2464_v13 }
 0x51e   : > { %v2466_v15 = vmul.f32 %v3964_v33, %v2463_v55  ;;  %vm2471_vm8 = vweird.f32 %v3964_v33 }
 0x51f   : > { %2729 = vmatpush.bf16.msra.mxu0 %v4704_v39  ;;  %vm2472_vm10 = vmor %vm2470_vm9, %vm2471_vm8  ;;  %v2477_v39 = vor.u32 1.1754944e-38, %v2476_v18 }
 0x520   : > { %2742 = vmatpush.bf16.msra.mxu1 %v4702_v38  ;;  %2755 = vmatpush.bf16.msrb.mxu2 %v4736_v28  ;;  %v2467_v16 = vsub.f32 1.0, %v2466_v15  ;;  %v2499_v28 = vadd.f32 %v5260_v44, %v2403_v50 }
 0x522   : > { %v2468_v35 = vmul.f32 %v3964_v33, %v2467_v16 }
 0x523   : > { %2730 = vmatpush.bf16.msra.mxu0 %v4710_v51  ;;  %v3966_v29 = vpop.eup %3965 }
 0x524   : > { %2743 = vmatpush.bf16.msra.mxu1 %v4713_v54  ;;  %2756 = vmatpush.bf16.msrb.mxu2 %v4747_v48  ;;  %v2481_v23 = vmul.f32 %v3966_v29, %v2464_v13  ;;  %v2469_v47 = vadd.f32 %v3964_v33, %v2468_v35  ;;  %v5803_v48 = vld [vmem:[#allocation82_spill] sm:$0xff]  ;;  %vm2486_vm12 = vweird.f32 %v3966_v29 }
 0x525   : > { %vm2487_vm14 = vmor %vm2485_vm13, %vm2486_vm12 }
 0x526   : > { %v2482_v38 = vsub.f32 1.0, %v2481_v23  ;;  %v2473_v20 = vsel %vm2472_vm10, %v3964_v33, %v2469_v47 }
 0x527   : > { %2731 = vmatpush.bf16.msra.mxu0 %v4720_v0  ;;  %v2478_v31 = vsel %vm2475_vm11, %v2477_v39, %v2473_v20  ;;  %v2489_v0 = vand.u32 2147483647, %v2464_v13  ;;  %v5807_v39 = vld [vmem:[#allocation79_spill] sm:$0xff] }
 0x528   : > { %2744 = vmatpush.bf16.msra.mxu1 %v4724_v2  ;;  %2757 = vmatpush.bf16.msrb.mxu2 %v4768_v12  ;;  %v2500_v51 = vmul.f32 %v2499_v28, %v2478_v31  ;;  %v2483_v54 = vmul.f32 %v3966_v29, %v2482_v38  ;;  %v2492_v12 = vor.u32 1.1754944e-38, %v2491_v43  ;;  %v996_v38 = vadd.f32 %v5807_v39, %v5778_v10 }
 0x529   : > { %vm2490_vm15 = vcmp.eq.f32.partialorder %v2489_v0, 8.507059e+37  ;;  %v5808_v0 = vld [vmem:[#allocation50_spill] sm:$0xff] }
 0x52a   : > { %v2501_v32 = vadd.f32 %v2500_v51, %v5803_v48  ;;  %v2484_v41 = vadd.f32 %v3966_v29, %v2483_v54 }
 0x52b   : > { %2732 = vmatpush.bf16.msra.mxu0 %v4733_v17 }
 0x52c   : > { %2745 = vmatpush.bf16.msra.mxu1 %v4731_v7  ;;  %2758 = vmatpush.bf16.msrb.mxu2 %v4775_v46  ;;  %3967 = vtanh.f32 %v2501_v32  ;;  %v2488_v2 = vsel %vm2487_vm14, %v3966_v29, %v2484_v41  ;;  %v5806_v29 = vld [vmem:[#allocation70_spill] sm:$0xff] }
 0x52f   : > { %2733 = vmatpush.bf16.msra.mxu0 %v4742_v40  ;;  %v2493_v40 = vsel %vm2490_vm15, %v2492_v12, %v2488_v2  ;;  %v967_v2 = vadd.f32 %v5808_v0, %v5780_v37 }
 0x530   : > { %2746 = vmatpush.bf16.msra.mxu1 %v4740_v36  ;;  %2759 = vmatpush.bf16.msrb.mxu2 %v4797_v52  ;;  %v5804_v52 = vld [vmem:[#allocation68_spill] sm:$0xff] }
 0x532   : > { %v3968_v17 = vpop.eup %3967 }
 0x533   : > { %2734 = vmatpush.bf16.msra.mxu0 %v4753_v60  ;;  %v2506_v7 = vsub.f32 %v5348_v53, %v3968_v17  ;;  %v5805_v53 = vld [vmem:[#allocation69_spill] sm:$0xff] }
 0x534   : > { %2747 = vmatpush.bf16.msra.mxu1 %v4756_v62  ;;  %2760 = vmatpush.bf16.msrb.mxu2 %v4804_v30 }
 0x535   : > { %v2507_v46 = vmul.f32 %v2506_v7, %v2493_v40 }
 0x537   : > { %v5419_v34 = vadd.f32 %v3968_v17, %v2507_v46 }
 0x539   : > { %v2512_v36 = vpack.c.bf16 %v5419_v34, %v5419_v34 }
 0x53b   : > { %3587 = vst [vmem:[%s4621_s16 + $0x8] sm:$0xf] %v2512_v36  ;;  %2562 = vmatmul.bf16.vlgmr.msrb.gmra.mxu3 %v2512_v36  ;;  %2575 = vmatmul.bf16.vlgmr.msrb.gmra.mxu0 %v2512_v36 }
 0x53c   : > { %2588 = vmatmul.bf16.vlgmr.msrb.gmra.mxu1 %v2512_v36  ;;  %2766 = vmatpush.bf16.msrb.mxu3 %v4715_v59 }
 0x540   : > { %2767 = vmatpush.bf16.msrb.mxu3 %v4744_v42 }
 0x544   : > { %2768 = vmatpush.bf16.msrb.mxu3 %v4750_v57 }
 0x548   : > { %2769 = vmatpush.bf16.msrb.mxu3 %v4771_v25 }
 0x54c   : > { %2770 = vmatpush.bf16.msrb.mxu3 %v5724_v1 }
 0x550   : > { %2771 = vmatpush.bf16.msrb.mxu3 %v5786_v4 }
 0x554   : > { %2772 = vmatpush.bf16.msrb.mxu3 %v5789_v9 }
 0x558   : > { %2773 = vmatpush.bf16.msrb.mxu3 %v5792_v21 }
 0x593   : > { %v2524_v60 = vpop.f32.mrf.mxu0  ;;  %v2537_v62 = vpop.f32.mrf.mxu1 }
 0x594   : > { %v2601_v30 = vadd.f32 %v2524_v60, %v5804_v52  ;;  %v2602_v59 = vadd.f32 %v2537_v62, %v5805_v53 }
 0x596   : > { %v3588_v3 = vmul.f32 -1.442695, %v2601_v30  ;;  %v3589_v42 = vmul.f32 -1.442695, %v2602_v59 }
 0x598   : > { %3969 = vpow2.f32 %v3588_v3 }
 0x599   : > { %3971 = vpow2.f32 %v3589_v42 }
 0x59a   : > { %v2550_v57 = vpop.f32.mrf.mxu2 }
 0x59b   : > { %v2526_v25 = vpop.f32.mrf.mxu0  ;;  %v2539_v58 = vpop.f32.mrf.mxu1  ;;  %v2681_v16 = vadd.f32 %v5232_v22, %v2550_v57 }
 0x59e   : > { %v3970_v1 = vpop.eup %3969 }
 0x59f   : > { %v3972_v5 = vpop.eup %3971  ;;  %v2609_v4 = vadd.f32 1.0, %v3970_v1 }
 0x5a0   : > { %v2610_v50 = vadd.f32 1.0, %v3972_v5 }
 0x5a1   : > { %3973 = vrcp.f32 %v2609_v4  ;;  %v2622_v55 = vand.u32 2147483648, %v2609_v4  ;;  %v2620_v26 = vand.u32 2147483647, %v2609_v4  ;;  %vm2616_vm1 = vweird.f32 %v2609_v4 }
 0x5a2   : > { %3975 = vrcp.f32 %v2610_v50  ;;  %v2552_v9 = vpop.f32.mrf.mxu2  ;;  %v2637_v20 = vand.u32 2147483648, %v2610_v50  ;;  %vm2631_vm5 = vweird.f32 %v2610_v50  ;;  %v2635_v28 = vand.u32 2147483647, %v2610_v50 }
 0x5a3   : > { %v2623_v33 = vor.u32 1.1754944e-38, %v2622_v55  ;;  %vm2621_vm3 = vcmp.eq.f32.partialorder %v2620_v26, 8.507059e+37 }
 0x5a4   : > { %v2638_v32 = vor.u32 1.1754944e-38, %v2637_v20  ;;  %vm2636_vm7 = vcmp.eq.f32.partialorder %v2635_v28, 8.507059e+37 }
 0x5a7   : > { %v3974_v21 = vpop.eup %3973 }
 0x5a8   : > { %v3976_v63 = vpop.eup %3975  ;;  %v2612_v19 = vmul.f32 %v3974_v21, %v2609_v4  ;;  %vm2617_vm0 = vweird.f32 %v3974_v21 }
 0x5a9   : > { %v2627_v49 = vmul.f32 %v3976_v63, %v2610_v50  ;;  %vm2618_vm2 = vmor %vm2616_vm1, %vm2617_vm0  ;;  %vm2632_vm4 = vweird.f32 %v3976_v63 }
 0x5aa   : > { %v2613_v11 = vsub.f32 1.0, %v2612_v19  ;;  %vm2633_vm6 = vmor %vm2631_vm5, %vm2632_vm4 }
 0x5ab   : > { %v2628_v13 = vsub.f32 1.0, %v2627_v49 }
 0x5ac   : > { %v2614_v8 = vmul.f32 %v3974_v21, %v2613_v11  ;;  %v5809_v11 = vld [vmem:[#allocation80_spill] sm:$0xff] }
 0x5ad   : > { %v2629_v61 = vmul.f32 %v3976_v63, %v2628_v13  ;;  %v1025_v49 = vadd.f32 %v5809_v11, %v5782_v6 }
 0x5ae   : > { %v2615_v56 = vadd.f32 %v3974_v21, %v2614_v8 }
 0x5af   : > { %v2630_v47 = vadd.f32 %v3976_v63, %v2629_v61 }
 0x5b0   : > { %v2619_v15 = vsel %vm2618_vm2, %v3974_v21, %v2615_v56 }
 0x5b1   : > { %v2624_v18 = vsel %vm2621_vm3, %v2623_v33, %v2619_v15  ;;  %v2634_v48 = vsel %vm2633_vm6, %v3976_v63, %v2630_v47  ;;  %v5810_v47 = vld [vmem:[#allocation71_spill] sm:$0xff] }
 0x5b2   : > { %v2682_v35 = vmul.f32 %v2681_v16, %v2624_v18  ;;  %v2639_v17 = vsel %vm2636_vm7, %v2638_v32, %v2634_v48  ;;  %v669_v39 = vadd.f32 %v5810_v47, %v5795_v27 }
 0x5b4   : > { %v2683_v23 = vadd.f32 %v2682_v35, %v5806_v29 }
 0x5b6   : > { %3977 = vtanh.f32 %v2683_v23 }
 0x5b8   : > { %v2576_v31 = vpop.f32.mrf.mxu0 }
 0x5b9   : > { %v2642_v51 = vadd.f32 %v2576_v31, %v996_v38  ;;  %v2589_v54 = vpop.f32.mrf.mxu1  ;;  %v5811_v38 = vld [vmem:[#allocation73_spill] sm:$0xff] }
 0x5ba   : > { %v2685_v21 = vadd.f32 %v5260_v44, %v2589_v54  ;;  %v698_v20 = vadd.f32 %v5811_v38, %v5797_v14 }
 0x5bb   : > { %v3591_v43 = vmul.f32 -1.442695, %v2642_v51 }
 0x5bc   : > { %v3978_v22 = vpop.eup %3977 }
 0x5bd   : > { %v2689_v41 = vsub.f32 %v5387_v24, %v3978_v22  ;;  %3979 = vpow2.f32 %v3591_v43 }
 0x5be   : > { %v2563_v12 = vpop.f32.mrf.mxu3 }
 0x5bf   : > { %v2690_v10 = vmul.f32 %v2689_v41, %v2639_v17  ;;  %v2641_v7 = vadd.f32 %v2563_v12, %v967_v2 }
 0x5c0   : > { %v2578_v46 = vpop.f32.mrf.mxu0 }
 0x5c1   : > { %v5441_v40 = vadd.f32 %v3978_v22, %v2690_v10  ;;  %v3590_v36 = vmul.f32 -1.442695, %v2641_v7  ;;  %v2591_v60 = vpop.f32.mrf.mxu1 }
 0x5c3   : > { %v2695_v62 = vpack.c.bf16 %v5441_v40, %v5441_v40  ;;  %3981 = vpow2.f32 %v3590_v36  ;;  %v3980_v24 = vpop.eup %3979 }
 0x5c4   : > { %v2650_v30 = vadd.f32 1.0, %v3980_v24 }
 0x5c5   : > { %3592 = vst [vmem:[%s4619_s20 + $0x18] sm:$0xf] %v2695_v62  ;;  %2709 = vmatmul.bf16.vlgmr.msra.gmra.mxu2 %v2695_v62  ;;  %2722 = vmatmul.bf16.vlgmr.msra.gmra.mxu3 %v2695_v62 }
 0x5c6   : > { %2735 = vmatmul.bf16.vlgmr.msra.gmra.mxu0 %v2695_v62  ;;  %v2565_v37 = vpop.f32.mrf.mxu3  ;;  %v2677_v13 = vand.u32 2147483648, %v2650_v30  ;;  %vm2671_vm13 = vweird.f32 %v2650_v30  ;;  %v2675_v33 = vand.u32 2147483647, %v2650_v30 }
 0x5c8   : > { %v2678_v44 = vor.u32 1.1754944e-38, %v2677_v13  ;;  %vm2676_vm15 = vcmp.eq.f32.partialorder %v2675_v33, 8.507059e+37 }
 0x5c9   : > { %v3982_v52 = vpop.eup %3981 }
 0x5ca   : > { %v2649_v53 = vadd.f32 1.0, %v3982_v52  ;;  %v4011_v52 = vld [vmem:[%s5555_s5] ss:$0 sm:$0xff] }
 0x5cc   : > { %3983 = vrcp.f32 %v2649_v53  ;;  %v2662_v58 = vand.u32 2147483648, %v2649_v53  ;;  %v2660_v5 = vand.u32 2147483647, %v2649_v53  ;;  %vm2656_vm9 = vweird.f32 %v2649_v53 }
 0x5cd   : > { %3985 = vrcp.f32 %v2650_v30 }
 0x5ce   : > { %v2663_v9 = vor.u32 1.1754944e-38, %v2662_v58  ;;  %vm2661_vm11 = vcmp.eq.f32.partialorder %v2660_v5, 8.507059e+37 }
 0x5d2   : > { %v3984_v59 = vpop.eup %3983 }
 0x5d3   : > { %v3986_v3 = vpop.eup %3985  ;;  %v2652_v42 = vmul.f32 %v3984_v59, %v2649_v53  ;;  %vm2657_vm8 = vweird.f32 %v3984_v59 }
 0x5d4   : > { %v2667_v25 = vmul.f32 %v3986_v3, %v2650_v30  ;;  %vm2658_vm10 = vmor %vm2656_vm9, %vm2657_vm8  ;;  %vm2672_vm12 = vweird.f32 %v3986_v3 }
 0x5d5   : > { %v2653_v57 = vsub.f32 1.0, %v2652_v42  ;;  %vm2673_vm14 = vmor %vm2671_vm13, %vm2672_vm12 }
 0x5d6   : > { %v2668_v50 = vsub.f32 1.0, %v2667_v25 }
 0x5d7   : > { %v2654_v1 = vmul.f32 %v3984_v59, %v2653_v57 }
 0x5d8   : > { %v2669_v8 = vmul.f32 %v3986_v3, %v2668_v50 }
 0x5d9   : > { %v2655_v4 = vadd.f32 %v3984_v59, %v2654_v1 }
 0x5da   : > { %v2670_v56 = vadd.f32 %v3986_v3, %v2669_v8 }
 0x5db   : > { %v2659_v63 = vsel %vm2658_vm10, %v3984_v59, %v2655_v4 }
 0x5dc   : > { %v2664_v19 = vsel %vm2661_vm11, %v2663_v9, %v2659_v63  ;;  %v2674_v15 = vsel %vm2673_vm14, %v3986_v3, %v2670_v56  ;;  %v5812_v3 = vld [vmem:[#allocation76_spill] sm:$0xff]  ;;  %v5813_v9 = vld [vmem:[#allocation45_spill] sm:$0xff] }
 0x5dd   : > { %v2686_v55 = vmul.f32 %v2685_v21, %v2664_v19  ;;  %v2679_v35 = vsel %vm2676_vm15, %v2678_v44, %v2674_v15  ;;  %v727_v42 = vadd.f32 %v5812_v3, %v5799_v45  ;;  %v5814_v56 = vld [vmem:[#allocation77_spill] sm:$0xff] }
 0x5df   : > { %v2687_v26 = vadd.f32 %v2686_v55, %v1025_v49 }
 0x5e1   : > { %3987 = vtanh.f32 %v2687_v26 }
 0x5e7   : > { %v3988_v16 = vpop.eup %3987 }
 0x5e8   : > { %v2692_v18 = vsub.f32 %v5419_v34, %v3988_v16 }
 0x5ea   : > { %v2693_v61 = vmul.f32 %v2692_v18, %v2679_v35 }
 0x5ec   : > { %v5450_v6 = vadd.f32 %v3988_v16, %v2693_v61 }
 0x5ee   : > { %v2698_v29 = vpack.c.bf16 %v5450_v6, %v5450_v6 }
 0x5f0   : > { %3593 = vst [vmem:[%s4621_s16 + $0x4] sm:$0xf] %v2698_v29  ;;  %2748 = vmatmul.bf16.vlgmr.msra.gmra.mxu1 %v2698_v29  ;;  %2761 = vmatmul.bf16.vlgmr.msrb.gmra.mxu2 %v2698_v29 }
 0x5f1   : > { %2774 = vmatmul.bf16.vlgmr.msrb.gmra.mxu3 %v2698_v29 }
 0x643   : > { %v2736_v23 = vpop.f32.mrf.mxu0 }
 0x644   : > { %v2866_v30 = vadd.f32 %v4011_v52, %v2736_v23 }
 0x648   : > { %v2710_v28 = vpop.f32.mrf.mxu2  ;;  %v2723_v34 = vpop.f32.mrf.mxu3 }
 0x649   : > { %v2786_v31 = vadd.f32 %v2710_v28, %v669_v39  ;;  %v2787_v51 = vadd.f32 %v2723_v34, %v698_v20 }
 0x64b   : > { %v3594_v54 = vmul.f32 -1.442695, %v2786_v31  ;;  %v3595_v48 = vmul.f32 -1.442695, %v2787_v51  ;;  %v2738_v22 = vpop.f32.mrf.mxu0 }
 0x64d   : > { %3989 = vpow2.f32 %v3594_v54 }
 0x64e   : > { %3991 = vpow2.f32 %v3595_v48 }
 0x650   : > { %v2712_v32 = vpop.f32.mrf.mxu2  ;;  %v2725_v41 = vpop.f32.mrf.mxu3 }
 0x653   : > { %v3990_v43 = vpop.eup %3989 }
 0x654   : > { %v3992_v0 = vpop.eup %3991  ;;  %v2794_v2 = vadd.f32 1.0, %v3990_v43  ;;  %v4012_v43 = vld [vmem:[%s5555_s5 + $0x1] ss:$0 sm:$0xff] }
 0x655   : > { %v2795_v17 = vadd.f32 1.0, %v3992_v0 }
 0x656   : > { %3993 = vrcp.f32 %v2794_v2  ;;  %v2807_v7 = vand.u32 2147483648, %v2794_v2  ;;  %v2805_v60 = vand.u32 2147483647, %v2794_v2  ;;  %vm2801_vm1 = vweird.f32 %v2794_v2 }
 0x657   : > { %3995 = vrcp.f32 %v2795_v17  ;;  %v2822_v5 = vand.u32 2147483648, %v2795_v17  ;;  %vm2816_vm5 = vweird.f32 %v2795_v17  ;;  %v2820_v4 = vand.u32 2147483647, %v2795_v17 }
 0x658   : > { %v2808_v24 = vor.u32 1.1754944e-38, %v2807_v7  ;;  %vm2806_vm3 = vcmp.eq.f32.partialorder %v2805_v60, 8.507059e+37 }
 0x659   : > { %v2823_v11 = vor.u32 1.1754944e-38, %v2822_v5  ;;  %vm2821_vm7 = vcmp.eq.f32.partialorder %v2820_v4, 8.507059e+37 }
 0x65c   : > { %v3994_v27 = vpop.eup %3993 }
 0x65d   : > { %v3996_v10 = vpop.eup %3995  ;;  %v2797_v14 = vmul.f32 %v3994_v27, %v2794_v2  ;;  %vm2802_vm0 = vweird.f32 %v3994_v27 }
 0x65e   : > { %v2812_v46 = vmul.f32 %v3996_v10, %v2795_v17  ;;  %vm2803_vm2 = vmor %vm2801_vm1, %vm2802_vm0  ;;  %vm2817_vm4 = vweird.f32 %v3996_v10 }
 0x65f   : > { %v2798_v12 = vsub.f32 1.0, %v2797_v14  ;;  %vm2818_vm6 = vmor %vm2816_vm5, %vm2817_vm4 }
 0x660   : > { %v2813_v37 = vsub.f32 1.0, %v2812_v46 }
 0x661   : > { %v2799_v36 = vmul.f32 %v3994_v27, %v2798_v12 }
 0x662   : > { %v2814_v25 = vmul.f32 %v3996_v10, %v2813_v37 }
 0x663   : > { %v2800_v62 = vadd.f32 %v3994_v27, %v2799_v36 }
 0x664   : > { %v2815_v1 = vadd.f32 %v3996_v10, %v2814_v25 }
 0x665   : > { %v2804_v53 = vsel %vm2803_vm2, %v3994_v27, %v2800_v62 }
 0x666   : > { %v2809_v59 = vsel %vm2806_vm3, %v2808_v24, %v2804_v53  ;;  %v2819_v63 = vsel %vm2818_vm6, %v3996_v10, %v2815_v1  ;;  %v5815_v10 = vld [vmem:[#allocation78_spill] sm:$0xff] }
 0x667   : > { %v2867_v57 = vmul.f32 %v2866_v30, %v2809_v59  ;;  %v2824_v55 = vsel %vm2821_vm7, %v2823_v11, %v2819_v63 }
 0x669   : > { %v2868_v58 = vadd.f32 %v2867_v57, %v727_v42 }
 0x66b   : > { %3997 = vtanh.f32 %v2868_v58 }
 0x66d   : > { %v2749_v50 = vpop.f32.mrf.mxu1 }
 0x66e   : > { %v2826_v21 = vadd.f32 %v2749_v50, %v5813_v9 }
 0x670   : > { %v3596_v49 = vmul.f32 -1.442695, %v2826_v21 }
 0x671   : > { %v3998_v19 = vpop.eup %3997 }
 0x672   : > { %v2874_v45 = vsub.f32 %v5441_v40, %v3998_v19  ;;  %3999 = vpow2.f32 %v3596_v49 }
 0x673   : > { %v2762_v26 = vpop.f32.mrf.mxu2 }
 0x674   : > { %v2875_v8 = vmul.f32 %v2874_v45, %v2824_v55  ;;  %v2827_v13 = vadd.f32 %v2762_v26, %v5814_v56  ;;  %v2775_v33 = vpop.f32.mrf.mxu3 }
 0x675   : > { %v2751_v16 = vpop.f32.mrf.mxu1  ;;  %v2870_v0 = vadd.f32 %v4012_v43, %v2775_v33 }
 0x676   : > { %v2876_v15 = vadd.f32 %v3998_v19, %v2875_v8  ;;  %v3597_v44 = vmul.f32 -1.442695, %v2827_v13 }
 0x678   : > { %v2880_v18 = vpack.c.bf16 %v2876_v15, %v2876_v15  ;;  %2885 = vst [vmem:[#allocation4] sm:$0xff] %v2876_v15  ;;  %v4000_v35 = vpop.eup %3999  ;;  %4001 = vpow2.f32 %v3597_v44 }
 0x679   : > { %v2834_v61 = vadd.f32 1.0, %v4000_v35 }
 0x67a   : > { %3598 = vst [vmem:[%s4619_s20 + $0x1c] sm:$0xf] %v2880_v18 }
 0x67b   : > { %4003 = vrcp.f32 %v2834_v61  ;;  %v2764_v29 = vpop.f32.mrf.mxu2  ;;  %v2847_v28 = vand.u32 2147483648, %v2834_v61  ;;  %v2845_v31 = vand.u32 2147483647, %v2834_v61  ;;  %vm2841_vm9 = vweird.f32 %v2834_v61 }
 0x67c   : > { %v2777_v23 = vpop.f32.mrf.mxu3 }
 0x67d   : > { %v2848_v22 = vor.u32 1.1754944e-38, %v2847_v28  ;;  %vm2846_vm11 = vcmp.eq.f32.partialorder %v2845_v31, 8.507059e+37 }
 0x67e   : > { %v4002_v40 = vpop.eup %4001 }
 0x67f   : > { %v2835_v47 = vadd.f32 1.0, %v4002_v40 }
 0x681   : > { %v4004_v39 = vpop.eup %4003  ;;  %4005 = vrcp.f32 %v2835_v47  ;;  %v2862_v7 = vand.u32 2147483648, %v2835_v47  ;;  %vm2856_vm13 = vweird.f32 %v2835_v47  ;;  %v2860_v46 = vand.u32 2147483647, %v2835_v47 }
 0x682   : > { %v2837_v38 = vmul.f32 %v4004_v39, %v2834_v61  ;;  %vm2842_vm8 = vweird.f32 %v4004_v39 }
 0x683   : > { %vm2843_vm10 = vmor %vm2841_vm9, %vm2842_vm8  ;;  %v2863_v62 = vor.u32 1.1754944e-38, %v2862_v7  ;;  %vm2861_vm15 = vcmp.eq.f32.partialorder %v2860_v46, 8.507059e+37 }
 0x684   : > { %v2838_v20 = vsub.f32 1.0, %v2837_v38 }
 0x686   : > { %v2839_v34 = vmul.f32 %v4004_v39, %v2838_v20 }
 0x687   : > { %v4006_v51 = vpop.eup %4005 }
 0x688   : > { %v2852_v54 = vmul.f32 %v4006_v51, %v2835_v47  ;;  %v2840_v48 = vadd.f32 %v4004_v39, %v2839_v34  ;;  %vm2857_vm12 = vweird.f32 %v4006_v51 }
 0x689   : > { %vm2858_vm14 = vmor %vm2856_vm13, %vm2857_vm12 }
 0x68a   : > { %v2853_v32 = vsub.f32 1.0, %v2852_v54  ;;  %v2844_v41 = vsel %vm2843_vm10, %v4004_v39, %v2840_v48 }
 0x68b   : > { %v2849_v2 = vsel %vm2846_vm11, %v2848_v22, %v2844_v41 }
 0x68c   : > { %v2871_v17 = vmul.f32 %v2870_v0, %v2849_v2  ;;  %v2854_v27 = vmul.f32 %v4006_v51, %v2853_v32 }
 0x68e   : > { %v2872_v14 = vadd.f32 %v2871_v17, %v5815_v10  ;;  %v2855_v12 = vadd.f32 %v4006_v51, %v2854_v27 }
 0x690   : > { %4007 = vtanh.f32 %v2872_v14  ;;  %v2859_v36 = vsel %vm2858_vm14, %v4006_v51, %v2855_v12 }
 0x691   : > { %v2864_v37 = vsel %vm2861_vm15, %v2863_v62, %v2859_v36 }
 0x696   : > { %v4008_v60 = vpop.eup %4007 }
 0x697   : > { %v2877_v24 = vsub.f32 %v5450_v6, %v4008_v60 }
 0x699   : > { %v2878_v52 = vmul.f32 %v2877_v24, %v2864_v37 }
 0x69b   : > { %v2879_v30 = vadd.f32 %v4008_v60, %v2878_v52  ;;  %2890 = sbr.rel (%p3599_p5) target bundleno = 1698 (0x6a2), region = 72 }
 0x69d   : > { %v2883_v53 = vpack.c.bf16 %v2879_v30, %v2879_v30  ;;  %2886 = vst [vmem:[#allocation4 + $0x8] sm:$0xff] %v2879_v30 }
 0x69f   : > { %2884 = vst [vmem:[%s4621_s16] sm:$0xf] %v2883_v53 }
 0x6a0   : > { %2891 = vst [vmem:[#allocation17] sm:$0xff] %v2876_v15 }
 0x6a1   : > { %2893 = vst [vmem:[#allocation17 + $0x8] sm:$0xff] %v2879_v30 }
 0x6a2 PF: > { %s2924_s22 = ssub.s32 1, %s4427_s12  ;;  %s2930_s19 = sshll.u32 %s4621_s16, 4  ;;  %s2931_s19 = int_to_ptr.vmem [resolvable:$true] %s2930_s19 }
 0x6a3   : > { %s3717_s13 = sshll.u32 %s2924_s22, 5  ;;  %s3716_s27 = sshll.u32 %s4427_s12, 5 }
 0x6a4   : > { %s2929_s0 = scalar_lea.hbm %s5557_s7, %s3717_s13  ;;  %s2900_s3 = scalar_lea.sflag [#allocation16], %s367_s10 }
 0x6a5   : > { %s2932_s15 = sshll.u32 %s2929_s0, 4  ;;  %s4183_s16 = scalar_lea.hbm %s5557_s7, 64  ;;  %s2933_s15 = int_to_ptr.hbm [resolvable:$true] %s2932_s15 }
 0x6a6   : > { %s4177_s21 = sshra.s32 %s2933_s15, 4  ;;  %s4178_s21 = int_to_ptr.hbm [resolvable:$true] %s4177_s21 }
 0x6a7   : > { %s4179_s14 = scalar_lea.hbm %s4178_s21, 32  ;;  %p4184_p11 = scmp.lt.s32.totalorder %s4178_s21, %s5557_s7 }
 0x6a8   : > { %p4180_p2 = scmp.ne.s32.totalorder %s4178_s21, %s4179_s14  ;;  %p4185_p0 = scmp.lt.s32.totalorder %s4183_s16, %s4179_s14 }
 0x6aa   : > { %p4181_p6 = pnand %p4180_p2, %p4562_p13  ;;  %p4186_p3 = por %p4185_p0, %p4184_p11 }
 0x6ac   : > { %p4182_p12 = pneg %p4181_p6 }
 0x6ae   : > { %p4187_p7 = pnand %p4186_p3, %p4182_p12 }
 0x6b0   : > { %4190 = shalt.err (!%p4187_p7)
}
 0x6b1   : > { %s4341_s10 = smov 64   ;;  %s4342_s13 = smov 4  }
 0x6b2   : > { %3735 = dma.vmem_to_hbm [thread:$0]  (%p4562_p13), %s2931_s19, 512, %s2933_s15, %s2900_s3, %s4341_s10, %s4341_s10, %s4342_s13  }
 0x6b3   : > { %s2911_s17 = scalar_lea.hbm %s5556_s6, %s3716_s27  ;;  %s2912_s23 = sshll.u32 %s4619_s20, 4  ;;  %s2913_s23 = int_to_ptr.vmem [resolvable:$true] %s2912_s23 }
 0x6b4   : > { %s2914_s22 = sshll.u32 %s2911_s17, 4  ;;  %s2895_s21 = scalar_lea.sflag [#allocation7], %s4591_s2  ;;  %s2915_s22 = int_to_ptr.hbm [resolvable:$true] %s2914_s22 }
 0x6b5   : > { %s4205_s14 = sshra.s32 %s2915_s22, 4  ;;  %s4211_s4 = scalar_lea.hbm %s5556_s6, 64  ;;  %s4206_s14 = int_to_ptr.hbm [resolvable:$true] %s4205_s14 }
 0x6b6   : > { %s4207_s16 = scalar_lea.hbm %s4206_s14, 32  ;;  %p4212_p13 = scmp.lt.s32.totalorder %s4206_s14, %s5556_s6 }
 0x6b7   : > { %p4208_p10 = scmp.ne.s32.totalorder %s4206_s14, %s4207_s16  ;;  %p4213_p1 = scmp.lt.s32.totalorder %s4211_s4, %s4207_s16 }
 0x6b9   : > { %p4209_p9 = pnand %p4208_p10, %p4490_p8  ;;  %p4214_p5 = por %p4213_p1, %p4212_p13 }
 0x6bb   : > { %p4210_p4 = pneg %p4209_p9 }
 0x6bd   : > { %p4215_p2 = pnand %p4214_p5, %p4210_p4 }
 0x6bf   : > { %4218 = shalt.err (!%p4215_p2)
}
 0x6c0   : > { %3734 = dma.vmem_to_hbm [thread:$0]  (%p4490_p8), %s2913_s23, 512, %s2915_s22, %s2895_s21, %s4341_s10, %s4341_s10, %s4342_s13  }
 0x6c1   : > { %s4343_s2 = smov [#allocation17]   ;;  %s2946_s1 = sshll.u32 %s5558_s8, 4  ;;  %s2947_s1 = int_to_ptr.hbm [resolvable:$true] %s2946_s1 }
 0x6c2   : > { %s2944_s20 = sshll.u32 %s4343_s2, 4  ;;  %s4344_s26 = smov 128   ;;  %s2945_s20 = int_to_ptr.vmem [resolvable:$true] %s2944_s20 }
 0x6c3   : > { %s4345_s0 = smov 8   ;;  %p5816_p6 = scmp.eq.s32.totalorder %s4427_s12, 1 }
 0x6c5   : > { %3737 = dma.vmem_to_hbm [thread:$0]  (%p5816_p6), %s2945_s20, 256, %s2947_s1, [#allocation16], %s4344_s26, %s4344_s26, %s4345_s0  }
 0x6c6   : > { %p5817_p12 = pmov %p5816_p6 }
 0x6c7   : > { %p5818_p11 = pmov %p5816_p6 }
 0x6c8   : > { %4292 = dma.done.wait (%p5817_p12), [#allocation16], 256  }
 0x6c9   : > { %4294 = vsyncadd (%p5818_p11), [#allocation16], 4294967040 }
 0x6ca PF: > { %s5819_s24 = sld [smem:[#allocation26_spill]]  ;;  %s2966_s10 = sand.u32 1, %s4317_s30  }
 0x6cb   : > { %p5821_p0 = scmp.ge.s32.totalorder %s4329_s11, 2  ;;  %s2967_s13 = scalar_lea.sflag [#allocation7], %s2966_s10 }
 0x6d0   : > { %p5820_p8 = scmp.ne.s32.totalorder %s5819_s24, 0 }
 0x6d2   : > { %p3760_p3 = pnand %p5821_p0, %p5820_p8 }
 0x6d4   : > { %p3761_p7 = pneg %p3760_p3 }
 0x6d6   : > { %4296 = dma.done.wait (%p3761_p7), %s2967_s13, 512  }
 0x6d7   : > { %4298 = vsyncadd (%p3761_p7), %s2967_s13, 4294966784  ;;  %s5822_s17 = sadd.s32 4294967294, %s4329_s11   ;;  %s5823_s23 = sld [smem:[#allocation27_spill]] }
 0x6d8   : > { %s2976_s22 = sand.u32 1, %s5822_s17   ;;  %p5825_p9 = pmov %p5821_p0 }
 0x6d9   : > { %s2977_s12 = scalar_lea.sflag [#allocation16], %s2976_s22 }
 0x6dd   : > { %p5824_p10 = scmp.ne.s32.totalorder %s5823_s23, 0 }
 0x6df   : > { %p3763_p4 = pnand %p5825_p9, %p5824_p10 }
 0x6e1   : > { %p3764_p13 = pneg %p3763_p4 }
 0x6e3   : > { %4300 = dma.done.wait (%p3764_p13), %s2977_s12, 512  }
 0x6e4   : > { %4302 = vsyncadd (%p3764_p13), %s2977_s12, 4294966784  ;;  %s5826_s30 = sld [smem:[#allocation29_spill]]  ;;  %p29_p1 = scmp.ge.s32.totalorder %s4539_s25, 4  }
 0x6e5   : > { %s5827_s21 = sld [smem:[#allocation25_spill]]  ;;  %s5829_s27 = smov %s4309_s28 }
 0x6e6   : > { %s5828_s10 = sld [smem:[#allocation28_spill]]  ;;  %s5830_s28 = smov %s4313_s29 }
 0x6e7   : > { %s5834_s11 = smov %s4539_s25  ;;  %31 = sbr.rel (!%p29_p1) target bundleno = 18 (0x12), region = 181 }
 0x6ea   : > { %s5831_s29 = smov %s5826_s30  ;;  %s5832_s30 = smov %s4321_s9 }
 0x6eb   : > { %s5833_s9 = smov %s5827_s21 }
 0x6ec   :  { %2983 = vsyncpa [#allocation6], 1 }
 0x6ed   :  { %2985 = vsyncpa [#allocation6 + $0x1], 1 }
 0x6ee   :  { %2986 = vsyncpa [#allocation9], 1 }
 0x6ef   :  { %2988 = vsyncpa [#allocation9 + $0x1], 1 }
 0x6f0   :  { %2989 = vsyncpa [#allocation12], 1 }
 0x6f1   :  { %2990 = vsyncpa [#allocation7], 1 }
 0x6f2   :  { %2992 = vsyncpa [#allocation7 + $0x1], 1 }
 0x6f3   :  { %2993 = vsyncpa [#allocation16], 1 }
 0x6f4   :  { %2995 = vsyncpa [#allocation16 + $0x1], 1 }

</bundles_post_ra>
